<compile_context>
chip_gen: v7x
topology: tpu7x:2x2x1
jax: 0.10.0
libtpu: 0.0.40
codegen_flags: <defaults>
</compile_context>

<pallas_src>
import functools
import math

import jax
import jax.numpy as jnp
from jax.experimental import pallas as pl
from jax.experimental.pallas import tpu as pltpu

COND_DIM = 1
LATENT_DIM = 100
CHANNELS = 1
IMG_SIZE = 28
IMG_PIX = CHANNELS * IMG_SIZE * IMG_SIZE   # 784
IN_DIM = COND_DIM + LATENT_DIM             # 101
IN_PAD = 128                               # 101 padded to one lane tile
OUT_PAD = 896                              # 784 padded to 7 * 128 lanes
BN_EPS = 0.8                               # BatchNorm1d(out_feat, 0.8) -> eps=0.8
LRELU_SLOPE = 0.2


def _leaky_relu(x):
    return jnp.where(x > 0, x, LRELU_SLOPE * x)


def _batchnorm_train(h, gamma, beta):
    # PyTorch BatchNorm1d in training mode: biased batch statistics.
    # Scale/shift form: 2 reductions + one full-width h*scale + shift pass.
    m = jnp.mean(h, axis=0, keepdims=True)
    v = jnp.maximum(jnp.mean(h * h, axis=0, keepdims=True) - m * m, 0.0)
    scale = gamma * jax.lax.rsqrt(v + BN_EPS)
    shift = beta - m * scale
    return h * scale + shift


def _generator_kernel(x_ref, w1_ref, w2_ref, w3_ref, w4_ref, w5_ref, vec_ref,
                      out_ref, *, int8_weights):
    # Packed small vectors (one (16, 1024) f32 tile):
    #   row 0: b1 | 1/2: g2/be2 | 3/4: g3/be3 | 5/6: g4/be4 | 7: b5
    #   rows 8..11: per-output-channel dequant scales for w2..w5 (int8 mode)
    b1 = vec_ref[0:1, 0:128]
    g2, be2 = vec_ref[1:2, 0:256], vec_ref[2:3, 0:256]
    g3, be3 = vec_ref[3:4, 0:512], vec_ref[4:5, 0:512]
    g4, be4 = vec_ref[5:6, 0:1024], vec_ref[6:7, 0:1024]
    b5 = vec_ref[7:8, 0:OUT_PAD]

    def _matmul(h, w_ref, scale_row):
        if int8_weights:
            # Quantize the tiny (B, K) activation tile (per-tensor), run the
            # int8 MXU path, dequant with act_scale * per-channel weight scale.
            amax = jnp.maximum(jnp.max(jnp.abs(h), keepdims=True), 1e-12)  # (1,1)
            s_act = amax * (1.0 / 127.0)
            q = jnp.clip(jnp.round(h * (127.0 / amax)), -127.0, 127.0)
            q = q.astype(jnp.int8)
            acc = jnp.dot(q, w_ref[...], preferred_element_type=jnp.int32)
            return acc.astype(jnp.float32) * (s_act * scale_row)
        # bf16 fallback path (v7x / unknown chips): bf16 operands, f32 accum.
        return jnp.dot(h.astype(jnp.bfloat16), w_ref[...],
                       preferred_element_type=jnp.float32)

    # block(101 -> 128, normalize=False): Linear + LeakyReLU
    # x arrives zero-padded to 128 lanes; cast the tiny tile to bf16 here.
    h = jnp.dot(x_ref[...].astype(jnp.bfloat16), w1_ref[...],
                preferred_element_type=jnp.float32) + b1
    h = _leaky_relu(h)

    # block(128 -> 256): Linear (bias dropped: cancels in BN) + BN(eps=0.8) + LeakyReLU
    h = _matmul(h, w2_ref, vec_ref[8:9, 0:256])
    h = _leaky_relu(_batchnorm_train(h, g2, be2))

    # block(256 -> 512)
    h = _matmul(h, w3_ref, vec_ref[9:10, 0:512])
    h = _leaky_relu(_batchnorm_train(h, g3, be3))

    # block(512 -> 1024)
    h = _matmul(h, w4_ref, vec_ref[10:11, 0:1024])
    h = _leaky_relu(_batchnorm_train(h, g4, be4))

    # Linear(1024 -> 784, padded to 896) + Tanh
    h = _matmul(h, w5_ref, vec_ref[11:12, 0:OUT_PAD]) + b5
    out_ref[...] = jnp.tanh(h)


def _const_spec(shape):
    nd = len(shape)
    return pl.BlockSpec(shape, lambda i, _nd=nd: (0,) * _nd)


def _supports_int8_mxu():
    """int8 MXU path only on chips we know support it (v5*/v6*); v7x has no
    integer MXU mode, so it (and anything unknown) takes the bf16 path."""
    try:
        kind = jax.devices()[0].device_kind.lower()
    except Exception:
        return False
    return ("v5" in kind) or ("v6" in kind)


def generator_forward(noise, label_embedding, packed, batch_tile=None):
    """Forward pass. If batch_tile is None the whole batch is one BN group
    (exact PyTorch semantics). If batch_tile divides B, the input is treated
    as a stack of independent batches of size batch_tile (one grid step each);
    weights stay resident across the grid so their DMA cost is amortized."""
    # torch.cat((label_embedding, noise), -1)  -- glue in plain JAX
    gen_input = jnp.concatenate([label_embedding, noise], axis=-1)   # (B, 101)
    B = gen_input.shape[0]
    if batch_tile is None:
        batch_tile = B
    assert B % batch_tile == 0, "batch must be a multiple of batch_tile"
    num_tiles = B // batch_tile

    # Zero-pad 101 -> 128 lanes. Kept f32 so 8-row batch tiles stay (8,128)
    # aligned; cast to bf16 inside the kernel (tile is tiny).
    x = jnp.pad(gen_input, ((0, 0), (0, IN_PAD - IN_DIM)))

    w1, w2, w3, w4, w5, vec = packed
    int8_weights = (w2.dtype == jnp.int8)

    in_specs = [
        pl.BlockSpec((batch_tile, IN_PAD), lambda i: (i, 0)),
        _const_spec(w1.shape), _const_spec(w2.shape), _const_spec(w3.shape),
        _const_spec(w4.shape), _const_spec(w5.shape), _const_spec(vec.shape),
    ]
    out_specs = pl.BlockSpec((batch_tile, OUT_PAD), lambda i: (i, 0))

    kernel = functools.partial(_generator_kernel, int8_weights=int8_weights)

    out = pl.pallas_call(
        kernel,
        out_shape=jax.ShapeDtypeStruct((B, OUT_PAD), jnp.float32),
        grid=(num_tiles,),
        in_specs=in_specs,
        out_specs=out_specs,
        compiler_params=pltpu.CompilerParams(
            # batch tiles are independent (BN stats are per tile) -> v7x can
            # shard them across its two TensorCores.
            dimension_semantics=("parallel",),
            vmem_limit_bytes=32 * 1024 * 1024,
        ),
    )(x, w1, w2, w3, w4, w5, vec)

    # Drop the lane padding, then img.view(B, *img_shape) -> NCHW
    return out[:, :IMG_PIX].reshape(B, CHANNELS, IMG_SIZE, IMG_SIZE)


def init_params(key):
    """Deterministic init mirroring the PyTorch module.
    Linear: U(-1/sqrt(fan_in), 1/sqrt(fan_in)); BatchNorm: gamma=1, beta=0."""
    dims = [IN_DIM, 128, 256, 512, 1024, IMG_PIX]
    ks = jax.random.split(key, 2 * (len(dims) - 1))
    p = {}
    for li in range(len(dims) - 1):
        fan_in, fan_out = dims[li], dims[li + 1]
        bound = 1.0 / math.sqrt(fan_in)
        p[f"w{li + 1}"] = jax.random.uniform(
            ks[2 * li], (fan_in, fan_out), jnp.float32, minval=-bound, maxval=bound)
        p[f"b{li + 1}"] = jax.random.uniform(
            ks[2 * li + 1], (fan_out,), jnp.float32, minval=-bound, maxval=bound)
        if li in (1, 2, 3):  # layers followed by BatchNorm1d
            p[f"g{li + 1}"] = jnp.ones((fan_out,), jnp.float32)
            p[f"be{li + 1}"] = jnp.zeros((fan_out,), jnp.float32)
    return p


def pack_params(p, int8_weights=None):
    """Pad weights to lane-aligned shapes; store w2..w5 as int8 with
    per-output-channel scales when the chip has an int8 MXU, else bf16.
    Small vectors (b1, gamma/beta x3, b5) + dequant scale rows are packed into
    one (16, 1024) f32 tile.
    Note: b2/b3/b4 are intentionally not packed -- a bias added immediately
    before batch-axis (training-mode) BatchNorm cancels exactly."""
    if int8_weights is None:
        int8_weights = _supports_int8_mxu()

    def pad_to(a, shape):
        out = jnp.zeros(shape, a.dtype)
        return out.at[tuple(slice(0, s) for s in a.shape)].set(a)

    w1 = pad_to(p["w1"], (IN_PAD, 128)).astype(jnp.bfloat16)
    w5f = pad_to(p["w5"], (1024, OUT_PAD))

    vec = jnp.zeros((16, 1024), jnp.float32)
    vec = vec.at[0, :128].set(p["b1"])
    vec = vec.at[1, :256].set(p["g2"])
    vec = vec.at[2, :256].set(p["be2"])
    vec = vec.at[3, :512].set(p["g3"])
    vec = vec.at[4, :512].set(p["be3"])
    vec = vec.at[5, :1024].set(p["g4"])
    vec = vec.at[6, :1024].set(p["be4"])
    vec = vec.at[7, :IMG_PIX].set(p["b5"])

    if int8_weights:
        def quant_w(w):
            amax = jnp.max(jnp.abs(w), axis=0)                    # per out-channel
            scale = jnp.where(amax > 0, amax / 127.0, 1.0)
            q = jnp.clip(jnp.round(w / scale), -127.0, 127.0).astype(jnp.int8)
            return q, scale.astype(jnp.float32)
        w2, s2 = quant_w(p["w2"])
        w3, s3 = quant_w(p["w3"])
        w4, s4 = quant_w(p["w4"])
        w5, s5 = quant_w(w5f)
        vec = vec.at[8, :256].set(s2)
        vec = vec.at[9, :512].set(s3)
        vec = vec.at[10, :1024].set(s4)
        vec = vec.at[11, :OUT_PAD].set(s5)
    else:
        w2 = p["w2"].astype(jnp.bfloat16)
        w3 = p["w3"].astype(jnp.bfloat16)
        w4 = p["w4"].astype(jnp.bfloat16)
        w5 = w5f.astype(jnp.bfloat16)

    return (w1, w2, w3, w4, w5, vec)


if __name__ == "__main__":
    key = jax.random.PRNGKey(0)
    k_noise, k_label, k_params = jax.random.split(key, 3)

    B = 8
    noise = jax.random.normal(k_noise, (B, LATENT_DIM), jnp.float32)
    label_embedding = jax.random.normal(k_label, (B, COND_DIM), jnp.float32)
    packed = pack_params(init_params(k_params))

    # Single batch: full-batch BN statistics (exact PyTorch training semantics).
    img = generator_forward(noise, label_embedding, packed)
    jax.block_until_ready(img)
    assert img.shape == (B, CHANNELS, IMG_SIZE, IMG_SIZE)
    assert bool(jnp.all(jnp.isfinite(img)))
    assert bool(jnp.all(jnp.abs(img) <= 1.0))

    # Amortized path: a stack of 4 independent batches of 8 in one call;
    # weights stay resident across the batch-tile grid axis (no re-DMA).
    BS = 32
    noise_s = jax.random.normal(k_noise, (BS, LATENT_DIM), jnp.float32)
    label_s = jax.random.normal(k_label, (BS, COND_DIM), jnp.float32)
    img_s = generator_forward(noise_s, label_s, packed, batch_tile=8)
    jax.block_until_ready(img_s)
    assert img_s.shape == (BS, CHANNELS, IMG_SIZE, IMG_SIZE)
    assert bool(jnp.all(jnp.isfinite(img_s)))

    print("KERNEL_OK")
</pallas_src>

<mosaic_0001>
module attributes {stable_mosaic.version = 11 : i64} {
  func.func @_generator_kernel(%arg0: i32, %arg1: memref<8x128xf32, #tpu.memory_space<vmem>>, %arg2: memref<128x128xbf16, #tpu.memory_space<vmem>>, %arg3: memref<128x256xbf16, #tpu.memory_space<vmem>>, %arg4: memref<256x512xbf16, #tpu.memory_space<vmem>>, %arg5: memref<512x1024xbf16, #tpu.memory_space<vmem>>, %arg6: memref<1024x896xbf16, #tpu.memory_space<vmem>>, %arg7: memref<16x1024xf32, #tpu.memory_space<vmem>>, %arg8: memref<8x896xf32, #tpu.memory_space<vmem>>) attributes {dimension_semantics = [#tpu.dimension_semantics<parallel>], iteration_bounds = array<i64: 1>, scalar_prefetch = 0 : i64, scratch_operands = 0 : i64, tpu.core_type = #tpu.core_type<tc>, window_params = [{transform_indices = @transform_0, window_bounds = array<i64: 8, 128>}, {pipeline_mode = #tpu.pipeline_mode<synchronous>, transform_indices = @transform_1, window_bounds = array<i64: 128, 128>}, {pipeline_mode = #tpu.pipeline_mode<synchronous>, transform_indices = @transform_2, window_bounds = array<i64: 128, 256>}, {pipeline_mode = #tpu.pipeline_mode<synchronous>, transform_indices = @transform_3, window_bounds = array<i64: 256, 512>}, {pipeline_mode = #tpu.pipeline_mode<synchronous>, transform_indices = @transform_4, window_bounds = array<i64: 512, 1024>}, {pipeline_mode = #tpu.pipeline_mode<synchronous>, transform_indices = @transform_5, window_bounds = array<i64: 1024, 896>}, {pipeline_mode = #tpu.pipeline_mode<synchronous>, transform_indices = @transform_6, window_bounds = array<i64: 16, 1024>}, {transform_indices = @transform_7, window_bounds = array<i64: 8, 896>}]} {
    %c0 = arith.constant 0 : index
    %c0_0 = arith.constant 0 : index
    %0 = vector.load %arg7[%c0, %c0_0] : memref<16x1024xf32, #tpu.memory_space<vmem>>, vector<1x128xf32>
    %c1 = arith.constant 1 : index
    %c0_1 = arith.constant 0 : index
    %1 = vector.load %arg7[%c1, %c0_1] : memref<16x1024xf32, #tpu.memory_space<vmem>>, vector<1x256xf32>
    %c2 = arith.constant 2 : index
    %c0_2 = arith.constant 0 : index
    %2 = vector.load %arg7[%c2, %c0_2] : memref<16x1024xf32, #tpu.memory_space<vmem>>, vector<1x256xf32>
    %c3 = arith.constant 3 : index
    %c0_3 = arith.constant 0 : index
    %3 = vector.load %arg7[%c3, %c0_3] : memref<16x1024xf32, #tpu.memory_space<vmem>>, vector<1x512xf32>
    %c4 = arith.constant 4 : index
    %c0_4 = arith.constant 0 : index
    %4 = vector.load %arg7[%c4, %c0_4] : memref<16x1024xf32, #tpu.memory_space<vmem>>, vector<1x512xf32>
    %c5 = arith.constant 5 : index
    %c0_5 = arith.constant 0 : index
    %5 = vector.load %arg7[%c5, %c0_5] : memref<16x1024xf32, #tpu.memory_space<vmem>>, vector<1x1024xf32>
    %c6 = arith.constant 6 : index
    %c0_6 = arith.constant 0 : index
    %6 = vector.load %arg7[%c6, %c0_6] : memref<16x1024xf32, #tpu.memory_space<vmem>>, vector<1x1024xf32>
    %c7 = arith.constant 7 : index
    %c0_7 = arith.constant 0 : index
    %7 = vector.load %arg7[%c7, %c0_7] : memref<16x1024xf32, #tpu.memory_space<vmem>>, vector<1x896xf32>
    %c0_8 = arith.constant 0 : index
    %c0_9 = arith.constant 0 : index
    %8 = vector.load %arg1[%c0_8, %c0_9] : memref<8x128xf32, #tpu.memory_space<vmem>>, vector<8x128xf32>
    %9 = arith.truncf %8 : vector<8x128xf32> to vector<8x128xbf16>
    %c0_10 = arith.constant 0 : index
    %c0_11 = arith.constant 0 : index
    %10 = vector.load %arg2[%c0_10, %c0_11] : memref<128x128xbf16, #tpu.memory_space<vmem>>, vector<128x128xbf16>
    %cst = arith.constant dense<0.000000e+00> : vector<8x128xf32>
    %11 = tpu.matmul %9, %10, %cst {dimension_numbers = #tpu.dot_dimension_numbers<[1], [0], [0], [1], [0, 0, 1, 1], [], []>} : vector<8x128xbf16>, vector<128x128xbf16>, vector<8x128xf32> -> vector<8x128xf32>
    %12 = vector.broadcast %0 : vector<1x128xf32> to vector<8x128xf32>
    %13 = arith.addf %11, %12 : vector<8x128xf32>
    %cst_12 = arith.constant 0.000000e+00 : f32
    %14 = vector.broadcast %cst_12 : f32 to vector<8x128xf32>
    %15 = arith.cmpf ogt, %13, %14 : vector<8x128xf32>
    %cst_13 = arith.constant 2.000000e-01 : f32
    %16 = vector.broadcast %cst_13 : f32 to vector<8x128xf32>
    %17 = arith.mulf %16, %13 : vector<8x128xf32>
    %18 = arith.select %15, %13, %17 : vector<8x128xi1>, vector<8x128xf32>
    %19 = arith.truncf %18 : vector<8x128xf32> to vector<8x128xbf16>
    %c0_14 = arith.constant 0 : index
    %c0_15 = arith.constant 0 : index
    %20 = vector.load %arg3[%c0_14, %c0_15] : memref<128x256xbf16, #tpu.memory_space<vmem>>, vector<128x256xbf16>
    %cst_16 = arith.constant dense<0.000000e+00> : vector<8x256xf32>
    %21 = tpu.matmul %19, %20, %cst_16 {dimension_numbers = #tpu.dot_dimension_numbers<[1], [0], [0], [1], [0, 0, 1, 1], [], []>} : vector<8x128xbf16>, vector<128x256xbf16>, vector<8x256xf32> -> vector<8x256xf32>
    %cst_17 = arith.constant dense<0.000000e+00> : vector<256xf32>
    %22 = vector.multi_reduction <add>, %21, %cst_17 [0] : vector<8x256xf32> to vector<256xf32>
    %23 = vector.shape_cast %22 : vector<256xf32> to vector<1x256xf32>
    %cst_18 = arith.constant 8.000000e+00 : f32
    %24 = vector.broadcast %cst_18 : f32 to vector<1x256xf32>
    %25 = arith.divf %23, %24 : vector<1x256xf32>
    %26 = arith.mulf %21, %21 : vector<8x256xf32>
    %cst_19 = arith.constant dense<0.000000e+00> : vector<256xf32>
    %27 = vector.multi_reduction <add>, %26, %cst_19 [0] : vector<8x256xf32> to vector<256xf32>
    %28 = vector.shape_cast %27 : vector<256xf32> to vector<1x256xf32>
    %cst_20 = arith.constant 8.000000e+00 : f32
    %29 = vector.broadcast %cst_20 : f32 to vector<1x256xf32>
    %30 = arith.divf %28, %29 : vector<1x256xf32>
    %31 = arith.mulf %25, %25 : vector<1x256xf32>
    %32 = arith.subf %30, %31 : vector<1x256xf32>
    %cst_21 = arith.constant 0.000000e+00 : f32
    %33 = vector.broadcast %cst_21 : f32 to vector<1x256xf32>
    %34 = arith.maximumf %32, %33 : vector<1x256xf32>
    %cst_22 = arith.constant 8.000000e-01 : f32
    %35 = vector.broadcast %cst_22 : f32 to vector<1x256xf32>
    %36 = arith.addf %34, %35 : vector<1x256xf32>
    %37 = math.rsqrt %36 : vector<1x256xf32>
    %38 = arith.mulf %1, %37 : vector<1x256xf32>
    %39 = arith.mulf %25, %38 : vector<1x256xf32>
    %40 = arith.subf %2, %39 : vector<1x256xf32>
    %41 = vector.broadcast %38 : vector<1x256xf32> to vector<8x256xf32>
    %42 = arith.mulf %21, %41 : vector<8x256xf32>
    %43 = vector.broadcast %40 : vector<1x256xf32> to vector<8x256xf32>
    %44 = arith.addf %42, %43 : vector<8x256xf32>
    %cst_23 = arith.constant 0.000000e+00 : f32
    %45 = vector.broadcast %cst_23 : f32 to vector<8x256xf32>
    %46 = arith.cmpf ogt, %44, %45 : vector<8x256xf32>
    %cst_24 = arith.constant 2.000000e-01 : f32
    %47 = vector.broadcast %cst_24 : f32 to vector<8x256xf32>
    %48 = arith.mulf %47, %44 : vector<8x256xf32>
    %49 = arith.select %46, %44, %48 : vector<8x256xi1>, vector<8x256xf32>
    %50 = arith.truncf %49 : vector<8x256xf32> to vector<8x256xbf16>
    %c0_25 = arith.constant 0 : index
    %c0_26 = arith.constant 0 : index
    %51 = vector.load %arg4[%c0_25, %c0_26] : memref<256x512xbf16, #tpu.memory_space<vmem>>, vector<256x512xbf16>
    %cst_27 = arith.constant dense<0.000000e+00> : vector<8x512xf32>
    %52 = tpu.matmul %50, %51, %cst_27 {dimension_numbers = #tpu.dot_dimension_numbers<[1], [0], [0], [1], [0, 0, 1, 1], [], []>} : vector<8x256xbf16>, vector<256x512xbf16>, vector<8x512xf32> -> vector<8x512xf32>
    %cst_28 = arith.constant dense<0.000000e+00> : vector<512xf32>
    %53 = vector.multi_reduction <add>, %52, %cst_28 [0] : vector<8x512xf32> to vector<512xf32>
    %54 = vector.shape_cast %53 : vector<512xf32> to vector<1x512xf32>
    %cst_29 = arith.constant 8.000000e+00 : f32
    %55 = vector.broadcast %cst_29 : f32 to vector<1x512xf32>
    %56 = arith.divf %54, %55 : vector<1x512xf32>
    %57 = arith.mulf %52, %52 : vector<8x512xf32>
    %cst_30 = arith.constant dense<0.000000e+00> : vector<512xf32>
    %58 = vector.multi_reduction <add>, %57, %cst_30 [0] : vector<8x512xf32> to vector<512xf32>
    %59 = vector.shape_cast %58 : vector<512xf32> to vector<1x512xf32>
    %cst_31 = arith.constant 8.000000e+00 : f32
    %60 = vector.broadcast %cst_31 : f32 to vector<1x512xf32>
    %61 = arith.divf %59, %60 : vector<1x512xf32>
    %62 = arith.mulf %56, %56 : vector<1x512xf32>
    %63 = arith.subf %61, %62 : vector<1x512xf32>
    %cst_32 = arith.constant 0.000000e+00 : f32
    %64 = vector.broadcast %cst_32 : f32 to vector<1x512xf32>
    %65 = arith.maximumf %63, %64 : vector<1x512xf32>
    %cst_33 = arith.constant 8.000000e-01 : f32
    %66 = vector.broadcast %cst_33 : f32 to vector<1x512xf32>
    %67 = arith.addf %65, %66 : vector<1x512xf32>
    %68 = math.rsqrt %67 : vector<1x512xf32>
    %69 = arith.mulf %3, %68 : vector<1x512xf32>
    %70 = arith.mulf %56, %69 : vector<1x512xf32>
    %71 = arith.subf %4, %70 : vector<1x512xf32>
    %72 = vector.broadcast %69 : vector<1x512xf32> to vector<8x512xf32>
    %73 = arith.mulf %52, %72 : vector<8x512xf32>
    %74 = vector.broadcast %71 : vector<1x512xf32> to vector<8x512xf32>
    %75 = arith.addf %73, %74 : vector<8x512xf32>
    %cst_34 = arith.constant 0.000000e+00 : f32
    %76 = vector.broadcast %cst_34 : f32 to vector<8x512xf32>
    %77 = arith.cmpf ogt, %75, %76 : vector<8x512xf32>
    %cst_35 = arith.constant 2.000000e-01 : f32
    %78 = vector.broadcast %cst_35 : f32 to vector<8x512xf32>
    %79 = arith.mulf %78, %75 : vector<8x512xf32>
    %80 = arith.select %77, %75, %79 : vector<8x512xi1>, vector<8x512xf32>
    %81 = arith.truncf %80 : vector<8x512xf32> to vector<8x512xbf16>
    %c0_36 = arith.constant 0 : index
    %c0_37 = arith.constant 0 : index
    %82 = vector.load %arg5[%c0_36, %c0_37] : memref<512x1024xbf16, #tpu.memory_space<vmem>>, vector<512x1024xbf16>
    %cst_38 = arith.constant dense<0.000000e+00> : vector<8x1024xf32>
    %83 = tpu.matmul %81, %82, %cst_38 {dimension_numbers = #tpu.dot_dimension_numbers<[1], [0], [0], [1], [0, 0, 1, 1], [], []>} : vector<8x512xbf16>, vector<512x1024xbf16>, vector<8x1024xf32> -> vector<8x1024xf32>
    %cst_39 = arith.constant dense<0.000000e+00> : vector<1024xf32>
    %84 = vector.multi_reduction <add>, %83, %cst_39 [0] : vector<8x1024xf32> to vector<1024xf32>
    %85 = vector.shape_cast %84 : vector<1024xf32> to vector<1x1024xf32>
    %cst_40 = arith.constant 8.000000e+00 : f32
    %86 = vector.broadcast %cst_40 : f32 to vector<1x1024xf32>
    %87 = arith.divf %85, %86 : vector<1x1024xf32>
    %88 = arith.mulf %83, %83 : vector<8x1024xf32>
    %cst_41 = arith.constant dense<0.000000e+00> : vector<1024xf32>
    %89 = vector.multi_reduction <add>, %88, %cst_41 [0] : vector<8x1024xf32> to vector<1024xf32>
    %90 = vector.shape_cast %89 : vector<1024xf32> to vector<1x1024xf32>
    %cst_42 = arith.constant 8.000000e+00 : f32
    %91 = vector.broadcast %cst_42 : f32 to vector<1x1024xf32>
    %92 = arith.divf %90, %91 : vector<1x1024xf32>
    %93 = arith.mulf %87, %87 : vector<1x1024xf32>
    %94 = arith.subf %92, %93 : vector<1x1024xf32>
    %cst_43 = arith.constant 0.000000e+00 : f32
    %95 = vector.broadcast %cst_43 : f32 to vector<1x1024xf32>
    %96 = arith.maximumf %94, %95 : vector<1x1024xf32>
    %cst_44 = arith.constant 8.000000e-01 : f32
    %97 = vector.broadcast %cst_44 : f32 to vector<1x1024xf32>
    %98 = arith.addf %96, %97 : vector<1x1024xf32>
    %99 = math.rsqrt %98 : vector<1x1024xf32>
    %100 = arith.mulf %5, %99 : vector<1x1024xf32>
    %101 = arith.mulf %87, %100 : vector<1x1024xf32>
    %102 = arith.subf %6, %101 : vector<1x1024xf32>
    %103 = vector.broadcast %100 : vector<1x1024xf32> to vector<8x1024xf32>
    %104 = arith.mulf %83, %103 : vector<8x1024xf32>
    %105 = vector.broadcast %102 : vector<1x1024xf32> to vector<8x1024xf32>
    %106 = arith.addf %104, %105 : vector<8x1024xf32>
    %cst_45 = arith.constant 0.000000e+00 : f32
    %107 = vector.broadcast %cst_45 : f32 to vector<8x1024xf32>
    %108 = arith.cmpf ogt, %106, %107 : vector<8x1024xf32>
    %cst_46 = arith.constant 2.000000e-01 : f32
    %109 = vector.broadcast %cst_46 : f32 to vector<8x1024xf32>
    %110 = arith.mulf %109, %106 : vector<8x1024xf32>
    %111 = arith.select %108, %106, %110 : vector<8x1024xi1>, vector<8x1024xf32>
    %112 = arith.truncf %111 : vector<8x1024xf32> to vector<8x1024xbf16>
    %c0_47 = arith.constant 0 : index
    %c0_48 = arith.constant 0 : index
    %113 = vector.load %arg6[%c0_47, %c0_48] : memref<1024x896xbf16, #tpu.memory_space<vmem>>, vector<1024x896xbf16>
    %cst_49 = arith.constant dense<0.000000e+00> : vector<8x896xf32>
    %114 = tpu.matmul %112, %113, %cst_49 {dimension_numbers = #tpu.dot_dimension_numbers<[1], [0], [0], [1], [0, 0, 1, 1], [], []>} : vector<8x1024xbf16>, vector<1024x896xbf16>, vector<8x896xf32> -> vector<8x896xf32>
    %115 = vector.broadcast %7 : vector<1x896xf32> to vector<8x896xf32>
    %116 = arith.addf %114, %115 : vector<8x896xf32>
    %117 = math.tanh %116 : vector<8x896xf32>
    %c0_50 = arith.constant 0 : index
    %c0_51 = arith.constant 0 : index
    %118 = vector.load %arg8[%c0_50, %c0_51] : memref<8x896xf32, #tpu.memory_space<vmem>>, vector<8x896xf32>
    tpu.vector_store %arg8[%c0_50, %c0_51], %117 {strides = array<i32>} : memref<8x896xf32, #tpu.memory_space<vmem>>, vector<8x896xf32>,
    return
  }
  func.func @transform_0(%arg0: i32) -> (i32, i32) {
    %c0_i32 = arith.constant 0 : i32
    %c0_i32_0 = arith.constant 0 : i32
    return %arg0, %c0_i32 : i32, i32
  }
  func.func @transform_1(%arg0: i32) -> (i32, i32) {
    %c0_i32 = arith.constant 0 : i32
    %c0_i32_0 = arith.constant 0 : i32
    %c0_i32_1 = arith.constant 0 : i32
    return %c0_i32, %c0_i32_0 : i32, i32
  }
  func.func @transform_2(%arg0: i32) -> (i32, i32) {
    %c0_i32 = arith.constant 0 : i32
    %c0_i32_0 = arith.constant 0 : i32
    %c0_i32_1 = arith.constant 0 : i32
    return %c0_i32, %c0_i32_0 : i32, i32
  }
  func.func @transform_3(%arg0: i32) -> (i32, i32) {
    %c0_i32 = arith.constant 0 : i32
    %c0_i32_0 = arith.constant 0 : i32
    %c0_i32_1 = arith.constant 0 : i32
    return %c0_i32, %c0_i32_0 : i32, i32
  }
  func.func @transform_4(%arg0: i32) -> (i32, i32) {
    %c0_i32 = arith.constant 0 : i32
    %c0_i32_0 = arith.constant 0 : i32
    %c0_i32_1 = arith.constant 0 : i32
    return %c0_i32, %c0_i32_0 : i32, i32
  }
  func.func @transform_5(%arg0: i32) -> (i32, i32) {
    %c0_i32 = arith.constant 0 : i32
    %c0_i32_0 = arith.constant 0 : i32
    %c0_i32_1 = arith.constant 0 : i32
    return %c0_i32, %c0_i32_0 : i32, i32
  }
  func.func @transform_6(%arg0: i32) -> (i32, i32) {
    %c0_i32 = arith.constant 0 : i32
    %c0_i32_0 = arith.constant 0 : i32
    %c0_i32_1 = arith.constant 0 : i32
    return %c0_i32, %c0_i32_0 : i32, i32
  }
  func.func @transform_7(%arg0: i32) -> (i32, i32) {
    %c0_i32 = arith.constant 0 : i32
    %c0_i32_0 = arith.constant 0 : i32
    return %arg0, %c0_i32 : i32, i32
  }
}

</mosaic_0001>

<bundles_post_ra>
// kernel: tpu_custom_call.1
= control target key start
LH: loop header
LB: loop body
LE: loop exit
PB: predicated region body
PF: predicated region fallthrough
CT: control target
= control target key end

     0   :  { %12 = vsyncpa [#allocation3], 0  ;;  %s9496_s0 = inlined_call_operand.hbm [shape: f32[8,128], index: 0, kind: input, shape index: {}]   ;;  %s9497_s1 = inlined_call_operand.hbm [shape: bf16[128,128], index: 1, kind: input, shape index: {}]   ;;  %s9498_s2 = inlined_call_operand.hbm [shape: bf16[128,256], index: 2, kind: input, shape index: {}]   ;;  %s9499_s3 = inlined_call_operand.hbm [shape: bf16[256,512], index: 3, kind: input, shape index: {}]   ;;  %s9500_s4 = inlined_call_operand.hbm [shape: bf16[512,1024], index: 4, kind: input, shape index: {}]   ;;  %s9501_s5 = inlined_call_operand.hbm [shape: bf16[1024,896], index: 5, kind: input, shape index: {}]   ;;  %s9502_s6 = inlined_call_operand.hbm [shape: f32[16,1024], index: 6, kind: input, shape index: {}]   ;;  %s9503_s7 = inlined_call_operand.hbm [shape: f32[8,896], index: 7, kind: output, shape index: {}]  }
   0x1   :  { %13 = vsyncpa [#allocation6], 0 }
   0x2   :  { %14 = vsyncpa [#allocation9], 0 }
   0x3   :  { %15 = vsyncpa [#allocation12], 0 }
   0x4   :  { %16 = vsyncpa [#allocation4], 0  ;;  %s8982_s24 = smov [#allocation5]   ;;  %s8796_s28 = scalar_lea.hbm %s9497_s1, 1024 }
   0x5   :  { %s32_s25 = sshll.u32 %s8982_s24, 4  ;;  %p8797_p0 = scmp.ne.s32.totalorder %s9497_s1, %s8796_s28  ;;  %s33_s25 = int_to_ptr.vmem [resolvable:$true] %s32_s25 }
   0x6   :  { %p8800_p1 = scmp.lt.u32.totalorder %s8796_s28, %s9497_s1 }
   0x8   :  { %p8802_p2 = pnand %p8800_p1, %p8797_p0 }
   0xa   :  { %8805 = shalt.err (!%p8802_p2)
}
   0xb   :  { %s8806_s10 = scalar_lea.vmem %s33_s25, 1024  ;;  %p8811_p4 = scmp.lt.s32.totalorder %s33_s25, %s33_s25 }
   0xc   :  { %p8807_p3 = scmp.ne.s32.totalorder %s33_s25, %s8806_s10  ;;  %p8812_p5 = scmp.lt.s32.totalorder %s8806_s10, %s8806_s10 }
   0xe   :  { %p8813_p6 = por %p8812_p5, %p8811_p4 }
  0x10   :  { %p8814_p7 = pnand %p8813_p6, %p8807_p3 }
  0x12   :  { %8817 = shalt.err (!%p8814_p7)
}
  0x13   :  { %s8983_s11 = smov 64   ;;  %s8984_s12 = smov 4  }
  0x14   :  { %38 = dma.hbm_to_vmem [thread:$0]  %s9497_s1, 1024, %s33_s25, [#allocation6], %s8983_s11, %s8983_s11, %s8984_s12  }
  0x15   :  { %s8985_s15 = smov [#allocation8]   ;;  %s8818_s19 = scalar_lea.hbm %s9499_s3, 8192 }
  0x16   :  { %s56_s16 = sshll.u32 %s8985_s15, 4  ;;  %p8819_p8 = scmp.ne.s32.totalorder %s9499_s3, %s8818_s19  ;;  %s57_s16 = int_to_ptr.vmem [resolvable:$true] %s56_s16 }
  0x17   :  { %p8822_p9 = scmp.lt.u32.totalorder %s8818_s19, %s9499_s3 }
  0x19   :  { %p8824_p10 = pnand %p8822_p9, %p8819_p8 }
  0x1b   :  { %8827 = shalt.err (!%p8824_p10)
}
  0x1c   :  { %s8828_s24 = scalar_lea.vmem %s57_s16, 8192  ;;  %p8833_p12 = scmp.lt.s32.totalorder %s57_s16, %s57_s16 }
  0x1d   :  { %p8829_p11 = scmp.ne.s32.totalorder %s57_s16, %s8828_s24  ;;  %p8834_p13 = scmp.lt.s32.totalorder %s8828_s24, %s8828_s24 }
  0x1f   :  { %p8835_p0 = por %p8834_p13, %p8833_p12 }
  0x21   :  { %p8836_p1 = pnand %p8835_p0, %p8829_p11 }
  0x23   :  { %8839 = shalt.err (!%p8836_p1)
}
  0x24   :  { %s8986_s1 = smov 256   ;;  %s8987_s25 = smov 16  }
  0x25   :  { %62 = dma.hbm_to_vmem [thread:$0]  %s9499_s3, 8192, %s57_s16, [#allocation9], %s8986_s1, %s8986_s1, %s8987_s25  }
  0x26   :  { %s8988_s28 = smov [#allocation11]   ;;  %s8840_s9 = scalar_lea.hbm %s9501_s5, 57344 }
  0x27   :  { %s80_s29 = sshll.u32 %s8988_s28, 4  ;;  %p8841_p2 = scmp.ne.s32.totalorder %s9501_s5, %s8840_s9  ;;  %s81_s29 = int_to_ptr.vmem [resolvable:$true] %s80_s29 }
  0x28   :  { %p8844_p3 = scmp.lt.u32.totalorder %s8840_s9, %s9501_s5 }
  0x2a   :  { %p8846_p4 = pnand %p8844_p3, %p8841_p2 }
  0x2c   :  { %8849 = shalt.err (!%p8846_p4)
}
  0x2d   :  { %s8850_s15 = scalar_lea.vmem %s81_s29, 57344  ;;  %p8855_p6 = scmp.lt.s32.totalorder %s81_s29, %s81_s29 }
  0x2e   :  { %p8851_p5 = scmp.ne.s32.totalorder %s81_s29, %s8850_s15  ;;  %p8856_p7 = scmp.lt.s32.totalorder %s8850_s15, %s8850_s15 }
  0x30   :  { %p8857_p8 = por %p8856_p7, %p8855_p6 }
  0x32   :  { %p8858_p9 = pnand %p8857_p8, %p8851_p5 }
  0x34   :  { %8861 = shalt.err (!%p8858_p9)
}
  0x35   :  { %s8989_s3 = smov 448   ;;  %s8990_s16 = smov 28  }
  0x36   :  { %86 = dma.hbm_to_vmem [thread:$0]  %s9501_s5, 57344, %s81_s29, [#allocation12], %s8989_s3, %s8989_s3, %s8990_s16  }
  0x37   :  { %s8991_s19 = smov [#allocation2]   ;;  %s8992_s21 = smov [#allocation7]  }
  0x38   :  { %s23_s20 = sshll.u32 %s8991_s19, 4  ;;  %s44_s22 = sshll.u32 %s8992_s21, 4  ;;  %s24_s20 = int_to_ptr.vmem [resolvable:$true] %s23_s20  ;;  %s45_s22 = int_to_ptr.vmem [resolvable:$true] %s44_s22 }
  0x39   :  { %s8862_s1 = scalar_lea.hbm %s9496_s0, 128 }
  0x3a   :  { %p8863_p10 = scmp.ne.s32.totalorder %s9496_s0, %s8862_s1  ;;  %p8866_p11 = scmp.lt.u32.totalorder %s8862_s1, %s9496_s0 }
  0x3c   :  { %p8868_p12 = pnand %p8866_p11, %p8863_p10 }
  0x3e   :  { %8871 = shalt.err (!%p8868_p12)
}
  0x3f   :  { %s8872_s5 = scalar_lea.vmem %s24_s20, 128  ;;  %p8877_p0 = scmp.lt.s32.totalorder %s24_s20, %s24_s20 }
  0x40   :  { %p8873_p13 = scmp.ne.s32.totalorder %s24_s20, %s8872_s5  ;;  %p8878_p1 = scmp.lt.s32.totalorder %s8872_s5, %s8872_s5 }
  0x42   :  { %p8879_p2 = por %p8878_p1, %p8877_p0 }
  0x44   :  { %p8880_p3 = pnand %p8879_p2, %p8873_p13 }
  0x46   :  { %8883 = shalt.err (!%p8880_p3)
}
  0x47   :  { %26 = dma.hbm_to_vmem [thread:$0]  %s9496_s0, 128, %s24_s20, [#allocation3]  }
  0x48   :  { %s8884_s10 = scalar_lea.hbm %s9498_s2, 2048 }
  0x49   :  { %p8885_p4 = scmp.ne.s32.totalorder %s9498_s2, %s8884_s10  ;;  %p8888_p5 = scmp.lt.u32.totalorder %s8884_s10, %s9498_s2 }
  0x4b   :  { %p8890_p6 = pnand %p8888_p5, %p8885_p4 }
  0x4d   :  { %8893 = shalt.err (!%p8890_p6)
}
  0x4e   :  { %s8894_s3 = scalar_lea.vmem %s45_s22, 2048  ;;  %p8899_p8 = scmp.lt.s32.totalorder %s45_s22, %s45_s22 }
  0x4f   :  { %p8895_p7 = scmp.ne.s32.totalorder %s45_s22, %s8894_s3  ;;  %p8900_p9 = scmp.lt.s32.totalorder %s8894_s3, %s8894_s3 }
  0x51   :  { %p8901_p10 = por %p8900_p9, %p8899_p8 }
  0x53   :  { %p8902_p11 = pnand %p8901_p10, %p8895_p7 }
  0x55   :  { %8905 = shalt.err (!%p8902_p11)
}
  0x56   :  { %s8993_s0 = smov 128   ;;  %s8994_s16 = smov 8  }
  0x57   :  { %50 = dma.hbm_to_vmem [thread:$0]  %s9498_s2, 2048, %s45_s22, [#allocation6], %s8993_s0, %s8993_s0, %s8994_s16  }
  0x58   :  { %s8995_s19 = smov [#allocation10]   ;;  %s8906_s24 = scalar_lea.hbm %s9500_s4, 32768 }
  0x59   :  { %s68_s20 = sshll.u32 %s8995_s19, 4  ;;  %p8907_p12 = scmp.ne.s32.totalorder %s9500_s4, %s8906_s24  ;;  %s69_s20 = int_to_ptr.vmem [resolvable:$true] %s68_s20 }
  0x5a   :  { %p8910_p13 = scmp.lt.u32.totalorder %s8906_s24, %s9500_s4 }
  0x5c   :  { %p8912_p0 = pnand %p8910_p13, %p8907_p12 }
  0x5e   :  { %8915 = shalt.err (!%p8912_p0)
}
  0x5f   :  { %s8916_s28 = scalar_lea.vmem %s69_s20, 32768  ;;  %p8921_p2 = scmp.lt.s32.totalorder %s69_s20, %s69_s20 }
  0x60   :  { %p8917_p1 = scmp.ne.s32.totalorder %s69_s20, %s8916_s28  ;;  %p8922_p3 = scmp.lt.s32.totalorder %s8916_s28, %s8916_s28 }
  0x62   :  { %p8923_p4 = por %p8922_p3, %p8921_p2 }
  0x64   :  { %p8924_p5 = pnand %p8923_p4, %p8917_p1 }
  0x66   :  { %8927 = shalt.err (!%p8924_p5)
}
  0x67   :  { %s8996_s2 = smov 512   ;;  %s8997_s22 = smov 32  }
  0x68   :  { %74 = dma.hbm_to_vmem [thread:$0]  %s9500_s4, 32768, %s69_s20, [#allocation9], %s8996_s2, %s8996_s2, %s8997_s22  }
  0x69   :  { %s8998_s30 = smov [#allocation13]   ;;  %s8928_s12 = scalar_lea.hbm %s9502_s6, 2048 }
  0x6a   :  { %s92_s8 = sshll.u32 %s8998_s30, 4  ;;  %p8929_p6 = scmp.ne.s32.totalorder %s9502_s6, %s8928_s12  ;;  %s93_s8 = int_to_ptr.vmem [resolvable:$true] %s92_s8 }
  0x6b   :  { %p8932_p7 = scmp.lt.u32.totalorder %s8928_s12, %s9502_s6 }
  0x6d   :  { %p8934_p8 = pnand %p8932_p7, %p8929_p6 }
  0x6f   :  { %8937 = shalt.err (!%p8934_p8)
}
  0x70   :  { %s8938_s0 = scalar_lea.vmem %s93_s8, 2048  ;;  %p8943_p10 = scmp.lt.s32.totalorder %s93_s8, %s93_s8 }
  0x71   :  { %p8939_p9 = scmp.ne.s32.totalorder %s93_s8, %s8938_s0  ;;  %p8944_p11 = scmp.lt.s32.totalorder %s8938_s0, %s8938_s0 }
  0x73   :  { %p8945_p12 = por %p8944_p11, %p8943_p10 }
  0x75   :  { %p8946_p13 = pnand %p8945_p12, %p8939_p9 }
  0x77   :  { %8949 = shalt.err (!%p8946_p13)
}
  0x78   :  { %s8999_s4 = smov 1024  }
  0x79   :  { %98 = dma.hbm_to_vmem [thread:$0]  %s9502_s6, 2048, %s93_s8, [#allocation12], %s8999_s4, %s8999_s4, %s8983_s11  }
  0x7a   :  { %8972 = dma.done.wait [#allocation3], 128  }
  0x7b   :  { %8973 = vsyncadd [#allocation3], 4294967168 }
  0x7c   :  { %8974 = dma.done.wait [#allocation6], 3072  }
  0x7d   :  { %8975 = vsyncadd [#allocation6], 4294964224 }
  0x7e   :  { %8976 = dma.done.wait [#allocation9], 40960  }
  0x7f   :  { %8977 = vsyncadd [#allocation9], 4294926336 }
  0x80   :  { %8978 = dma.done.wait [#allocation12], 59392  }
  0x81   :  { %8979 = vsyncadd [#allocation12], 4294907904  ;;  %v9000_v0 = vmov 0.0   ;;  %vm9001_vm0 = vmmov 0   ;;  %v7986_v1 = vld [vmem:[#allocation5] sm:$0xff]   ;;  %v7987_v2 = vld [vmem:[#allocation5 + $0x8] sm:$0xff]  }
  0x82   :  { %7885 = vmatprep.subr.bf16.mxu0 %v9000_v0  ;;  %7901 = vmatprep.mubr.msk.bf16.mxu0 %vm9001_vm0, %v9000_v0  ;;  %v7988_v3 = vld [vmem:[#allocation5 + $0x10] sm:$0xff]   ;;  %v7994_v4 = vld [vmem:[#allocation7 + $0x4] ss:$8 sps:$4 sm:$0xff]   ;;  %v7996_v5 = vld [vmem:[#allocation7] ss:$8 sps:$4 sm:$0xff]   ;;  %v9002_v27 = vmov 0  }
  0x83   :  { %7886 = vmatpush3.bf16.msra.mxu0 %v7986_v1  ;;  %v7989_v6 = vld [vmem:[#allocation5 + $0x18] sm:$0xff]   ;;  %348 = vmatprep.subr.bf16.mxu1 %v7994_v4  ;;  %v8000_v9 = vld [vmem:[#allocation7 + $0x24] ss:$8 sps:$4 sm:$0xff]   ;;  %v8002_v12 = vld [vmem:[#allocation7 + $0x20] ss:$8 sps:$4 sm:$0xff]   ;;  %s9004_s6 = smov [#allocation14]  }
  0x84   :  { %7887 = vmatprep.subr.bf16.mxu0 %v9000_v0  ;;  %v7997_v7 = vld [vmem:[#allocation7 + $0x14] ss:$8 sps:$4 sm:$0xff]   ;;  %349 = vmatpush1.bf16.msra.mxu1 %v7996_v5  ;;  %v7999_v8 = vld [vmem:[#allocation7 + $0x10] ss:$8 sps:$4 sm:$0xff]   ;;  %v7990_v10 = vld [vmem:[#allocation5 + $0x20] sm:$0xff]   ;;  %s6984_s11 = sshll.u32 %s9004_s6, 4  ;;  %s6985_s11 = int_to_ptr.vmem [resolvable:$true] %s6984_s11 }
  0x85   :  { %350 = vmatprep.subr.bf16.mxu1 %v7997_v7  ;;  %v7991_v11 = vld [vmem:[#allocation5 + $0x28] sm:$0xff]   ;;  %v8003_v13 = vld [vmem:[#allocation7 + $0x34] ss:$8 sps:$4 sm:$0xff]   ;;  %v8005_v14 = vld [vmem:[#allocation7 + $0x30] ss:$8 sps:$4 sm:$0xff]   ;;  %380 = vmatprep.mubr.bf16.mxu1 %v9002_v27  ;;  %s8950_s18 = scalar_lea.vmem %s6985_s11, 896  ;;  %p8955_p1 = scmp.lt.s32.totalorder %s6985_s11, %s6985_s11 }
  0x86   :  { %v8006_v15 = vld [vmem:[#allocation7 + $0x44] ss:$8 sps:$4 sm:$0xff]   ;;  %v7992_v16 = vld [vmem:[#allocation5 + $0x30] sm:$0xff]   ;;  %v8008_v17 = vld [vmem:[#allocation7 + $0x40] ss:$8 sps:$4 sm:$0xff]   ;;  %p8951_p0 = scmp.ne.s32.totalorder %s6985_s11, %s8950_s18  ;;  %p8956_p2 = scmp.lt.s32.totalorder %s8950_s18, %s8950_s18 }
  0x87   :  { %7888 = vmatpush3.bf16.msra.mxu0 %v7987_v2  ;;  %v8009_v18 = vld [vmem:[#allocation7 + $0x54] ss:$8 sps:$4 sm:$0xff]   ;;  %v8011_v21 = vld [vmem:[#allocation7 + $0x50] ss:$8 sps:$4 sm:$0xff]   ;;  %v8012_v23 = vld [vmem:[#allocation7 + $0x64] ss:$8 sps:$4 sm:$0xff]  }
  0x88   :  { %7889 = vmatprep.subr.bf16.mxu0 %v9000_v0  ;;  %351 = vmatpush1.bf16.msra.mxu1 %v7999_v8  ;;  %v7993_v19 = vld [vmem:[#allocation5 + $0x38] sm:$0xff]   ;;  %v8014_v24 = vld [vmem:[#allocation7 + $0x60] ss:$8 sps:$4 sm:$0xff]   ;;  %v8020_v37 = vld [vmem:[#allocation8 + $0x4] ss:$16 sps:$4 sm:$0xff]   ;;  %p8957_p3 = por %p8956_p2, %p8955_p1 }
  0x89   :  { %352 = vmatprep.subr.bf16.mxu1 %v8000_v9  ;;  %v142_v20 = vld [vmem:[#allocation2] sm:$0xff]  ;;  %v121_v28 = vld [vmem:[#allocation13] ss:$0 sm:$0xff]  ;;  %v8023_v39 = vld [vmem:[#allocation8 + $0x24] ss:$16 sps:$4 sm:$0xff]  }
  0x8a   :  { %v143_v22 = vpack.c.bf16 %v142_v20, %v142_v20  ;;  %v8015_v25 = vld [vmem:[#allocation7 + $0x74] ss:$8 sps:$4 sm:$0xff]   ;;  %v8017_v26 = vld [vmem:[#allocation7 + $0x70] ss:$8 sps:$4 sm:$0xff]   ;;  %p8958_p4 = pnand %p8957_p3, %p8951_p0 }
  0x8b   :  { %7890 = vmatpush3.bf16.msra.mxu0 %v7988_v3  ;;  %v8018_v38 = vld [vmem:[#allocation8] ss:$16 sps:$4 sm:$0xff]   ;;  %v8026_v41 = vld [vmem:[#allocation8 + $0x44] ss:$16 sps:$4 sm:$0xff]   ;;  %v8068_v5 = vld [vmem:[#allocation8 + $0xc] ss:$16 sps:$4 sm:$0xff]  }
  0x8c   :  { %7891 = vmatprep.subr.bf16.mxu0 %v9000_v0  ;;  %353 = vmatpush1.bf16.msra.mxu1 %v8002_v12  ;;  %v8021_v40 = vld [vmem:[#allocation8 + $0x20] ss:$16 sps:$4 sm:$0xff]   ;;  %v8029_v43 = vld [vmem:[#allocation8 + $0x64] ss:$16 sps:$4 sm:$0xff]  }
  0x8d   :  { %354 = vmatprep.subr.bf16.mxu1 %v8003_v13  ;;  %v8024_v42 = vld [vmem:[#allocation8 + $0x40] ss:$16 sps:$4 sm:$0xff]   ;;  %v8032_v45 = vld [vmem:[#allocation8 + $0x84] ss:$16 sps:$4 sm:$0xff]  }
  0x8e   :  { %v8027_v44 = vld [vmem:[#allocation8 + $0x60] ss:$16 sps:$4 sm:$0xff]   ;;  %v8035_v47 = vld [vmem:[#allocation8 + $0xa4] ss:$16 sps:$4 sm:$0xff]  }
  0x8f   :  { %7892 = vmatpush3.bf16.msra.mxu0 %v7989_v6  ;;  %v8030_v46 = vld [vmem:[#allocation8 + $0x80] ss:$16 sps:$4 sm:$0xff]   ;;  %v8038_v49 = vld [vmem:[#allocation8 + $0xc4] ss:$16 sps:$4 sm:$0xff]  }
  0x90   :  { %7893 = vmatprep.subr.bf16.mxu0 %v9000_v0  ;;  %355 = vmatpush1.bf16.msra.mxu1 %v8005_v14  ;;  %v8033_v48 = vld [vmem:[#allocation8 + $0xa0] ss:$16 sps:$4 sm:$0xff]   ;;  %v8041_v51 = vld [vmem:[#allocation8 + $0xe4] ss:$16 sps:$4 sm:$0xff]  }
  0x91   :  { %356 = vmatprep.subr.bf16.mxu1 %v8006_v15  ;;  %v8036_v50 = vld [vmem:[#allocation8 + $0xc0] ss:$16 sps:$4 sm:$0xff]   ;;  %v8044_v53 = vld [vmem:[#allocation8 + $0x104] ss:$16 sps:$4 sm:$0xff]  }
  0x92   :  { %v8039_v52 = vld [vmem:[#allocation8 + $0xe0] ss:$16 sps:$4 sm:$0xff]   ;;  %v8047_v55 = vld [vmem:[#allocation8 + $0x124] ss:$16 sps:$4 sm:$0xff]  }
  0x93   :  { %7894 = vmatpush3.bf16.msra.mxu0 %v7990_v10  ;;  %v8042_v54 = vld [vmem:[#allocation8 + $0x100] ss:$16 sps:$4 sm:$0xff]   ;;  %v8050_v57 = vld [vmem:[#allocation8 + $0x144] ss:$16 sps:$4 sm:$0xff]  }
  0x94   :  { %7895 = vmatprep.subr.bf16.mxu0 %v9000_v0  ;;  %357 = vmatpush1.bf16.msra.mxu1 %v8008_v17  ;;  %v8045_v56 = vld [vmem:[#allocation8 + $0x120] ss:$16 sps:$4 sm:$0xff]   ;;  %v8053_v59 = vld [vmem:[#allocation8 + $0x164] ss:$16 sps:$4 sm:$0xff]  }
  0x95   :  { %358 = vmatprep.subr.bf16.mxu1 %v8009_v18  ;;  %v8048_v58 = vld [vmem:[#allocation8 + $0x140] ss:$16 sps:$4 sm:$0xff]   ;;  %v8056_v61 = vld [vmem:[#allocation8 + $0x184] ss:$16 sps:$4 sm:$0xff]  }
  0x96   :  { %v8051_v60 = vld [vmem:[#allocation8 + $0x160] ss:$16 sps:$4 sm:$0xff]   ;;  %v8059_v63 = vld [vmem:[#allocation8 + $0x1a4] ss:$16 sps:$4 sm:$0xff]  }
  0x97   :  { %7896 = vmatpush3.bf16.msra.mxu0 %v7991_v11  ;;  %v8054_v62 = vld [vmem:[#allocation8 + $0x180] ss:$16 sps:$4 sm:$0xff]   ;;  %v8062_v1 = vld [vmem:[#allocation8 + $0x1c4] ss:$16 sps:$4 sm:$0xff]  }
  0x98   :  { %7897 = vmatprep.subr.bf16.mxu0 %v9000_v0  ;;  %359 = vmatpush1.bf16.msra.mxu1 %v8011_v21  ;;  %v8060_v2 = vld [vmem:[#allocation8 + $0x1c0] ss:$16 sps:$4 sm:$0xff]   ;;  %v8065_v3 = vld [vmem:[#allocation8 + $0x1e4] ss:$16 sps:$4 sm:$0xff]  }
  0x99   :  { %360 = vmatprep.subr.bf16.mxu1 %v8012_v23  ;;  %v8063_v4 = vld [vmem:[#allocation8 + $0x1e0] ss:$16 sps:$4 sm:$0xff]  }
  0x9b   :  { %7898 = vmatpush3.bf16.msra.mxu0 %v7992_v16 }
  0x9c   :  { %7899 = vmatprep.subr.bf16.mxu0 %v9000_v0  ;;  %361 = vmatpush1.bf16.msra.mxu1 %v8014_v24  ;;  %v8057_v0 = vld [vmem:[#allocation8 + $0x1a0] ss:$16 sps:$4 sm:$0xff]  }
  0x9d   :  { %362 = vmatprep.subr.bf16.mxu1 %v8015_v25 }
  0x9f   :  { %7900 = vmatpush3.bf16.msra.mxu0 %v7993_v19 }
  0xa0   :  { %363 = vmatpush1.bf16.msra.mxu1 %v8017_v26 }
  0xa1   :  { %888 = vmatprep.subr.bf16.mxu1 %v8020_v37 }
  0xa2   :  { %7902 = vmatmul.mubr.bf16.vlgmr.msra.gmra.mrb[0].mxu0 %v143_v22 }
 0x175   :  { %v242_v29 = vpop.f32.mrb[0].mxu0 }
 0x176   :  { %v243_v30 = vadd.f32 %v242_v29, %v121_v28  ;;  %v7903_v31 = vpop.f32.mrb[1].mxu0 }
 0x177   :  { %v245_v32 = vpop.f32.mrb[2].mxu0 }
 0x178   :  { %vm248_vm1 = vcmp.gt.f32.partialorder %v243_v30, 0.0  ;;  %v249_v33 = vmul.f32 0.2, %v243_v30  ;;  %v7904_v34 = vpop.f32.mrb[3].mxu0 }
 0x17a   :  { %v250_v35 = vsel %vm248_vm1, %v243_v30, %v249_v33 }
 0x17b   :  { %v251_v36 = vpack.c.bf16 %v250_v35, %v250_v35 }
 0x17d   :  { %381 = vmatmul.mubr.bf16.vlgmr.msra.gmra.mrb[0].mxu1 %v251_v36 }
 0x17e   :  { %889 = vmatpush1.bf16.msra.mxu1 %v8018_v38 }
 0x17f   :  { %890 = vmatprep.subr.bf16.mxu1 %v8023_v39 }
 0x182   :  { %891 = vmatpush1.bf16.msra.mxu1 %v8021_v40 }
 0x183   :  { %892 = vmatprep.subr.bf16.mxu1 %v8026_v41 }
 0x186   :  { %893 = vmatpush1.bf16.msra.mxu1 %v8024_v42 }
 0x187   :  { %894 = vmatprep.subr.bf16.mxu1 %v8029_v43 }
 0x18a   :  { %895 = vmatpush1.bf16.msra.mxu1 %v8027_v44 }
 0x18b   :  { %896 = vmatprep.subr.bf16.mxu1 %v8032_v45 }
 0x18e   :  { %897 = vmatpush1.bf16.msra.mxu1 %v8030_v46 }
 0x18f   :  { %898 = vmatprep.subr.bf16.mxu1 %v8035_v47 }
 0x192   :  { %899 = vmatpush1.bf16.msra.mxu1 %v8033_v48  ;;  %v9003_v48 = vmov 1966171168  }
 0x193   :  { %900 = vmatprep.subr.bf16.mxu1 %v8038_v49  ;;  %v434_v49 = vunpack.c.l.s4 %v9003_v48  ;;  %v8108_v48 = vld [vmem:[#allocation8 + $0x1c8] ss:$16 sps:$4 sm:$0xff]  }
 0x196   :  { %901 = vmatpush1.bf16.msra.mxu1 %v8036_v50  ;;  %v436_v50 = vlaneseq }
 0x197   :  { %902 = vmatprep.subr.bf16.mxu1 %v8041_v51  ;;  %v435_v51 = vunpack.c.0.s8 %v434_v49  ;;  %v8113_v49 = vld [vmem:[#allocation8 + $0x1ec] ss:$16 sps:$4 sm:$0xff]  }
 0x19a   :  { %903 = vmatpush1.bf16.msra.mxu1 %v8039_v52  ;;  %v9138_v52 = vshrl.u32 %v436_v50, 7  ;;  %v8111_v50 = vld [vmem:[#allocation8 + $0x1e8] ss:$16 sps:$4 sm:$0xff]  }
 0x19b   :  { %904 = vmatprep.subr.bf16.mxu1 %v8044_v53 }
 0x19e   :  { %905 = vmatpush1.bf16.msra.mxu1 %v8042_v54  ;;  %v9141_v54 = vsub.s32 %v435_v51, %v9138_v52  ;;  %v1180_v51 = vld [vmem:[#allocation10] sm:$0xff] }
 0x19f   :  { %906 = vmatprep.subr.bf16.mxu1 %v8047_v55 }
 0x1a2   :  { %907 = vmatpush1.bf16.msra.mxu1 %v8045_v56 }
 0x1a3   :  { %908 = vmatprep.subr.bf16.mxu1 %v8050_v57 }
 0x1a6   :  { %909 = vmatpush1.bf16.msra.mxu1 %v8048_v58  ;;  %v123_v58 = vld [vmem:[#allocation13 + $0x1] ss:$8 sm:$0x3] }
 0x1a7   :  { %910 = vmatprep.subr.bf16.mxu1 %v8053_v59 }
 0x1aa   :  { %911 = vmatpush1.bf16.msra.mxu1 %v8051_v60  ;;  %v9146_v60 = vsub.s32 0, %v9138_v52 }
 0x1ab   :  { %912 = vmatprep.subr.bf16.mxu1 %v8056_v61  ;;  %v9149_v61 = vsub.s32 1, %v9138_v52 }
 0x1ae   :  { %913 = vmatpush1.bf16.msra.mxu1 %v8054_v62 }
 0x1af   :  { %914 = vmatprep.subr.bf16.mxu1 %v8059_v63 }
 0x1b2   :  { %915 = vmatpush1.bf16.msra.mxu1 %v8057_v0 }
 0x1b3   :  { %916 = vmatprep.subr.bf16.mxu1 %v8062_v1 }
 0x1b6   :  { %917 = vmatpush1.bf16.msra.mxu1 %v8060_v2 }
 0x1b7   :  { %918 = vmatprep.subr.bf16.mxu1 %v8065_v3 }
 0x1ba   :  { %919 = vmatpush1.bf16.msra.mxu1 %v8063_v4 }
 0x1bb   :  { %929 = vmatprep.subr.bf16.mxu1 %v8068_v5 }
 0x250   :  { %v9132_v6 = vpop.f32.mrb[0].mxu1 }
 0x251   :  { %v389_v7 = vrot.slane %v9132_v6, 4  ;;  %v404_v8 = vmul.f32 %v9132_v6, %v9132_v6  ;;  %v384_v9 = vpop.f32.mrb[1].mxu1 }
 0x252   :  { %v395_v10 = vrot.slane %v384_v9, 4  ;;  %v405_v11 = vmul.f32 %v384_v9, %v384_v9  ;;  %v386_v12 = vpop.f32.mrb[2].mxu1 }
 0x253   :  { %v390_v13 = vadd.f32 %v389_v7, %v9132_v6  ;;  %v406_v14 = vrot.slane %v404_v8, 4  ;;  %v387_v15 = vpop.f32.mrb[3].mxu1 }
 0x254   :  { %v396_v16 = vadd.f32 %v395_v10, %v384_v9  ;;  %v412_v17 = vrot.slane %v405_v11, 4 }
 0x255   :  { %v391_v18 = vrot.slane %v390_v13, 2  ;;  %v407_v19 = vadd.f32 %v406_v14, %v404_v8  ;;  %v125_v8 = vld [vmem:[#allocation13 + $0x2] ss:$8 sm:$0x3] }
 0x256   :  { %v397_v20 = vrot.slane %v396_v16, 2  ;;  %v413_v21 = vadd.f32 %v412_v17, %v405_v11 }
 0x257   :  { %v392_v22 = vadd.f32 %v391_v18, %v390_v13  ;;  %v408_v23 = vrot.slane %v407_v19, 2 }
 0x258   :  { %v398_v24 = vadd.f32 %v397_v20, %v396_v16  ;;  %v414_v25 = vrot.slane %v413_v21, 2 }
 0x259   :  { %v393_v26 = vrot.slane %v392_v22, 1  ;;  %v409_v27 = vadd.f32 %v408_v23, %v407_v19  ;;  %v8066_v19 = vld [vmem:[#allocation8 + $0x8] ss:$16 sps:$4 sm:$0xff]   ;;  %v8074_v23 = vld [vmem:[#allocation8 + $0x4c] ss:$16 sps:$4 sm:$0xff]  }
 0x25a   :  { %v399_v28 = vrot.slane %v398_v24, 1  ;;  %v415_v29 = vadd.f32 %v414_v25, %v413_v21  ;;  %v8071_v21 = vld [vmem:[#allocation8 + $0x2c] ss:$16 sps:$4 sm:$0xff]  }
 0x25b   :  { %v394_v30 = vadd.f32 %v393_v26, %v392_v22  ;;  %v410_v31 = vrot.slane %v409_v27, 1  ;;  %v8069_v22 = vld [vmem:[#allocation8 + $0x28] ss:$16 sps:$4 sm:$0xff]   ;;  %v8077_v25 = vld [vmem:[#allocation8 + $0x6c] ss:$16 sps:$4 sm:$0xff]  }
 0x25c   :  { %v400_v32 = vadd.f32 %v399_v28, %v398_v24  ;;  %v416_v33 = vrot.slane %v415_v29, 1  ;;  %v8072_v24 = vld [vmem:[#allocation8 + $0x48] ss:$16 sps:$4 sm:$0xff]  }
 0x25d   :  { %v402_v34 = vmul.f32 0.125, %v394_v30  ;;  %v411_v35 = vadd.f32 %v410_v31, %v409_v27  ;;  %v8075_v26 = vld [vmem:[#allocation8 + $0x68] ss:$16 sps:$4 sm:$0xff]   ;;  %v8080_v27 = vld [vmem:[#allocation8 + $0x8c] ss:$16 sps:$4 sm:$0xff]  }
 0x25e   :  { %v403_v36 = vmul.f32 0.125, %v400_v32  ;;  %v417_v37 = vadd.f32 %v416_v33, %v415_v29  ;;  %v8078_v28 = vld [vmem:[#allocation8 + $0x88] ss:$16 sps:$4 sm:$0xff]   ;;  %v8083_v29 = vld [vmem:[#allocation8 + $0xac] ss:$16 sps:$4 sm:$0xff]  }
 0x25f   :  { %v418_v38 = vmul.f32 0.125, %v411_v35  ;;  %v420_v39 = vmul.f32 %v402_v34, %v402_v34  ;;  %v8081_v30 = vld [vmem:[#allocation8 + $0xa8] ss:$16 sps:$4 sm:$0xff]   ;;  %v8086_v31 = vld [vmem:[#allocation8 + $0xcc] ss:$16 sps:$4 sm:$0xff]  }
 0x260   :  { %v419_v40 = vmul.f32 0.125, %v417_v37  ;;  %v421_v41 = vmul.f32 %v403_v36, %v403_v36  ;;  %v8084_v32 = vld [vmem:[#allocation8 + $0xc8] ss:$16 sps:$4 sm:$0xff]   ;;  %v8089_v33 = vld [vmem:[#allocation8 + $0xec] ss:$16 sps:$4 sm:$0xff]  }
 0x261   :  { %v422_v42 = vsub.f32 %v418_v38, %v420_v39  ;;  %v8092_v35 = vld [vmem:[#allocation8 + $0x10c] ss:$16 sps:$4 sm:$0xff]   ;;  %v8093_v38 = vld [vmem:[#allocation8 + $0x128] ss:$16 sps:$4 sm:$0xff]  }
 0x262   :  { %v423_v43 = vsub.f32 %v419_v40, %v421_v41  ;;  %v8095_v37 = vld [vmem:[#allocation8 + $0x12c] ss:$16 sps:$4 sm:$0xff]   ;;  %v8096_v40 = vld [vmem:[#allocation8 + $0x148] ss:$16 sps:$4 sm:$0xff]  }
 0x263   :  { %v424_v44 = vmax.f32 %v422_v42, 0.0  ;;  %v8098_v39 = vld [vmem:[#allocation8 + $0x14c] ss:$16 sps:$4 sm:$0xff]   ;;  %v8099_v42 = vld [vmem:[#allocation8 + $0x168] ss:$16 sps:$4 sm:$0xff]  }
 0x264   :  { %v425_v45 = vmax.f32 %v423_v43, 0.0  ;;  %v8101_v41 = vld [vmem:[#allocation8 + $0x16c] ss:$16 sps:$4 sm:$0xff]  }
 0x265   :  { %v426_v46 = vadd.f32 0.8, %v424_v44  ;;  %v8104_v43 = vld [vmem:[#allocation8 + $0x18c] ss:$16 sps:$4 sm:$0xff]   ;;  %v8102_v44 = vld [vmem:[#allocation8 + $0x188] ss:$16 sps:$4 sm:$0xff]  }
 0x266   :  { %v427_v47 = vadd.f32 0.8, %v425_v45  ;;  %v8107_v45 = vld [vmem:[#allocation8 + $0x1ac] ss:$16 sps:$4 sm:$0xff]  }
 0x267   :  { %8754 = vrsqrt.f32 %v426_v46  ;;  %v8105_v46 = vld [vmem:[#allocation8 + $0x1a8] ss:$16 sps:$4 sm:$0xff]  }
 0x268   :  { %8756 = vrsqrt.f32 %v427_v47  ;;  %v8110_v47 = vld [vmem:[#allocation8 + $0x1cc] ss:$16 sps:$4 sm:$0xff]  }
 0x271   :  { %v8755_v53 = vpop.eup %8754 }
 0x272   :  { %v8757_v55 = vpop.eup %8756 }
 0x273   :  { %v432_v56 = vcombine.low %v8755_v53, %v8757_v55  ;;  %v1184_v53 = vld [vmem:[#allocation10 + $0x20] sm:$0xff]  ;;  %v1181_v55 = vld [vmem:[#allocation10 + $0x8] sm:$0xff] }
 0x275   :  { %v439_v57 = vrot.slane %v432_v56, %v9141_v54  ;;  %v7085_v56 = vcombine.high %v1180_v51, %v1184_v53 }
 0x277   :  { %v446_v59 = vrot.slane %v439_v57, %v9141_v54  ;;  %v1185_v57 = vld [vmem:[#allocation10 + $0x28] sm:$0xff]  ;;  %2716 = vmatprep.subr.bf16.mxu0 %v7085_v56 }
 0x279   :  { %v448_v62 = vmul.f32 %v446_v59, %v123_v58  ;;  %v7084_v58 = vcombine.low %v1180_v51, %v1184_v53  ;;  %v7086_v59 = vcombine.low %v1181_v55, %v1185_v57  ;;  %v1241_v51 = vld [vmem:[#allocation10 + $0x1e8] sm:$0xff] }
 0x27b   :  { %v453_v63 = vrot.slane %v448_v62, %v9146_v60  ;;  %v457_v0 = vrot.slane %v448_v62, %v9149_v61  ;;  %v7087_v62 = vcombine.high %v1181_v55, %v1185_v57  ;;  %2717 = vmatpush1.bf16.msra.mxu0 %v7084_v58  ;;  %v1244_v57 = vld [vmem:[#allocation10 + $0x200] sm:$0xff] }
 0x27c   :  { %v1248_v58 = vld [vmem:[#allocation10 + $0x220] sm:$0xff] }
 0x27d   :  { %v460_v1 = vmul.f32 %v453_v63, %v402_v34  ;;  %v461_v2 = vmul.f32 %v457_v0, %v403_v36  ;;  %v481_v3 = vmul.f32 %v453_v63, %v9132_v6  ;;  %v482_v4 = vmul.f32 %v457_v0, %v384_v9  ;;  %v8087_v34 = vld [vmem:[#allocation8 + $0xe8] ss:$16 sps:$4 sm:$0xff]   ;;  %v1188_v63 = vld [vmem:[#allocation10 + $0x40] sm:$0xff] }
 0x27e   :  { %v8090_v36 = vld [vmem:[#allocation8 + $0x108] ss:$16 sps:$4 sm:$0xff]   ;;  %v1192_v0 = vld [vmem:[#allocation10 + $0x60] sm:$0xff] }
 0x27f   :  { %v464_v5 = vcombine.low %v460_v1, %v461_v2  ;;  %v1189_v1 = vld [vmem:[#allocation10 + $0x48] sm:$0xff]  ;;  %v7093_v2 = vcombine.high %v1188_v63, %v1192_v0 }
 0x281   :  { %v471_v7 = vrot.slane %v464_v5, %v9141_v54  ;;  %2718 = vmatprep.subr.bf16.mxu0 %v7093_v2 }
 0x283   :  { %v478_v10 = vrot.slane %v471_v7, %v9141_v54 }
 0x285   :  { %v480_v11 = vsub.f32 %v125_v8, %v478_v10  ;;  %v1196_v8 = vld [vmem:[#allocation10 + $0x80] sm:$0xff] }
 0x286   :  { %v1200_v10 = vld [vmem:[#allocation10 + $0xa0] sm:$0xff] }
 0x287   :  { %v487_v12 = vrot.slane %v480_v11, %v9146_v60  ;;  %v491_v13 = vrot.slane %v480_v11, %v9149_v61  ;;  %v1197_v11 = vld [vmem:[#allocation10 + $0x88] sm:$0xff] }
 0x289   :  { %v495_v14 = vadd.f32 %v491_v13, %v482_v4  ;;  %v494_v15 = vadd.f32 %v487_v12, %v481_v3  ;;  %v1193_v3 = vld [vmem:[#allocation10 + $0x68] sm:$0xff]  ;;  %v7092_v4 = vcombine.low %v1188_v63, %v1192_v0  ;;  %v7101_v12 = vcombine.high %v1196_v8, %v1200_v10 }
 0x28a   :  { %v7094_v5 = vcombine.low %v1189_v1, %v1193_v3  ;;  %v7095_v7 = vcombine.high %v1189_v1, %v1193_v3  ;;  %v1201_v13 = vld [vmem:[#allocation10 + $0xa8] sm:$0xff]  ;;  %v7148_v0 = vcombine.low %v1244_v57, %v1248_v58  ;;  %v1252_v3 = vld [vmem:[#allocation10 + $0x240] sm:$0xff] }
 0x28b   :  { %vm497_vm2 = vcmp.gt.f32.partialorder %v495_v14, 0.0  ;;  %v499_v16 = vmul.f32 0.2, %v495_v14  ;;  %vm496_vm3 = vcmp.gt.f32.partialorder %v494_v15, 0.0  ;;  %v498_v17 = vmul.f32 0.2, %v494_v15  ;;  %2719 = vmatpush1.bf16.msra.mxu0 %v7092_v4 }
 0x28c   :  { %2720 = vmatprep.subr.bf16.mxu0 %v7101_v12  ;;  %v1249_v63 = vld [vmem:[#allocation10 + $0x228] sm:$0xff]  ;;  %v1256_v4 = vld [vmem:[#allocation10 + $0x260] sm:$0xff] }
 0x28d   :  { %v501_v18 = vsel %vm497_vm2, %v495_v14, %v499_v16  ;;  %v500_v6 = vsel %vm496_vm3, %v494_v15, %v498_v17  ;;  %v7100_v14 = vcombine.low %v1196_v8, %v1200_v10  ;;  %v7102_v15 = vcombine.low %v1197_v11, %v1201_v13  ;;  %v1204_v17 = vld [vmem:[#allocation10 + $0xc0] sm:$0xff]  ;;  %v1257_v8 = vld [vmem:[#allocation10 + $0x268] sm:$0xff] }
 0x28e   :  { %v503_v9 = vpack.c.bf16 %v501_v18, %v501_v18  ;;  %v9158_v20 = vpack.c.bf16 %v500_v6, %v500_v6  ;;  %v7103_v16 = vcombine.high %v1197_v11, %v1201_v13  ;;  %v1208_v18 = vld [vmem:[#allocation10 + $0xe0] sm:$0xff]  ;;  %v1205_v6 = vld [vmem:[#allocation10 + $0xc8] sm:$0xff]  ;;  %v7156_v10 = vcombine.low %v1252_v3, %v1256_v4 }
 0x28f   :  { %2721 = vmatpush1.bf16.msra.mxu0 %v7100_v14  ;;  %v1260_v13 = vld [vmem:[#allocation10 + $0x280] sm:$0xff] }
 0x290   :  { %920 = vmatprep.mubr.bf16.mxu1 %v503_v9  ;;  %v1264_v14 = vld [vmem:[#allocation10 + $0x2a0] sm:$0xff] }
 0x291   :  { %921 = vmatmul.mubr.bf16.vlgmr.msra.gmra.mrb[4].mxu1 %v9158_v20 }
 0x292   :  { %930 = vmatpush1.bf16.msra.mxu1 %v8066_v19  ;;  %961 = vmatprep.mubr.bf16.mxu1 %v503_v9  ;;  %v7109_v9 = vcombine.high %v1204_v17, %v1208_v18  ;;  %v1209_v19 = vld [vmem:[#allocation10 + $0xe8] sm:$0xff] }
 0x293   :  { %931 = vmatprep.subr.bf16.mxu1 %v8071_v21  ;;  %v7110_v21 = vcombine.low %v1205_v6, %v1209_v19 }
 0x294   :  { %2722 = vmatprep.subr.bf16.mxu0 %v7109_v9 }
 0x296   :  { %932 = vmatpush1.bf16.msra.mxu1 %v8069_v22  ;;  %v7111_v22 = vcombine.high %v1205_v6, %v1209_v19  ;;  %v1268_v19 = vld [vmem:[#allocation10 + $0x2c0] sm:$0xff] }
 0x297   :  { %933 = vmatprep.subr.bf16.mxu1 %v8074_v23  ;;  %v1212_v23 = vld [vmem:[#allocation10 + $0x100] sm:$0xff] }
 0x29a   :  { %934 = vmatpush1.bf16.msra.mxu1 %v8072_v24  ;;  %v1216_v24 = vld [vmem:[#allocation10 + $0x120] sm:$0xff] }
 0x29b   :  { %935 = vmatprep.subr.bf16.mxu1 %v8077_v25  ;;  %v1213_v25 = vld [vmem:[#allocation10 + $0x108] sm:$0xff] }
 0x29e   :  { %936 = vmatpush1.bf16.msra.mxu1 %v8075_v26  ;;  %v7117_v26 = vcombine.high %v1212_v23, %v1216_v24 }
 0x29f   :  { %937 = vmatprep.subr.bf16.mxu1 %v8080_v27  ;;  %v1217_v27 = vld [vmem:[#allocation10 + $0x128] sm:$0xff] }
 0x2a2   :  { %938 = vmatpush1.bf16.msra.mxu1 %v8078_v28  ;;  %v7116_v28 = vcombine.low %v1212_v23, %v1216_v24  ;;  %v1273_v23 = vld [vmem:[#allocation10 + $0x2e8] sm:$0xff] }
 0x2a3   :  { %939 = vmatprep.subr.bf16.mxu1 %v8083_v29  ;;  %v7118_v29 = vcombine.low %v1213_v25, %v1217_v27 }
 0x2a6   :  { %940 = vmatpush1.bf16.msra.mxu1 %v8081_v30  ;;  %v7119_v30 = vcombine.high %v1213_v25, %v1217_v27  ;;  %v1276_v27 = vld [vmem:[#allocation10 + $0x300] sm:$0xff] }
 0x2a7   :  { %941 = vmatprep.subr.bf16.mxu1 %v8086_v31  ;;  %v1220_v31 = vld [vmem:[#allocation10 + $0x140] sm:$0xff] }
 0x2aa   :  { %942 = vmatpush1.bf16.msra.mxu1 %v8084_v32  ;;  %v1224_v32 = vld [vmem:[#allocation10 + $0x160] sm:$0xff] }
 0x2ab   :  { %943 = vmatprep.subr.bf16.mxu1 %v8089_v33  ;;  %v1221_v33 = vld [vmem:[#allocation10 + $0x148] sm:$0xff] }
 0x2ae   :  { %944 = vmatpush1.bf16.msra.mxu1 %v8087_v34  ;;  %v7125_v34 = vcombine.high %v1220_v31, %v1224_v32 }
 0x2af   :  { %945 = vmatprep.subr.bf16.mxu1 %v8092_v35  ;;  %v7124_v35 = vcombine.low %v1220_v31, %v1224_v32  ;;  %v1281_v31 = vld [vmem:[#allocation10 + $0x328] sm:$0xff] }
 0x2b2   :  { %946 = vmatpush1.bf16.msra.mxu1 %v8090_v36  ;;  %v1225_v36 = vld [vmem:[#allocation10 + $0x168] sm:$0xff] }
 0x2b3   :  { %947 = vmatprep.subr.bf16.mxu1 %v8095_v37  ;;  %v7126_v37 = vcombine.low %v1221_v33, %v1225_v36 }
 0x2b6   :  { %948 = vmatpush1.bf16.msra.mxu1 %v8093_v38  ;;  %v7127_v38 = vcombine.high %v1221_v33, %v1225_v36  ;;  %v1288_v36 = vld [vmem:[#allocation10 + $0x360] sm:$0xff] }
 0x2b7   :  { %949 = vmatprep.subr.bf16.mxu1 %v8098_v39  ;;  %v1228_v39 = vld [vmem:[#allocation10 + $0x180] sm:$0xff] }
 0x2ba   :  { %950 = vmatpush1.bf16.msra.mxu1 %v8096_v40  ;;  %v1232_v40 = vld [vmem:[#allocation10 + $0x1a0] sm:$0xff] }
 0x2bb   :  { %951 = vmatprep.subr.bf16.mxu1 %v8101_v41  ;;  %v1229_v41 = vld [vmem:[#allocation10 + $0x188] sm:$0xff] }
 0x2be   :  { %952 = vmatpush1.bf16.msra.mxu1 %v8099_v42  ;;  %v7133_v42 = vcombine.high %v1228_v39, %v1232_v40 }
 0x2bf   :  { %953 = vmatprep.subr.bf16.mxu1 %v8104_v43  ;;  %v1233_v43 = vld [vmem:[#allocation10 + $0x1a8] sm:$0xff] }
 0x2c2   :  { %954 = vmatpush1.bf16.msra.mxu1 %v8102_v44  ;;  %v7132_v44 = vcombine.low %v1228_v39, %v1232_v40  ;;  %v1289_v39 = vld [vmem:[#allocation10 + $0x368] sm:$0xff] }
 0x2c3   :  { %955 = vmatprep.subr.bf16.mxu1 %v8107_v45  ;;  %v7134_v45 = vcombine.low %v1229_v41, %v1233_v43 }
 0x2c6   :  { %956 = vmatpush1.bf16.msra.mxu1 %v8105_v46  ;;  %v7135_v46 = vcombine.high %v1229_v41, %v1233_v43  ;;  %v1292_v43 = vld [vmem:[#allocation10 + $0x380] sm:$0xff] }
 0x2c7   :  { %957 = vmatprep.subr.bf16.mxu1 %v8110_v47  ;;  %v1236_v47 = vld [vmem:[#allocation10 + $0x1c0] sm:$0xff] }
 0x2ca   :  { %958 = vmatpush1.bf16.msra.mxu1 %v8108_v48  ;;  %v1240_v48 = vld [vmem:[#allocation10 + $0x1e0] sm:$0xff] }
 0x2cb   :  { %959 = vmatprep.subr.bf16.mxu1 %v8113_v49  ;;  %v1237_v49 = vld [vmem:[#allocation10 + $0x1c8] sm:$0xff]  ;;  %v7140_v53 = vcombine.low %v1236_v47, %v1240_v48 }
 0x2cc   :  { %v7142_v55 = vcombine.low %v1237_v49, %v1241_v51  ;;  %v7143_v56 = vcombine.high %v1237_v49, %v1241_v51  ;;  %v1300_v51 = vld [vmem:[#allocation10 + $0x3c0] sm:$0xff] }
 0x2ce   :  { %960 = vmatpush1.bf16.msra.mxu1 %v8111_v50  ;;  %v7141_v50 = vcombine.high %v1236_v47, %v1240_v48  ;;  %v1297_v47 = vld [vmem:[#allocation10 + $0x3a8] sm:$0xff] }
 0x2cf   :  { %2798 = vmatprep.subr.bf16.mxu1 %v7087_v62  ;;  %v7149_v62 = vcombine.high %v1244_v57, %v1248_v58  ;;  %v1305_v58 = vld [vmem:[#allocation10 + $0x3e8] sm:$0xff] }
 0x2d1   :  { %962 = vmatmul.mubr.bf16.vlgmr.msra.gmra.mrb[8].mxu1 %v9158_v20  ;;  %v7108_v20 = vcombine.low %v1204_v17, %v1208_v18  ;;  %v1265_v17 = vld [vmem:[#allocation10 + $0x2a8] sm:$0xff]  ;;  %v7164_v18 = vcombine.low %v1260_v13, %v1264_v14 }
 0x2d2   :  { %2799 = vmatpush1.bf16.msra.mxu1 %v7086_v59  ;;  %v1245_v59 = vld [vmem:[#allocation10 + $0x208] sm:$0xff] }
 0x2d3   :  { %2800 = vmatprep.subr.bf16.mxu1 %v7095_v7  ;;  %2723 = vmatpush1.bf16.msra.mxu0 %v7108_v20  ;;  %v7150_v1 = vcombine.low %v1245_v59, %v1249_v63  ;;  %v7151_v2 = vcombine.high %v1245_v59, %v1249_v63  ;;  %v7157_v7 = vcombine.high %v1252_v3, %v1256_v4  ;;  %v1272_v20 = vld [vmem:[#allocation10 + $0x2e0] sm:$0xff] }
 0x2d4   :  { %2724 = vmatprep.subr.bf16.mxu0 %v7117_v26  ;;  %v7172_v24 = vcombine.low %v1268_v19, %v1272_v20 }
 0x2d6   :  { %2801 = vmatpush1.bf16.msra.mxu1 %v7094_v5  ;;  %v1253_v5 = vld [vmem:[#allocation10 + $0x248] sm:$0xff] }
 0x2d7   :  { %2802 = vmatprep.subr.bf16.mxu1 %v7103_v16  ;;  %2725 = vmatpush1.bf16.msra.mxu0 %v7116_v28  ;;  %v7158_v11 = vcombine.low %v1253_v5, %v1257_v8  ;;  %v7159_v12 = vcombine.high %v1253_v5, %v1257_v8  ;;  %v7165_v16 = vcombine.high %v1260_v13, %v1264_v14  ;;  %v1280_v28 = vld [vmem:[#allocation10 + $0x320] sm:$0xff] }
 0x2d8   :  { %2726 = vmatprep.subr.bf16.mxu0 %v7125_v34  ;;  %v7180_v32 = vcombine.low %v1276_v27, %v1280_v28  ;;  %v9174_v8 = vld [vmem:[#allocation10 + $0x420] sm:$0xff] }
 0x2da   :  { %2803 = vmatpush1.bf16.msra.mxu1 %v7102_v15  ;;  %v1261_v15 = vld [vmem:[#allocation10 + $0x288] sm:$0xff] }
 0x2db   :  { %2804 = vmatprep.subr.bf16.mxu1 %v7111_v22  ;;  %2727 = vmatpush1.bf16.msra.mxu0 %v7124_v35  ;;  %v7166_v6 = vcombine.low %v1261_v15, %v1265_v17  ;;  %v7167_v9 = vcombine.high %v1261_v15, %v1265_v17  ;;  %v7173_v22 = vcombine.high %v1268_v19, %v1272_v20  ;;  %v1284_v35 = vld [vmem:[#allocation10 + $0x340] sm:$0xff]  ;;  %v9181_v15 = vld [vmem:[#allocation10 + $0x428] sm:$0xff] }
 0x2dc   :  { %2728 = vmatprep.subr.bf16.mxu0 %v7133_v42  ;;  %v7188_v40 = vcombine.low %v1284_v35, %v1288_v36 }
 0x2de   :  { %2805 = vmatpush1.bf16.msra.mxu1 %v7110_v21  ;;  %v1269_v21 = vld [vmem:[#allocation10 + $0x2c8] sm:$0xff] }
 0x2df   :  { %2806 = vmatprep.subr.bf16.mxu1 %v7119_v30  ;;  %2729 = vmatpush1.bf16.msra.mxu0 %v7132_v44  ;;  %v7174_v25 = vcombine.low %v1269_v21, %v1273_v23  ;;  %v7175_v26 = vcombine.high %v1269_v21, %v1273_v23  ;;  %v7181_v30 = vcombine.high %v1276_v27, %v1280_v28  ;;  %v1296_v44 = vld [vmem:[#allocation10 + $0x3a0] sm:$0xff] }
 0x2e0   :  { %2730 = vmatprep.subr.bf16.mxu0 %v7141_v50  ;;  %v7196_v48 = vcombine.low %v1292_v43, %v1296_v44 }
 0x2e2   :  { %2807 = vmatpush1.bf16.msra.mxu1 %v7118_v29  ;;  %v1277_v29 = vld [vmem:[#allocation10 + $0x308] sm:$0xff] }
 0x2e3   :  { %2808 = vmatprep.subr.bf16.mxu1 %v7127_v38  ;;  %2731 = vmatpush1.bf16.msra.mxu0 %v7140_v53  ;;  %v7182_v33 = vcombine.low %v1277_v29, %v1281_v31  ;;  %v7183_v34 = vcombine.high %v1277_v29, %v1281_v31  ;;  %v7189_v38 = vcombine.high %v1284_v35, %v1288_v36  ;;  %v1304_v53 = vld [vmem:[#allocation10 + $0x3e0] sm:$0xff] }
 0x2e4   :  { %2732 = vmatprep.subr.bf16.mxu0 %v7149_v62  ;;  %v7205_v57 = vcombine.high %v1300_v51, %v1304_v53 }
 0x2e6   :  { %2809 = vmatpush1.bf16.msra.mxu1 %v7126_v37  ;;  %v1285_v37 = vld [vmem:[#allocation10 + $0x348] sm:$0xff] }
 0x2e7   :  { %2810 = vmatprep.subr.bf16.mxu1 %v7135_v46  ;;  %2733 = vmatpush1.bf16.msra.mxu0 %v7148_v0  ;;  %v7190_v41 = vcombine.low %v1285_v37, %v1289_v39  ;;  %v7191_v42 = vcombine.high %v1285_v37, %v1289_v39  ;;  %v7197_v46 = vcombine.high %v1292_v43, %v1296_v44 }
 0x2e8   :  { %2734 = vmatprep.subr.bf16.mxu0 %v7157_v7  ;;  %v9172_v7 = vld [vmem:[#allocation10 + $0x400] sm:$0xff] }
 0x2e9   :  { %v7213_v14 = vcombine.high %v9172_v7, %v9174_v8 }
 0x2ea   :  { %2811 = vmatpush1.bf16.msra.mxu1 %v7134_v45  ;;  %v1293_v45 = vld [vmem:[#allocation10 + $0x388] sm:$0xff] }
 0x2eb   :  { %2812 = vmatprep.subr.bf16.mxu1 %v7143_v56  ;;  %2735 = vmatpush1.bf16.msra.mxu0 %v7156_v10  ;;  %v7198_v49 = vcombine.low %v1293_v45, %v1297_v47  ;;  %v7199_v50 = vcombine.high %v1293_v45, %v1297_v47  ;;  %v7204_v56 = vcombine.low %v1300_v51, %v1304_v53  ;;  %v9176_v10 = vld [vmem:[#allocation10 + $0x408] sm:$0xff] }
 0x2ec   :  { %2736 = vmatprep.subr.bf16.mxu0 %v7165_v16  ;;  %v7215_v20 = vcombine.high %v9176_v10, %v9181_v15 }
 0x2ee   :  { %2813 = vmatpush1.bf16.msra.mxu1 %v7142_v55  ;;  %v1301_v55 = vld [vmem:[#allocation10 + $0x3c8] sm:$0xff] }
 0x2ef   :  { %2814 = vmatprep.subr.bf16.mxu1 %v7151_v2  ;;  %2737 = vmatpush1.bf16.msra.mxu0 %v7164_v18  ;;  %v7207_v59 = vcombine.high %v1301_v55, %v1305_v58  ;;  %v7206_v63 = vcombine.low %v1301_v55, %v1305_v58  ;;  %v7212_v18 = vcombine.low %v9172_v7, %v9174_v8 }
 0x2f0   :  { %2738 = vmatprep.subr.bf16.mxu0 %v7173_v22 }
 0x2f2   :  { %2815 = vmatpush1.bf16.msra.mxu1 %v7150_v1 }
 0x2f3   :  { %2816 = vmatprep.subr.bf16.mxu1 %v7159_v12  ;;  %2739 = vmatpush1.bf16.msra.mxu0 %v7172_v24 }
 0x2f4   :  { %2740 = vmatprep.subr.bf16.mxu0 %v7181_v30 }
 0x2f6   :  { %2817 = vmatpush1.bf16.msra.mxu1 %v7158_v11 }
 0x2f7   :  { %2818 = vmatprep.subr.bf16.mxu1 %v7167_v9  ;;  %2741 = vmatpush1.bf16.msra.mxu0 %v7180_v32 }
 0x2f8   :  { %2742 = vmatprep.subr.bf16.mxu0 %v7189_v38 }
 0x2fa   :  { %2819 = vmatpush1.bf16.msra.mxu1 %v7166_v6  ;;  %v7214_v6 = vcombine.low %v9176_v10, %v9181_v15 }
 0x2fb   :  { %2820 = vmatprep.subr.bf16.mxu1 %v7175_v26  ;;  %2743 = vmatpush1.bf16.msra.mxu0 %v7188_v40 }
 0x2fc   :  { %2744 = vmatprep.subr.bf16.mxu0 %v7197_v46 }
 0x2fe   :  { %2821 = vmatpush1.bf16.msra.mxu1 %v7174_v25 }
 0x2ff   :  { %2822 = vmatprep.subr.bf16.mxu1 %v7183_v34  ;;  %2745 = vmatpush1.bf16.msra.mxu0 %v7196_v48 }
 0x300   :  { %2746 = vmatprep.subr.bf16.mxu0 %v7205_v57 }
 0x302   :  { %2823 = vmatpush1.bf16.msra.mxu1 %v7182_v33 }
 0x303   :  { %2824 = vmatprep.subr.bf16.mxu1 %v7191_v42  ;;  %2747 = vmatpush1.bf16.msra.mxu0 %v7204_v56 }
 0x304   :  { %2757 = vmatprep.subr.bf16.mxu0 %v7213_v14 }
 0x306   :  { %2825 = vmatpush1.bf16.msra.mxu1 %v7190_v41 }
 0x307   :  { %2826 = vmatprep.subr.bf16.mxu1 %v7199_v50 }
 0x30a   :  { %2827 = vmatpush1.bf16.msra.mxu1 %v7198_v49 }
 0x30b   :  { %2828 = vmatprep.subr.bf16.mxu1 %v7207_v59 }
 0x30e   :  { %2829 = vmatpush1.bf16.msra.mxu1 %v7206_v63 }
 0x30f   :  { %2839 = vmatprep.subr.bf16.mxu1 %v7215_v20 }
 0x364   :  { %v9162_v62 = vpop.f32.mrb[4].mxu1 }
 0x365   :  { %v970_v0 = vrot.slane %v9162_v62, 4  ;;  %v998_v1 = vmul.f32 %v9162_v62, %v9162_v62  ;;  %v9167_v2 = vpop.f32.mrb[5].mxu1 }
 0x366   :  { %v976_v3 = vrot.slane %v9167_v2, 4  ;;  %v999_v4 = vmul.f32 %v9167_v2, %v9167_v2  ;;  %v926_v5 = vpop.f32.mrb[6].mxu1 }
 0x367   :  { %v971_v11 = vadd.f32 %v970_v0, %v9162_v62  ;;  %v1002_v12 = vrot.slane %v998_v1, 4  ;;  %v927_v13 = vpop.f32.mrb[7].mxu1 }
 0x368   :  { %v977_v16 = vadd.f32 %v976_v3, %v9167_v2  ;;  %v1008_v17 = vrot.slane %v999_v4, 4 }
 0x369   :  { %v972_v9 = vrot.slane %v971_v11, 2  ;;  %v1003_v19 = vadd.f32 %v1002_v12, %v998_v1 }
 0x36a   :  { %v978_v21 = vrot.slane %v977_v16, 2  ;;  %v1009_v22 = vadd.f32 %v1008_v17, %v999_v4 }
 0x36b   :  { %v973_v23 = vadd.f32 %v972_v9, %v971_v11  ;;  %v1004_v24 = vrot.slane %v1003_v19, 2 }
 0x36c   :  { %v979_v25 = vadd.f32 %v978_v21, %v977_v16  ;;  %v1010_v26 = vrot.slane %v1009_v22, 2 }
 0x36d   :  { %v974_v27 = vrot.slane %v973_v23, 1  ;;  %v1005_v28 = vadd.f32 %v1004_v24, %v1003_v19 }
 0x36e   :  { %v980_v29 = vrot.slane %v979_v25, 1  ;;  %v1011_v30 = vadd.f32 %v1010_v26, %v1009_v22 }
 0x36f   :  { %v975_v31 = vadd.f32 %v974_v27, %v973_v23  ;;  %v1006_v32 = vrot.slane %v1005_v28, 1 }
 0x370   :  { %v981_v33 = vadd.f32 %v980_v29, %v979_v25  ;;  %v1012_v34 = vrot.slane %v1011_v30, 1 }
 0x371   :  { %v9190_v35 = vmul.f32 0.125, %v975_v31  ;;  %v1007_v36 = vadd.f32 %v1006_v32, %v1005_v28 }
 0x372   :  { %v9192_v37 = vmul.f32 0.125, %v981_v33  ;;  %v1013_v38 = vadd.f32 %v1012_v34, %v1011_v30 }
 0x373   :  { %v1026_v39 = vmul.f32 0.125, %v1007_v36  ;;  %v1030_v40 = vmul.f32 %v9190_v35, %v9190_v35 }
 0x374   :  { %v1027_v41 = vmul.f32 0.125, %v1013_v38  ;;  %v1031_v42 = vmul.f32 %v9192_v37, %v9192_v37 }
 0x375   :  { %v1034_v43 = vsub.f32 %v1026_v39, %v1030_v40 }
 0x376   :  { %v1035_v44 = vsub.f32 %v1027_v41, %v1031_v42 }
 0x377   :  { %v1038_v45 = vmax.f32 %v1034_v43, 0.0 }
 0x378   :  { %v1039_v46 = vmax.f32 %v1035_v44, 0.0 }
 0x379   :  { %v1042_v47 = vadd.f32 0.8, %v1038_v45 }
 0x37a   :  { %v1043_v48 = vadd.f32 0.8, %v1039_v46 }
 0x37b   :  { %8758 = vrsqrt.f32 %v1042_v47 }
 0x37c   :  { %8760 = vrsqrt.f32 %v1043_v48 }
 0x385   :  { %v8759_v49 = vpop.eup %8758 }
 0x386   :  { %v8761_v50 = vpop.eup %8760 }
 0x387   :  { %v1054_v51 = vcombine.low %v8759_v49, %v8761_v50  ;;  %v127_v50 = vld [vmem:[#allocation13 + $0x3] ss:$8 sm:$0xf] }
 0x389   :  { %v1062_v47 = vrot.slane %v1054_v51, %v9141_v54 }
 0x3a4   :  { %v9198_v53 = vpop.f32.mrb[8].mxu1 }
 0x3a5   :  { %v982_v55 = vrot.slane %v9198_v53, 4  ;;  %v1000_v56 = vmul.f32 %v9198_v53, %v9198_v53  ;;  %v965_v57 = vpop.f32.mrb[9].mxu1 }
 0x3a6   :  { %v988_v58 = vrot.slane %v965_v57, 4  ;;  %v1001_v59 = vmul.f32 %v965_v57, %v965_v57  ;;  %v967_v63 = vpop.f32.mrb[10].mxu1 }
 0x3a7   :  { %v983_v0 = vadd.f32 %v982_v55, %v9198_v53  ;;  %v1014_v1 = vrot.slane %v1000_v56, 4  ;;  %v968_v3 = vpop.f32.mrb[11].mxu1 }
 0x3a8   :  { %v989_v4 = vadd.f32 %v988_v58, %v965_v57  ;;  %v1020_v5 = vrot.slane %v1001_v59, 4  ;;  %v9211_v58 = vsub.s32 3, %v9138_v52 }
 0x3a9   :  { %v984_v11 = vrot.slane %v983_v0, 2  ;;  %v1015_v12 = vadd.f32 %v1014_v1, %v1000_v56  ;;  %v9208_v56 = vsub.s32 2, %v9138_v52 }
 0x3aa   :  { %v990_v13 = vrot.slane %v989_v4, 2  ;;  %v1021_v14 = vadd.f32 %v1020_v5, %v1001_v59 }
 0x3ab   :  { %v985_v16 = vadd.f32 %v984_v11, %v983_v0  ;;  %v1016_v17 = vrot.slane %v1015_v12, 2 }
 0x3ac   :  { %v991_v9 = vadd.f32 %v990_v13, %v989_v4  ;;  %v1022_v19 = vrot.slane %v1021_v14, 2 }
 0x3ad   :  { %v986_v20 = vrot.slane %v985_v16, 1  ;;  %v1017_v21 = vadd.f32 %v1016_v17, %v1015_v12 }
 0x3ae   :  { %v992_v22 = vrot.slane %v991_v9, 1  ;;  %v1023_v23 = vadd.f32 %v1022_v19, %v1021_v14 }
 0x3af   :  { %v987_v24 = vadd.f32 %v986_v20, %v985_v16  ;;  %v1018_v25 = vrot.slane %v1017_v21, 1 }
 0x3b0   :  { %v993_v26 = vadd.f32 %v992_v22, %v991_v9  ;;  %v1024_v27 = vrot.slane %v1023_v23, 1  ;;  %v129_v22 = vld [vmem:[#allocation13 + $0x4] ss:$8 sm:$0xf] }
 0x3b1   :  { %v996_v28 = vmul.f32 0.125, %v987_v24  ;;  %v1019_v29 = vadd.f32 %v1018_v25, %v1017_v21 }
 0x3b2   :  { %v997_v30 = vmul.f32 0.125, %v993_v26  ;;  %v1025_v31 = vadd.f32 %v1024_v27, %v1023_v23 }
 0x3b3   :  { %v1028_v32 = vmul.f32 0.125, %v1019_v29  ;;  %v1032_v33 = vmul.f32 %v996_v28, %v996_v28 }
 0x3b4   :  { %v1029_v34 = vmul.f32 0.125, %v1025_v31  ;;  %v1033_v36 = vmul.f32 %v997_v30, %v997_v30 }
 0x3b5   :  { %v1036_v38 = vsub.f32 %v1028_v32, %v1032_v33  ;;  %v1320_v33 = vld [vmem:[#allocation10 + $0x460] sm:$0xff] }
 0x3b6   :  { %v1037_v39 = vsub.f32 %v1029_v34, %v1033_v36  ;;  %v1317_v34 = vld [vmem:[#allocation10 + $0x448] sm:$0xff] }
 0x3b7   :  { %v1040_v40 = vmax.f32 %v1036_v38, 0.0  ;;  %v1321_v36 = vld [vmem:[#allocation10 + $0x468] sm:$0xff] }
 0x3b8   :  { %v1041_v41 = vmax.f32 %v1037_v39, 0.0 }
 0x3b9   :  { %v1044_v42 = vadd.f32 0.8, %v1040_v40 }
 0x3ba   :  { %v1045_v43 = vadd.f32 0.8, %v1041_v41  ;;  %v1324_v41 = vld [vmem:[#allocation10 + $0x480] sm:$0xff] }
 0x3bb   :  { %8762 = vrsqrt.f32 %v1044_v42 }
 0x3bc   :  { %8764 = vrsqrt.f32 %v1045_v43  ;;  %v7223_v43 = vcombine.high %v1317_v34, %v1321_v36 }
 0x3c5   :  { %v8763_v44 = vpop.eup %8762 }
 0x3c6   :  { %v8765_v45 = vpop.eup %8764 }
 0x3c7   :  { %v1055_v46 = vcombine.low %v8763_v44, %v8765_v45  ;;  %v1328_v44 = vld [vmem:[#allocation10 + $0x4a0] sm:$0xff]  ;;  %v1325_v45 = vld [vmem:[#allocation10 + $0x488] sm:$0xff] }
 0x3c8   :  { %v7228_v7 = vcombine.low %v1324_v41, %v1328_v44 }
 0x3c9   :  { %v1069_v48 = vrot.slane %v1055_v46, %v9141_v54  ;;  %v1329_v46 = vld [vmem:[#allocation10 + $0x4a8] sm:$0xff] }
 0x3ca   :  { %v7230_v8 = vcombine.low %v1325_v45, %v1329_v46 }
 0x3cb   :  { %v1070_v49 = vcombine.low %v1062_v47, %v1069_v48 }
 0x3cd   :  { %v1077_v55 = vrot.slane %v1070_v49, %v9141_v54  ;;  %v7222_v49 = vcombine.low %v1317_v34, %v1321_v36  ;;  %v1376_v34 = vld [vmem:[#allocation10 + $0x620] sm:$0xff]  ;;  %v1373_v36 = vld [vmem:[#allocation10 + $0x608] sm:$0xff] }
 0x3cf   :  { %v1079_v59 = vmul.f32 %v1077_v55, %v127_v50  ;;  %v7229_v50 = vcombine.high %v1324_v41, %v1328_v44  ;;  %v7231_v55 = vcombine.high %v1325_v45, %v1329_v46  ;;  %v1380_v45 = vld [vmem:[#allocation10 + $0x640] sm:$0xff] }
 0x3d0   :  { %v1384_v46 = vld [vmem:[#allocation10 + $0x660] sm:$0xff] }
 0x3d1   :  { %v1084_v63 = vrot.slane %v1079_v59, %v9146_v60  ;;  %v1088_v0 = vrot.slane %v1079_v59, %v9149_v61  ;;  %v1092_v1 = vrot.slane %v1079_v59, %v9208_v56  ;;  %v1096_v51 = vrot.slane %v1079_v59, %v9211_v58  ;;  %v1332_v59 = vld [vmem:[#allocation10 + $0x4c0] sm:$0xff] }
 0x3d3   :  { %v1101_v3 = vmul.f32 %v1084_v63, %v9190_v35  ;;  %v1102_v4 = vmul.f32 %v1088_v0, %v9192_v37  ;;  %v1103_v5 = vmul.f32 %v1092_v1, %v996_v28  ;;  %v1104_v11 = vmul.f32 %v1096_v51, %v997_v30  ;;  %v1316_v30 = vld [vmem:[#allocation10 + $0x440] sm:$0xff] }
 0x3d4   :  { %v1138_v12 = vmul.f32 %v1096_v51, %v965_v57  ;;  %v1136_v13 = vmul.f32 %v1088_v0, %v9167_v2  ;;  %v1135_v14 = vmul.f32 %v1084_v63, %v9162_v62  ;;  %v1137_v16 = vmul.f32 %v1092_v1, %v9198_v53  ;;  %v1336_v63 = vld [vmem:[#allocation10 + $0x4e0] sm:$0xff]  ;;  %v1333_v0 = vld [vmem:[#allocation10 + $0x4c8] sm:$0xff] }
 0x3d5   :  { %v1109_v17 = vcombine.low %v1101_v3, %v1102_v4  ;;  %v1110_v9 = vcombine.low %v1103_v5, %v1104_v11  ;;  %v7221_v42 = vcombine.high %v1316_v30, %v1320_v33  ;;  %v7220_v48 = vcombine.low %v1316_v30, %v1320_v33  ;;  %v1337_v1 = vld [vmem:[#allocation10 + $0x4e8] sm:$0xff]  ;;  %v1372_v33 = vld [vmem:[#allocation10 + $0x600] sm:$0xff] }
 0x3d6   :  { %v7237_v10 = vcombine.high %v1332_v59, %v1336_v63  ;;  %v7239_v15 = vcombine.high %v1333_v0, %v1337_v1  ;;  %v1341_v51 = vld [vmem:[#allocation10 + $0x508] sm:$0xff]  ;;  %v7236_v4 = vcombine.low %v1332_v59, %v1336_v63  ;;  %v7238_v5 = vcombine.low %v1333_v0, %v1337_v1  ;;  %v1388_v0 = vld [vmem:[#allocation10 + $0x680] sm:$0xff] }
 0x3d7   :  { %v1117_v19 = vrot.slane %v1109_v17, %v9141_v54  ;;  %v1124_v20 = vrot.slane %v1110_v9, %v9141_v54  ;;  %v1345_v3 = vld [vmem:[#allocation10 + $0x528] sm:$0xff]  ;;  %v7285_v59 = vcombine.high %v1380_v45, %v1384_v46  ;;  %v1392_v1 = vld [vmem:[#allocation10 + $0x6a0] sm:$0xff] }
 0x3d8   :  { %v1353_v17 = vld [vmem:[#allocation10 + $0x568] sm:$0xff] }
 0x3d9   :  { %v1125_v21 = vcombine.low %v1117_v19, %v1124_v20  ;;  %v7246_v19 = vcombine.low %v1341_v51, %v1345_v3 }
 0x3db   :  { %v1132_v35 = vrot.slane %v1125_v21, %v9141_v54 }
 0x3dd   :  { %v1134_v37 = vsub.f32 %v129_v22, %v1132_v35  ;;  %v1356_v22 = vld [vmem:[#allocation10 + $0x580] sm:$0xff] }
 0x3de   :  { %v1360_v35 = vld [vmem:[#allocation10 + $0x5a0] sm:$0xff] }
 0x3df   :  { %v1155_v23 = vrot.slane %v1134_v37, %v9211_v58  ;;  %v1147_v57 = vrot.slane %v1134_v37, %v9149_v61  ;;  %v1143_v2 = vrot.slane %v1134_v37, %v9146_v60  ;;  %v1151_v62 = vrot.slane %v1134_v37, %v9208_v56  ;;  %v1357_v37 = vld [vmem:[#allocation10 + $0x588] sm:$0xff] }
 0x3e1   :  { %v1163_v53 = vadd.f32 %v1155_v23, %v1138_v12  ;;  %v1161_v24 = vadd.f32 %v1147_v57, %v1136_v13  ;;  %v1160_v25 = vadd.f32 %v1143_v2, %v1135_v14  ;;  %v9229_v26 = vadd.f32 %v1151_v62, %v1137_v16  ;;  %v1348_v13 = vld [vmem:[#allocation10 + $0x540] sm:$0xff]  ;;  %v1349_v16 = vld [vmem:[#allocation10 + $0x548] sm:$0xff] }
 0x3e2   :  { %v7247_v12 = vcombine.high %v1341_v51, %v1345_v3  ;;  %v1352_v14 = vld [vmem:[#allocation10 + $0x560] sm:$0xff]  ;;  %v7255_v21 = vcombine.high %v1349_v16, %v1353_v17  ;;  %v1361_v23 = vld [vmem:[#allocation10 + $0x5a8] sm:$0xff]  ;;  %v7254_v2 = vcombine.low %v1349_v16, %v1353_v17  ;;  %v7261_v62 = vcombine.high %v1356_v22, %v1360_v35 }
 0x3e3   :  { %vm1165_vm4 = vcmp.gt.f32.partialorder %v1161_v24, 0.0  ;;  %v1169_v27 = vmul.f32 0.2, %v1161_v24  ;;  %vm1164_vm5 = vcmp.gt.f32.partialorder %v1160_v25, 0.0  ;;  %v1168_v28 = vmul.f32 0.2, %v1160_v25 }
 0x3e4   :  { %vm1167_vm6 = vcmp.gt.f32.partialorder %v1163_v53, 0.0  ;;  %v1171_v29 = vmul.f32 0.2, %v1163_v53  ;;  %v7253_v20 = vcombine.high %v1348_v13, %v1352_v14  ;;  %v7252_v57 = vcombine.low %v1348_v13, %v1352_v14  ;;  %v1396_v51 = vld [vmem:[#allocation10 + $0x6c0] sm:$0xff] }
 0x3e5   :  { %v1173_v31 = vsel %vm1165_vm4, %v1161_v24, %v1169_v27  ;;  %v1172_v32 = vsel %vm1164_vm5, %v1160_v25, %v1168_v28  ;;  %v1364_v24 = vld [vmem:[#allocation10 + $0x5c0] sm:$0xff]  ;;  %v1365_v27 = vld [vmem:[#allocation10 + $0x5c8] sm:$0xff]  ;;  %v7262_v30 = vcombine.low %v1357_v37, %v1361_v23  ;;  %vm1166_vm7 = vcmp.gt.f32.partialorder %v9229_v26, 0.0 }
 0x3e6   :  { %v9231_v38 = vpack.c.bf16 %v1173_v31, %v1173_v31  ;;  %v9233_v39 = vpack.c.bf16 %v1172_v32, %v1172_v32  ;;  %v1175_v40 = vsel %vm1167_vm6, %v1163_v53, %v1171_v29  ;;  %v7263_v53 = vcombine.high %v1357_v37, %v1361_v23  ;;  %v1368_v25 = vld [vmem:[#allocation10 + $0x5e0] sm:$0xff]  ;;  %v1369_v28 = vld [vmem:[#allocation10 + $0x5e8] sm:$0xff] }
 0x3e7   :  { %v9239_v47 = vpack.c.bf16 %v1175_v40, %v1175_v40  ;;  %v7260_v29 = vcombine.low %v1356_v22, %v1360_v35  ;;  %v7269_v31 = vcombine.high %v1364_v24, %v1368_v25  ;;  %v7271_v32 = vcombine.high %v1365_v27, %v1369_v28  ;;  %v1377_v40 = vld [vmem:[#allocation10 + $0x628] sm:$0xff]  ;;  %v1400_v3 = vld [vmem:[#allocation10 + $0x6e0] sm:$0xff] }
 0x3e8   :  { %2748 = vmatprep.mubr.bf16.mxu0 %v9231_v38  ;;  %2830 = vmatprep.mubr.bf16.mxu1 %v9231_v38  ;;  %v7268_v41 = vcombine.low %v1364_v24, %v1368_v25  ;;  %v7279_v44 = vcombine.high %v1373_v36, %v1377_v40  ;;  %v7301_v13 = vcombine.high %v1396_v51, %v1400_v3  ;;  %v1404_v16 = vld [vmem:[#allocation10 + $0x700] sm:$0xff] }
 0x3e9   :  { %2749 = vmatmul.mubr.bf16.vlgmr.msra.gmra.mrb[4].mxu0 %v9233_v39  ;;  %2831 = vmatmul.mubr.bf16.vlgmr.msra.gmra.mrb[12].mxu1 %v9233_v39  ;;  %v1408_v17 = vld [vmem:[#allocation10 + $0x720] sm:$0xff] }
 0x3ea   :  { %2758 = vmatpush1.bf16.msra.mxu0 %v7212_v18  ;;  %2840 = vmatpush1.bf16.msra.mxu1 %v7214_v6  ;;  %v1340_v18 = vld [vmem:[#allocation10 + $0x500] sm:$0xff]  ;;  %v7309_v22 = vcombine.high %v1404_v16, %v1408_v17 }
 0x3eb   :  { %2789 = vmatprep.mubr.bf16.mxu0 %v9239_v47  ;;  %2871 = vmatprep.mubr.bf16.mxu1 %v9239_v47  ;;  %v1344_v6 = vld [vmem:[#allocation10 + $0x520] sm:$0xff] }
 0x3ec   :  { %2759 = vmatprep.subr.bf16.mxu0 %v7221_v42  ;;  %2841 = vmatprep.subr.bf16.mxu1 %v7223_v43  ;;  %v7245_v11 = vcombine.high %v1340_v18, %v1344_v6  ;;  %v7244_v9 = vcombine.low %v1340_v18, %v1344_v6  ;;  %v7270_v42 = vcombine.low %v1365_v27, %v1369_v28  ;;  %v1412_v37 = vld [vmem:[#allocation10 + $0x740] sm:$0xff] }
 0x3ed   :  { %v7277_v43 = vcombine.high %v1372_v33, %v1376_v34  ;;  %v7293_v18 = vcombine.high %v1388_v0, %v1392_v1  ;;  %v1416_v23 = vld [vmem:[#allocation10 + $0x760] sm:$0xff] }
 0x3ee   :  { %2760 = vmatpush1.bf16.msra.mxu0 %v7220_v48  ;;  %2842 = vmatpush1.bf16.msra.mxu1 %v7222_v49  ;;  %v1381_v48 = vld [vmem:[#allocation10 + $0x648] sm:$0xff]  ;;  %v7317_v24 = vcombine.high %v1412_v37, %v1416_v23  ;;  %v1420_v27 = vld [vmem:[#allocation10 + $0x780] sm:$0xff] }
 0x3ef   :  { %2761 = vmatprep.subr.bf16.mxu0 %v7229_v50  ;;  %2843 = vmatprep.subr.bf16.mxu1 %v7231_v55  ;;  %v1385_v49 = vld [vmem:[#allocation10 + $0x668] sm:$0xff]  ;;  %v7276_v50 = vcombine.low %v1372_v33, %v1376_v34  ;;  %v7278_v55 = vcombine.low %v1373_v36, %v1377_v40  ;;  %v1424_v28 = vld [vmem:[#allocation10 + $0x7a0] sm:$0xff] }
 0x3f0   :  { %v7287_v63 = vcombine.high %v1381_v48, %v1385_v49  ;;  %v7325_v33 = vcombine.high %v1420_v27, %v1424_v28  ;;  %v1428_v36 = vld [vmem:[#allocation10 + $0x7c0] sm:$0xff] }
 0x3f1   :  { %v1432_v40 = vld [vmem:[#allocation10 + $0x7e0] sm:$0xff] }
 0x3f2   :  { %2762 = vmatpush1.bf16.msra.mxu0 %v7228_v7  ;;  %2844 = vmatpush1.bf16.msra.mxu1 %v7230_v8  ;;  %v1389_v7 = vld [vmem:[#allocation10 + $0x688] sm:$0xff] }
 0x3f3   :  { %2763 = vmatprep.subr.bf16.mxu0 %v7237_v10  ;;  %2845 = vmatprep.subr.bf16.mxu1 %v7239_v15  ;;  %v1393_v8 = vld [vmem:[#allocation10 + $0x6a8] sm:$0xff]  ;;  %v7284_v10 = vcombine.low %v1380_v45, %v1384_v46  ;;  %v7286_v15 = vcombine.low %v1381_v48, %v1385_v49  ;;  %v7333_v45 = vcombine.high %v1428_v36, %v1432_v40  ;;  %v1182_v48 = vld [vmem:[#allocation10 + $0x10] sm:$0xff]  ;;  %v1170_v49 = vmul.f32 0.2, %v9229_v26 }
 0x3f4   :  { %v7295_v6 = vcombine.high %v1389_v7, %v1393_v8 }
 0x3f6   :  { %2764 = vmatpush1.bf16.msra.mxu0 %v7236_v4  ;;  %2846 = vmatpush1.bf16.msra.mxu1 %v7238_v5  ;;  %v1397_v4 = vld [vmem:[#allocation10 + $0x6c8] sm:$0xff] }
 0x3f7   :  { %2765 = vmatprep.subr.bf16.mxu0 %v7245_v11  ;;  %2847 = vmatprep.subr.bf16.mxu1 %v7247_v12  ;;  %v1401_v5 = vld [vmem:[#allocation10 + $0x6e8] sm:$0xff]  ;;  %v7292_v11 = vcombine.low %v1388_v0, %v1392_v1  ;;  %v7294_v12 = vcombine.low %v1389_v7, %v1393_v8  ;;  %v1174_v8 = vsel %vm1166_vm7, %v9229_v26, %v1170_v49  ;;  %v1199_v26 = vld [vmem:[#allocation10 + $0x98] sm:$0xff] }
 0x3f8   :  { %v7303_v14 = vcombine.high %v1397_v4, %v1401_v5 }
 0x3fa   :  { %2766 = vmatpush1.bf16.msra.mxu0 %v7244_v9  ;;  %2848 = vmatpush1.bf16.msra.mxu1 %v7246_v19  ;;  %v1405_v9 = vld [vmem:[#allocation10 + $0x708] sm:$0xff] }
 0x3fb   :  { %2767 = vmatprep.subr.bf16.mxu0 %v7253_v20  ;;  %2849 = vmatprep.subr.bf16.mxu1 %v7255_v21  ;;  %v1409_v19 = vld [vmem:[#allocation10 + $0x728] sm:$0xff]  ;;  %v7300_v20 = vcombine.low %v1396_v51, %v1400_v3  ;;  %v7302_v21 = vcombine.low %v1397_v4, %v1401_v5  ;;  %v9252_v3 = vpack.c.bf16 %v1174_v8, %v1174_v8 }
 0x3fc   :  { %v7311_v35 = vcombine.high %v1405_v9, %v1409_v19 }
 0x3fe   :  { %2768 = vmatpush1.bf16.msra.mxu0 %v7252_v57  ;;  %2850 = vmatpush1.bf16.msra.mxu1 %v7254_v2  ;;  %v1413_v57 = vld [vmem:[#allocation10 + $0x748] sm:$0xff] }
 0x3ff   :  { %2769 = vmatprep.subr.bf16.mxu0 %v7261_v62  ;;  %2851 = vmatprep.subr.bf16.mxu1 %v7263_v53  ;;  %v1417_v2 = vld [vmem:[#allocation10 + $0x768] sm:$0xff]  ;;  %v7308_v62 = vcombine.low %v1404_v16, %v1408_v17  ;;  %v7310_v53 = vcombine.low %v1405_v9, %v1409_v19 }
 0x400   :  { %v7319_v25 = vcombine.high %v1413_v57, %v1417_v2 }
 0x402   :  { %2770 = vmatpush1.bf16.msra.mxu0 %v7260_v29  ;;  %2852 = vmatpush1.bf16.msra.mxu1 %v7262_v30  ;;  %v1421_v29 = vld [vmem:[#allocation10 + $0x788] sm:$0xff] }
 0x403   :  { %2771 = vmatprep.subr.bf16.mxu0 %v7269_v31  ;;  %2853 = vmatprep.subr.bf16.mxu1 %v7271_v32  ;;  %v1425_v30 = vld [vmem:[#allocation10 + $0x7a8] sm:$0xff]  ;;  %v7316_v31 = vcombine.low %v1412_v37, %v1416_v23  ;;  %v7318_v32 = vcombine.low %v1413_v57, %v1417_v2 }
 0x404   :  { %v7327_v34 = vcombine.high %v1421_v29, %v1425_v30 }
 0x406   :  { %2772 = vmatpush1.bf16.msra.mxu0 %v7268_v41  ;;  %2854 = vmatpush1.bf16.msra.mxu1 %v7270_v42  ;;  %v1429_v41 = vld [vmem:[#allocation10 + $0x7c8] sm:$0xff] }
 0x407   :  { %2773 = vmatprep.subr.bf16.mxu0 %v7277_v43  ;;  %2855 = vmatprep.subr.bf16.mxu1 %v7279_v44  ;;  %v1433_v42 = vld [vmem:[#allocation10 + $0x7e8] sm:$0xff]  ;;  %v7324_v43 = vcombine.low %v1420_v27, %v1424_v28  ;;  %v7326_v44 = vcombine.low %v1421_v29, %v1425_v30  ;;  %v1222_v30 = vld [vmem:[#allocation10 + $0x150] sm:$0xff] }
 0x408   :  { %v7335_v46 = vcombine.high %v1429_v41, %v1433_v42  ;;  %v7334_v0 = vcombine.low %v1429_v41, %v1433_v42  ;;  %v1230_v42 = vld [vmem:[#allocation10 + $0x190] sm:$0xff] }
 0x40a   :  { %2774 = vmatpush1.bf16.msra.mxu0 %v7276_v50  ;;  %2856 = vmatpush1.bf16.msra.mxu1 %v7278_v55  ;;  %v1186_v50 = vld [vmem:[#allocation10 + $0x30] sm:$0xff]  ;;  %v1183_v55 = vld [vmem:[#allocation10 + $0x18] sm:$0xff] }
 0x40b   :  { %2775 = vmatprep.subr.bf16.mxu0 %v7285_v59  ;;  %2857 = vmatprep.subr.bf16.mxu1 %v7287_v63  ;;  %v1187_v59 = vld [vmem:[#allocation10 + $0x38] sm:$0xff]  ;;  %v7332_v63 = vcombine.low %v1428_v36, %v1432_v40  ;;  %v7089_v1 = vcombine.high %v1182_v48, %v1186_v50  ;;  %v7088_v51 = vcombine.low %v1182_v48, %v1186_v50 }
 0x40c   :  { %v7091_v7 = vcombine.high %v1183_v55, %v1187_v59  ;;  %v7090_v4 = vcombine.low %v1183_v55, %v1187_v59  ;;  %v1238_v55 = vld [vmem:[#allocation10 + $0x1d0] sm:$0xff] }
 0x40d   :  { %v1242_v59 = vld [vmem:[#allocation10 + $0x1f0] sm:$0xff] }
 0x40e   :  { %2776 = vmatpush1.bf16.msra.mxu0 %v7284_v10  ;;  %2858 = vmatpush1.bf16.msra.mxu1 %v7286_v15  ;;  %v1190_v10 = vld [vmem:[#allocation10 + $0x50] sm:$0xff]  ;;  %v7145_v8 = vcombine.high %v1238_v55, %v1242_v59 }
 0x40f   :  { %2777 = vmatprep.subr.bf16.mxu0 %v7293_v18  ;;  %2859 = vmatprep.subr.bf16.mxu1 %v7295_v6  ;;  %v1194_v15 = vld [vmem:[#allocation10 + $0x70] sm:$0xff]  ;;  %v1191_v18 = vld [vmem:[#allocation10 + $0x58] sm:$0xff] }
 0x410   :  { %v1195_v6 = vld [vmem:[#allocation10 + $0x78] sm:$0xff]  ;;  %v7097_v5 = vcombine.high %v1190_v10, %v1194_v15  ;;  %v7096_v16 = vcombine.low %v1190_v10, %v1194_v15  ;;  %v1246_v15 = vld [vmem:[#allocation10 + $0x210] sm:$0xff] }
 0x411   :  { %v7098_v17 = vcombine.low %v1191_v18, %v1195_v6 }
 0x412   :  { %2778 = vmatpush1.bf16.msra.mxu0 %v7292_v11  ;;  %2860 = vmatpush1.bf16.msra.mxu1 %v7294_v12  ;;  %v7099_v11 = vcombine.high %v1191_v18, %v1195_v6  ;;  %v1198_v12 = vld [vmem:[#allocation10 + $0x90] sm:$0xff]  ;;  %v1247_v6 = vld [vmem:[#allocation10 + $0x218] sm:$0xff] }
 0x413   :  { %2779 = vmatprep.subr.bf16.mxu0 %v7301_v13  ;;  %2861 = vmatprep.subr.bf16.mxu1 %v7303_v14  ;;  %v1202_v13 = vld [vmem:[#allocation10 + $0xb0] sm:$0xff]  ;;  %v1203_v14 = vld [vmem:[#allocation10 + $0xb8] sm:$0xff] }
 0x414   :  { %v7105_v9 = vcombine.high %v1198_v12, %v1202_v13  ;;  %v7107_v19 = vcombine.high %v1199_v26, %v1203_v14  ;;  %v7104_v37 = vcombine.low %v1198_v12, %v1202_v13  ;;  %v7106_v23 = vcombine.low %v1199_v26, %v1203_v14  ;;  %v1250_v18 = vld [vmem:[#allocation10 + $0x230] sm:$0xff]  ;;  %v1255_v14 = vld [vmem:[#allocation10 + $0x258] sm:$0xff] }
 0x415   :  { %v1254_v13 = vld [vmem:[#allocation10 + $0x250] sm:$0xff] }
 0x416   :  { %2780 = vmatpush1.bf16.msra.mxu0 %v7300_v20  ;;  %2862 = vmatpush1.bf16.msra.mxu1 %v7302_v21  ;;  %v1206_v20 = vld [vmem:[#allocation10 + $0xd0] sm:$0xff] }
 0x417   :  { %2781 = vmatprep.subr.bf16.mxu0 %v7309_v22  ;;  %2863 = vmatprep.subr.bf16.mxu1 %v7311_v35  ;;  %v1210_v21 = vld [vmem:[#allocation10 + $0xf0] sm:$0xff]  ;;  %v1207_v22 = vld [vmem:[#allocation10 + $0xd8] sm:$0xff] }
 0x418   :  { %v1211_v35 = vld [vmem:[#allocation10 + $0xf8] sm:$0xff]  ;;  %v7113_v57 = vcombine.high %v1206_v20, %v1210_v21  ;;  %v1258_v26 = vld [vmem:[#allocation10 + $0x270] sm:$0xff] }
 0x419   :  { %v7115_v2 = vcombine.high %v1207_v22, %v1211_v35  ;;  %v7114_v27 = vcombine.low %v1207_v22, %v1211_v35  ;;  %v1266_v22 = vld [vmem:[#allocation10 + $0x2b0] sm:$0xff]  ;;  %v1263_v35 = vld [vmem:[#allocation10 + $0x298] sm:$0xff] }
 0x41a   :  { %2782 = vmatpush1.bf16.msra.mxu0 %v7308_v62  ;;  %2864 = vmatpush1.bf16.msra.mxu1 %v7310_v53  ;;  %v1214_v62 = vld [vmem:[#allocation10 + $0x110] sm:$0xff] }
 0x41b   :  { %2783 = vmatprep.subr.bf16.mxu0 %v7317_v24  ;;  %2865 = vmatprep.subr.bf16.mxu1 %v7319_v25  ;;  %v1218_v53 = vld [vmem:[#allocation10 + $0x130] sm:$0xff]  ;;  %v1219_v24 = vld [vmem:[#allocation10 + $0x138] sm:$0xff]  ;;  %v7112_v25 = vcombine.low %v1206_v20, %v1210_v21 }
 0x41c   :  { %v7121_v28 = vcombine.high %v1214_v62, %v1218_v53  ;;  %v1262_v21 = vld [vmem:[#allocation10 + $0x290] sm:$0xff] }
 0x41e   :  { %2784 = vmatpush1.bf16.msra.mxu0 %v7316_v31  ;;  %2866 = vmatpush1.bf16.msra.mxu1 %v7318_v32  ;;  %v1226_v31 = vld [vmem:[#allocation10 + $0x170] sm:$0xff]  ;;  %v1223_v32 = vld [vmem:[#allocation10 + $0x158] sm:$0xff] }
 0x41f   :  { %2785 = vmatprep.subr.bf16.mxu0 %v7325_v33  ;;  %2867 = vmatprep.subr.bf16.mxu1 %v7327_v34  ;;  %v1227_v33 = vld [vmem:[#allocation10 + $0x178] sm:$0xff]  ;;  %v7120_v34 = vcombine.low %v1214_v62, %v1218_v53  ;;  %v7129_v40 = vcombine.high %v1222_v30, %v1226_v31  ;;  %v1270_v53 = vld [vmem:[#allocation10 + $0x2d0] sm:$0xff] }
 0x420   :  { %v7131_v41 = vcombine.high %v1223_v32, %v1227_v33  ;;  %v7130_v48 = vcombine.low %v1223_v32, %v1227_v33  ;;  %v1282_v32 = vld [vmem:[#allocation10 + $0x330] sm:$0xff]  ;;  %v1279_v33 = vld [vmem:[#allocation10 + $0x318] sm:$0xff] }
 0x422   :  { %2786 = vmatpush1.bf16.msra.mxu0 %v7324_v43  ;;  %2868 = vmatpush1.bf16.msra.mxu1 %v7326_v44  ;;  %v1234_v43 = vld [vmem:[#allocation10 + $0x1b0] sm:$0xff]  ;;  %v1231_v44 = vld [vmem:[#allocation10 + $0x198] sm:$0xff] }
 0x423   :  { %2787 = vmatprep.subr.bf16.mxu0 %v7333_v45  ;;  %2869 = vmatprep.subr.bf16.mxu1 %v7335_v46  ;;  %v1235_v45 = vld [vmem:[#allocation10 + $0x1b8] sm:$0xff]  ;;  %v7128_v46 = vcombine.low %v1222_v30, %v1226_v31  ;;  %v7137_v49 = vcombine.high %v1230_v42, %v1234_v43  ;;  %v1278_v31 = vld [vmem:[#allocation10 + $0x310] sm:$0xff] }
 0x424   :  { %v7139_v50 = vcombine.high %v1231_v44, %v1235_v45 }
 0x426   :  { %2788 = vmatpush1.bf16.msra.mxu0 %v7332_v63  ;;  %2870 = vmatpush1.bf16.msra.mxu1 %v7334_v0  ;;  %v1239_v63 = vld [vmem:[#allocation10 + $0x1d8] sm:$0xff] }
 0x427   :  { %2880 = vmatprep.subr.bf16.mxu0 %v7089_v1  ;;  %2962 = vmatprep.subr.bf16.mxu1 %v7091_v7  ;;  %v1243_v0 = vld [vmem:[#allocation10 + $0x1f8] sm:$0xff]  ;;  %v7136_v1 = vcombine.low %v1230_v42, %v1234_v43  ;;  %v7138_v7 = vcombine.low %v1231_v44, %v1235_v45  ;;  %v1286_v43 = vld [vmem:[#allocation10 + $0x350] sm:$0xff] }
 0x428   :  { %v7147_v10 = vcombine.high %v1239_v63, %v1243_v0  ;;  %v1290_v44 = vld [vmem:[#allocation10 + $0x370] sm:$0xff]  ;;  %v1287_v45 = vld [vmem:[#allocation10 + $0x358] sm:$0xff] }
 0x429   :  { %2790 = vmatmul.mubr.bf16.vlgmr.msra.gmra.mrb[4].mxu0 %v9252_v3  ;;  %2872 = vmatmul.mubr.bf16.vlgmr.msra.gmra.mrb[12].mxu1 %v9252_v3 }
 0x42a   :  { %2881 = vmatpush1.bf16.msra.mxu0 %v7088_v51  ;;  %2912 = vmatprep.mubr.bf16.mxu0 %v9231_v38  ;;  %v1251_v51 = vld [vmem:[#allocation10 + $0x238] sm:$0xff] }
 0x42b   :  { %2963 = vmatpush1.bf16.msra.mxu1 %v7090_v4  ;;  %2994 = vmatprep.mubr.bf16.mxu1 %v9231_v38  ;;  %v1215_v38 = vld [vmem:[#allocation10 + $0x118] sm:$0xff]  ;;  %v7144_v4 = vcombine.low %v1238_v55, %v1242_v59  ;;  %v7155_v12 = vcombine.high %v1247_v6, %v1251_v51  ;;  %v1294_v59 = vld [vmem:[#allocation10 + $0x390] sm:$0xff] }
 0x42c   :  { %2882 = vmatprep.subr.bf16.mxu0 %v7097_v5  ;;  %2964 = vmatprep.subr.bf16.mxu1 %v7099_v11  ;;  %v7123_v29 = vcombine.high %v1215_v38, %v1219_v24  ;;  %v7122_v36 = vcombine.low %v1215_v38, %v1219_v24  ;;  %v7146_v5 = vcombine.low %v1239_v63, %v1243_v0  ;;  %v1274_v38 = vld [vmem:[#allocation10 + $0x2f0] sm:$0xff]  ;;  %v1271_v24 = vld [vmem:[#allocation10 + $0x2d8] sm:$0xff] }
 0x42d   :  { %v7153_v11 = vcombine.high %v1246_v15, %v1250_v18  ;;  %v1298_v63 = vld [vmem:[#allocation10 + $0x3b0] sm:$0xff]  ;;  %v1295_v0 = vld [vmem:[#allocation10 + $0x398] sm:$0xff] }
 0x42e   :  { %2883 = vmatpush1.bf16.msra.mxu0 %v7096_v16  ;;  %v1259_v16 = vld [vmem:[#allocation10 + $0x278] sm:$0xff] }
 0x42f   :  { %2965 = vmatpush1.bf16.msra.mxu1 %v7098_v17  ;;  %2884 = vmatprep.subr.bf16.mxu0 %v7105_v9  ;;  %v7152_v17 = vcombine.low %v1246_v15, %v1250_v18  ;;  %v7154_v9 = vcombine.low %v1247_v6, %v1251_v51  ;;  %v7163_v20 = vcombine.high %v1255_v14, %v1259_v16  ;;  %v1302_v18 = vld [vmem:[#allocation10 + $0x3d0] sm:$0xff]  ;;  %v1303_v51 = vld [vmem:[#allocation10 + $0x3d8] sm:$0xff] }
 0x430   :  { %2966 = vmatprep.subr.bf16.mxu1 %v7107_v19  ;;  %v7161_v19 = vcombine.high %v1254_v13, %v1258_v26  ;;  %v1306_v6 = vld [vmem:[#allocation10 + $0x3f0] sm:$0xff] }
 0x432   :  { %2885 = vmatpush1.bf16.msra.mxu0 %v7104_v37  ;;  %v1267_v37 = vld [vmem:[#allocation10 + $0x2b8] sm:$0xff] }
 0x433   :  { %2967 = vmatpush1.bf16.msra.mxu1 %v7106_v23  ;;  %2886 = vmatprep.subr.bf16.mxu0 %v7113_v57  ;;  %v7160_v23 = vcombine.low %v1254_v13, %v1258_v26  ;;  %v7162_v57 = vcombine.low %v1255_v14, %v1259_v16  ;;  %v7171_v62 = vcombine.high %v1263_v35, %v1267_v37  ;;  %v1310_v26 = vld [vmem:[#allocation10 + $0x410] sm:$0xff]  ;;  %v1311_v16 = vld [vmem:[#allocation10 + $0x418] sm:$0xff] }
 0x434   :  { %2968 = vmatprep.subr.bf16.mxu1 %v7115_v2  ;;  %v7169_v2 = vcombine.high %v1262_v21, %v1266_v22  ;;  %v1314_v14 = vld [vmem:[#allocation10 + $0x430] sm:$0xff] }
 0x436   :  { %2887 = vmatpush1.bf16.msra.mxu0 %v7112_v25  ;;  %v1275_v25 = vld [vmem:[#allocation10 + $0x2f8] sm:$0xff] }
 0x437   :  { %2969 = vmatpush1.bf16.msra.mxu1 %v7114_v27  ;;  %2888 = vmatprep.subr.bf16.mxu0 %v7121_v28  ;;  %v7168_v27 = vcombine.low %v1262_v21, %v1266_v22  ;;  %v7170_v28 = vcombine.low %v1263_v35, %v1267_v37  ;;  %v7179_v30 = vcombine.high %v1271_v24, %v1275_v25  ;;  %v1318_v22 = vld [vmem:[#allocation10 + $0x450] sm:$0xff] }
 0x438   :  { %2970 = vmatprep.subr.bf16.mxu1 %v7123_v29  ;;  %v7177_v29 = vcombine.high %v1270_v53, %v1274_v38  ;;  %v1322_v35 = vld [vmem:[#allocation10 + $0x470] sm:$0xff]  ;;  %v7216_v37 = vcombine.low %v1310_v26, %v1314_v14 }
 0x43a   :  { %2889 = vmatpush1.bf16.msra.mxu0 %v7120_v34  ;;  %v1283_v34 = vld [vmem:[#allocation10 + $0x338] sm:$0xff] }
 0x43b   :  { %2971 = vmatpush1.bf16.msra.mxu1 %v7122_v36  ;;  %2890 = vmatprep.subr.bf16.mxu0 %v7129_v40  ;;  %v7176_v36 = vcombine.low %v1270_v53, %v1274_v38  ;;  %v7178_v40 = vcombine.low %v1271_v24, %v1275_v25  ;;  %v7187_v42 = vcombine.high %v1279_v33, %v1283_v34  ;;  %v1326_v53 = vld [vmem:[#allocation10 + $0x490] sm:$0xff]  ;;  %v1327_v25 = vld [vmem:[#allocation10 + $0x498] sm:$0xff] }
 0x43c   :  { %2972 = vmatprep.subr.bf16.mxu1 %v7131_v41  ;;  %v7185_v41 = vcombine.high %v1278_v31, %v1282_v32  ;;  %v1330_v38 = vld [vmem:[#allocation10 + $0x4b0] sm:$0xff] }
 0x43e   :  { %2891 = vmatpush1.bf16.msra.mxu0 %v7128_v46  ;;  %v1291_v46 = vld [vmem:[#allocation10 + $0x378] sm:$0xff] }
 0x43f   :  { %2973 = vmatpush1.bf16.msra.mxu1 %v7130_v48  ;;  %2892 = vmatprep.subr.bf16.mxu0 %v7137_v49  ;;  %v7184_v48 = vcombine.low %v1278_v31, %v1282_v32  ;;  %v7186_v49 = vcombine.low %v1279_v33, %v1283_v34  ;;  %v7195_v55 = vcombine.high %v1287_v45, %v1291_v46  ;;  %v1334_v32 = vld [vmem:[#allocation10 + $0x4d0] sm:$0xff]  ;;  %v1335_v34 = vld [vmem:[#allocation10 + $0x4d8] sm:$0xff] }
 0x440   :  { %2974 = vmatprep.subr.bf16.mxu1 %v7139_v50  ;;  %v7193_v50 = vcombine.high %v1286_v43, %v1290_v44  ;;  %v1338_v33 = vld [vmem:[#allocation10 + $0x4f0] sm:$0xff] }
 0x442   :  { %2893 = vmatpush1.bf16.msra.mxu0 %v7136_v1  ;;  %v1299_v1 = vld [vmem:[#allocation10 + $0x3b8] sm:$0xff] }
 0x443   :  { %2975 = vmatpush1.bf16.msra.mxu1 %v7138_v7  ;;  %2894 = vmatprep.subr.bf16.mxu0 %v7145_v8  ;;  %v7192_v7 = vcombine.low %v1286_v43, %v1290_v44  ;;  %v7194_v8 = vcombine.low %v1287_v45, %v1291_v46  ;;  %v7203_v15 = vcombine.high %v1295_v0, %v1299_v1  ;;  %v1342_v43 = vld [vmem:[#allocation10 + $0x510] sm:$0xff]  ;;  %v1343_v45 = vld [vmem:[#allocation10 + $0x518] sm:$0xff] }
 0x444   :  { %2976 = vmatprep.subr.bf16.mxu1 %v7147_v10  ;;  %v7201_v10 = vcombine.high %v1294_v59, %v1298_v63  ;;  %v1346_v44 = vld [vmem:[#allocation10 + $0x530] sm:$0xff]  ;;  %v1347_v46 = vld [vmem:[#allocation10 + $0x538] sm:$0xff] }
 0x446   :  { %2895 = vmatpush1.bf16.msra.mxu0 %v7144_v4  ;;  %v1307_v4 = vld [vmem:[#allocation10 + $0x3f8] sm:$0xff] }
 0x447   :  { %2977 = vmatpush1.bf16.msra.mxu1 %v7146_v5  ;;  %2896 = vmatprep.subr.bf16.mxu0 %v7153_v11  ;;  %v7200_v5 = vcombine.low %v1294_v59, %v1298_v63  ;;  %v7202_v11 = vcombine.low %v1295_v0, %v1299_v1  ;;  %v7211_v13 = vcombine.high %v1303_v51, %v1307_v4  ;;  %v1354_v59 = vld [vmem:[#allocation10 + $0x570] sm:$0xff]  ;;  %v1351_v63 = vld [vmem:[#allocation10 + $0x558] sm:$0xff] }
 0x448   :  { %2978 = vmatprep.subr.bf16.mxu1 %v7155_v12  ;;  %v7209_v12 = vcombine.high %v1302_v18, %v1306_v6  ;;  %v1355_v0 = vld [vmem:[#allocation10 + $0x578] sm:$0xff]  ;;  %v7248_v1 = vcombine.low %v1342_v43, %v1346_v44 }
 0x44a   :  { %2897 = vmatpush1.bf16.msra.mxu0 %v7152_v17  ;;  %v1315_v17 = vld [vmem:[#allocation10 + $0x438] sm:$0xff] }
 0x44b   :  { %2979 = vmatpush1.bf16.msra.mxu1 %v7154_v9  ;;  %2898 = vmatprep.subr.bf16.mxu0 %v7161_v19  ;;  %v7208_v9 = vcombine.low %v1302_v18, %v1306_v6  ;;  %v7210_v19 = vcombine.low %v1303_v51, %v1307_v4  ;;  %v7219_v21 = vcombine.high %v1311_v16, %v1315_v17  ;;  %v1362_v18 = vld [vmem:[#allocation10 + $0x5b0] sm:$0xff]  ;;  %v1359_v6 = vld [vmem:[#allocation10 + $0x598] sm:$0xff] }
 0x44c   :  { %2980 = vmatprep.subr.bf16.mxu1 %v7163_v20  ;;  %v7217_v20 = vcombine.high %v1310_v26, %v1314_v14  ;;  %v1363_v51 = vld [vmem:[#allocation10 + $0x5b8] sm:$0xff]  ;;  %v1370_v26 = vld [vmem:[#allocation10 + $0x5f0] sm:$0xff] }
 0x44d   :  { %v1367_v14 = vld [vmem:[#allocation10 + $0x5d8] sm:$0xff] }
 0x44e   :  { %2899 = vmatpush1.bf16.msra.mxu0 %v7160_v23  ;;  %v1319_v23 = vld [vmem:[#allocation10 + $0x458] sm:$0xff] }
 0x44f   :  { %2981 = vmatpush1.bf16.msra.mxu1 %v7162_v57  ;;  %2900 = vmatprep.subr.bf16.mxu0 %v7169_v2  ;;  %v1323_v57 = vld [vmem:[#allocation10 + $0x478] sm:$0xff]  ;;  %v7218_v2 = vcombine.low %v1311_v16, %v1315_v17 }
 0x450   :  { %2982 = vmatprep.subr.bf16.mxu1 %v7171_v62  ;;  %v7225_v62 = vcombine.high %v1318_v22, %v1322_v35  ;;  %v7227_v24 = vcombine.high %v1319_v23, %v1323_v57  ;;  %v1371_v16 = vld [vmem:[#allocation10 + $0x5f8] sm:$0xff] }
 0x452   :  { %2901 = vmatpush1.bf16.msra.mxu0 %v7168_v27  ;;  %v1331_v27 = vld [vmem:[#allocation10 + $0x4b8] sm:$0xff] }
 0x453   :  { %2983 = vmatpush1.bf16.msra.mxu1 %v7170_v28  ;;  %2902 = vmatprep.subr.bf16.mxu0 %v7177_v29  ;;  %v7224_v28 = vcombine.low %v1318_v22, %v1322_v35  ;;  %v7226_v29 = vcombine.low %v1319_v23, %v1323_v57  ;;  %v7235_v31 = vcombine.high %v1327_v25, %v1331_v27  ;;  %v1378_v22 = vld [vmem:[#allocation10 + $0x630] sm:$0xff]  ;;  %v1375_v35 = vld [vmem:[#allocation10 + $0x618] sm:$0xff] }
 0x454   :  { %2984 = vmatprep.subr.bf16.mxu1 %v7179_v30  ;;  %v7233_v30 = vcombine.high %v1326_v53, %v1330_v38  ;;  %v7274_v57 = vcombine.low %v1367_v14, %v1371_v16 }
 0x456   :  { %2903 = vmatpush1.bf16.msra.mxu0 %v7176_v36  ;;  %v1339_v36 = vld [vmem:[#allocation10 + $0x4f8] sm:$0xff] }
 0x457   :  { %2985 = vmatpush1.bf16.msra.mxu1 %v7178_v40  ;;  %2904 = vmatprep.subr.bf16.mxu0 %v7185_v41  ;;  %v7232_v40 = vcombine.low %v1326_v53, %v1330_v38  ;;  %v7241_v41 = vcombine.high %v1334_v32, %v1338_v33  ;;  %v1382_v53 = vld [vmem:[#allocation10 + $0x650] sm:$0xff] }
 0x458   :  { %2986 = vmatprep.subr.bf16.mxu1 %v7187_v42  ;;  %v7243_v42 = vcombine.high %v1335_v34, %v1339_v36  ;;  %v1386_v38 = vld [vmem:[#allocation10 + $0x670] sm:$0xff] }
 0x45a   :  { %2905 = vmatpush1.bf16.msra.mxu0 %v7184_v48  ;;  %v7242_v48 = vcombine.low %v1335_v34, %v1339_v36  ;;  %v1395_v34 = vld [vmem:[#allocation10 + $0x6b8] sm:$0xff]  ;;  %v7288_v36 = vcombine.low %v1382_v53, %v1386_v38 }
 0x45b   :  { %2987 = vmatpush1.bf16.msra.mxu1 %v7186_v49  ;;  %2906 = vmatprep.subr.bf16.mxu0 %v7193_v50  ;;  %v7249_v49 = vcombine.high %v1342_v43, %v1346_v44  ;;  %v7251_v50 = vcombine.high %v1343_v45, %v1347_v46  ;;  %v1402_v43 = vld [vmem:[#allocation10 + $0x6f0] sm:$0xff]  ;;  %v1399_v44 = vld [vmem:[#allocation10 + $0x6d8] sm:$0xff] }
 0x45c   :  { %2988 = vmatprep.subr.bf16.mxu1 %v7195_v55  ;;  %v1350_v55 = vld [vmem:[#allocation10 + $0x550] sm:$0xff] }
 0x45d   :  { %v7256_v4 = vcombine.low %v1350_v55, %v1354_v59 }
 0x45e   :  { %2907 = vmatpush1.bf16.msra.mxu0 %v7192_v7  ;;  %v7250_v7 = vcombine.low %v1343_v45, %v1347_v46  ;;  %v1403_v45 = vld [vmem:[#allocation10 + $0x6f8] sm:$0xff] }
 0x45f   :  { %2989 = vmatpush1.bf16.msra.mxu1 %v7194_v8  ;;  %2908 = vmatprep.subr.bf16.mxu0 %v7201_v10  ;;  %v7257_v8 = vcombine.high %v1350_v55, %v1354_v59  ;;  %v7259_v10 = vcombine.high %v1351_v63, %v1355_v0  ;;  %v1410_v55 = vld [vmem:[#allocation10 + $0x730] sm:$0xff]  ;;  %v1407_v59 = vld [vmem:[#allocation10 + $0x718] sm:$0xff] }
 0x460   :  { %2990 = vmatprep.subr.bf16.mxu1 %v7203_v15  ;;  %v1358_v15 = vld [vmem:[#allocation10 + $0x590] sm:$0xff] }
 0x461   :  { %v7264_v17 = vcombine.low %v1358_v15, %v1362_v18 }
 0x462   :  { %2909 = vmatpush1.bf16.msra.mxu0 %v7200_v5  ;;  %v7258_v5 = vcombine.low %v1351_v63, %v1355_v0  ;;  %v1411_v63 = vld [vmem:[#allocation10 + $0x738] sm:$0xff] }
 0x463   :  { %2991 = vmatpush1.bf16.msra.mxu1 %v7202_v11  ;;  %2910 = vmatprep.subr.bf16.mxu0 %v7209_v12  ;;  %v7265_v11 = vcombine.high %v1358_v15, %v1362_v18  ;;  %v7267_v12 = vcombine.high %v1359_v6, %v1363_v51  ;;  %v1418_v15 = vld [vmem:[#allocation10 + $0x770] sm:$0xff]  ;;  %v1415_v18 = vld [vmem:[#allocation10 + $0x758] sm:$0xff] }
 0x464   :  { %2992 = vmatprep.subr.bf16.mxu1 %v7211_v13  ;;  %v1366_v13 = vld [vmem:[#allocation10 + $0x5d0] sm:$0xff] }
 0x465   :  { %v7272_v23 = vcombine.low %v1366_v13, %v1370_v26 }
 0x466   :  { %2911 = vmatpush1.bf16.msra.mxu0 %v7208_v9  ;;  %v7266_v9 = vcombine.low %v1359_v6, %v1363_v51  ;;  %v1419_v6 = vld [vmem:[#allocation10 + $0x778] sm:$0xff] }
 0x467   :  { %2993 = vmatpush1.bf16.msra.mxu1 %v7210_v19  ;;  %2921 = vmatprep.subr.bf16.mxu0 %v7217_v20  ;;  %v7273_v19 = vcombine.high %v1366_v13, %v1370_v26  ;;  %v7275_v20 = vcombine.high %v1367_v14, %v1371_v16  ;;  %v1426_v13 = vld [vmem:[#allocation10 + $0x7b0] sm:$0xff]  ;;  %v1423_v26 = vld [vmem:[#allocation10 + $0x798] sm:$0xff] }
 0x468   :  { %3003 = vmatprep.subr.bf16.mxu1 %v7219_v21  ;;  %v1374_v21 = vld [vmem:[#allocation10 + $0x610] sm:$0xff]  ;;  %v1427_v14 = vld [vmem:[#allocation10 + $0x7b8] sm:$0xff] }
 0x469   :  { %2913 = vmatmul.mubr.bf16.vlgmr.msra.gmra.mrb[8].mxu0 %v9233_v39 }
 0x46a   :  { %2995 = vmatmul.mubr.bf16.vlgmr.msra.gmra.mrb[16].mxu1 %v9233_v39  ;;  %2922 = vmatpush1.bf16.msra.mxu0 %v7216_v37  ;;  %v7234_v39 = vcombine.low %v1327_v25, %v1331_v27  ;;  %v1379_v37 = vld [vmem:[#allocation10 + $0x638] sm:$0xff]  ;;  %v7280_v27 = vcombine.low %v1374_v21, %v1378_v22 }
 0x46b   :  { %2953 = vmatprep.mubr.bf16.mxu0 %v9239_v47  ;;  %3004 = vmatpush1.bf16.msra.mxu1 %v7218_v2  ;;  %v7281_v2 = vcombine.high %v1374_v21, %v1378_v22  ;;  %v1387_v25 = vld [vmem:[#allocation10 + $0x678] sm:$0xff]  ;;  %v1434_v21 = vld [vmem:[#allocation10 + $0x7f0] sm:$0xff] }
 0x46c   :  { %3035 = vmatprep.mubr.bf16.mxu1 %v9239_v47  ;;  %2923 = vmatprep.subr.bf16.mxu0 %v7225_v62  ;;  %v7240_v47 = vcombine.low %v1334_v32, %v1338_v33  ;;  %v7283_v62 = vcombine.high %v1375_v35, %v1379_v37  ;;  %v1394_v32 = vld [vmem:[#allocation10 + $0x6b0] sm:$0xff]  ;;  %v1391_v33 = vld [vmem:[#allocation10 + $0x698] sm:$0xff] }
 0x46d   :  { %3005 = vmatprep.subr.bf16.mxu1 %v7227_v24  ;;  %v1383_v24 = vld [vmem:[#allocation10 + $0x658] sm:$0xff] }
 0x46e   :  { %2924 = vmatpush1.bf16.msra.mxu0 %v7224_v28  ;;  %v7282_v28 = vcombine.low %v1375_v35, %v1379_v37  ;;  %v1431_v22 = vld [vmem:[#allocation10 + $0x7d8] sm:$0xff] }
 0x46f   :  { %3006 = vmatpush1.bf16.msra.mxu1 %v7226_v29  ;;  %2925 = vmatprep.subr.bf16.mxu0 %v7233_v30  ;;  %v7289_v29 = vcombine.high %v1382_v53, %v1386_v38  ;;  %v7291_v30 = vcombine.high %v1383_v24, %v1387_v25  ;;  %v1435_v35 = vld [vmem:[#allocation10 + $0x7f8] sm:$0xff] }
 0x470   :  { %3007 = vmatprep.subr.bf16.mxu1 %v7235_v31  ;;  %v1390_v31 = vld [vmem:[#allocation10 + $0x690] sm:$0xff]  ;;  %v7338_v53 = vcombine.low %v1431_v22, %v1435_v35 }
 0x471   :  { %v7296_v46 = vcombine.low %v1390_v31, %v1394_v32 }
 0x472   :  { %2926 = vmatpush1.bf16.msra.mxu0 %v7232_v40  ;;  %v7290_v40 = vcombine.low %v1383_v24, %v1387_v25 }
 0x473   :  { %3008 = vmatpush1.bf16.msra.mxu1 %v7234_v39  ;;  %2927 = vmatprep.subr.bf16.mxu0 %v7241_v41  ;;  %v7297_v39 = vcombine.high %v1390_v31, %v1394_v32  ;;  %v7299_v41 = vcombine.high %v1391_v33, %v1395_v34 }
 0x474   :  { %3009 = vmatprep.subr.bf16.mxu1 %v7243_v42  ;;  %v1398_v42 = vld [vmem:[#allocation10 + $0x6d0] sm:$0xff] }
 0x475   :  { %v7304_v0 = vcombine.low %v1398_v42, %v1402_v43 }
 0x476   :  { %2928 = vmatpush1.bf16.msra.mxu0 %v7240_v47  ;;  %v7298_v47 = vcombine.low %v1391_v33, %v1395_v34 }
 0x477   :  { %3010 = vmatpush1.bf16.msra.mxu1 %v7242_v48  ;;  %2929 = vmatprep.subr.bf16.mxu0 %v7249_v49  ;;  %v7305_v48 = vcombine.high %v1398_v42, %v1402_v43  ;;  %v7307_v49 = vcombine.high %v1399_v44, %v1403_v45 }
 0x478   :  { %3011 = vmatprep.subr.bf16.mxu1 %v7251_v50  ;;  %v1406_v50 = vld [vmem:[#allocation10 + $0x710] sm:$0xff] }
 0x479   :  { %v7312_v51 = vcombine.low %v1406_v50, %v1410_v55 }
 0x47a   :  { %2930 = vmatpush1.bf16.msra.mxu0 %v7248_v1  ;;  %v7306_v1 = vcombine.low %v1399_v44, %v1403_v45 }
 0x47b   :  { %3012 = vmatpush1.bf16.msra.mxu1 %v7250_v7  ;;  %2931 = vmatprep.subr.bf16.mxu0 %v7257_v8  ;;  %v7313_v7 = vcombine.high %v1406_v50, %v1410_v55  ;;  %v7315_v8 = vcombine.high %v1407_v59, %v1411_v63 }
 0x47c   :  { %3013 = vmatprep.subr.bf16.mxu1 %v7259_v10  ;;  %v1414_v10 = vld [vmem:[#allocation10 + $0x750] sm:$0xff] }
 0x47d   :  { %v7320_v16 = vcombine.low %v1414_v10, %v1418_v15 }
 0x47e   :  { %2932 = vmatpush1.bf16.msra.mxu0 %v7256_v4  ;;  %v7314_v4 = vcombine.low %v1407_v59, %v1411_v63 }
 0x47f   :  { %3014 = vmatpush1.bf16.msra.mxu1 %v7258_v5  ;;  %2933 = vmatprep.subr.bf16.mxu0 %v7265_v11  ;;  %v7321_v5 = vcombine.high %v1414_v10, %v1418_v15  ;;  %v7323_v11 = vcombine.high %v1415_v18, %v1419_v6 }
 0x480   :  { %3015 = vmatprep.subr.bf16.mxu1 %v7267_v12  ;;  %v1422_v12 = vld [vmem:[#allocation10 + $0x790] sm:$0xff] }
 0x481   :  { %v7328_v37 = vcombine.low %v1422_v12, %v1426_v13 }
 0x482   :  { %2934 = vmatpush1.bf16.msra.mxu0 %v7264_v17  ;;  %v7322_v17 = vcombine.low %v1415_v18, %v1419_v6 }
 0x483   :  { %3016 = vmatpush1.bf16.msra.mxu1 %v7266_v9  ;;  %2935 = vmatprep.subr.bf16.mxu0 %v7273_v19  ;;  %v7329_v9 = vcombine.high %v1422_v12, %v1426_v13  ;;  %v7331_v19 = vcombine.high %v1423_v26, %v1427_v14 }
 0x484   :  { %3017 = vmatprep.subr.bf16.mxu1 %v7275_v20  ;;  %v1430_v20 = vld [vmem:[#allocation10 + $0x7d0] sm:$0xff] }
 0x486   :  { %2936 = vmatpush1.bf16.msra.mxu0 %v7272_v23  ;;  %v7330_v23 = vcombine.low %v1423_v26, %v1427_v14 }
 0x487   :  { %3018 = vmatpush1.bf16.msra.mxu1 %v7274_v57  ;;  %2937 = vmatprep.subr.bf16.mxu0 %v7281_v2  ;;  %v7337_v57 = vcombine.high %v1430_v20, %v1434_v21  ;;  %v7339_v2 = vcombine.high %v1431_v22, %v1435_v35 }
 0x488   :  { %3019 = vmatprep.subr.bf16.mxu1 %v7283_v62  ;;  %v7336_v62 = vcombine.low %v1430_v20, %v1434_v21  ;;  %v8116_v20 = vld [vmem:[#allocation11 + $0x4] ss:$28 sps:$4 sm:$0xff]   ;;  %v8119_v21 = vld [vmem:[#allocation11 + $0xc] ss:$28 sps:$4 sm:$0xff]  }
 0x48a   :  { %2938 = vmatpush1.bf16.msra.mxu0 %v7280_v27 }
 0x48b   :  { %3020 = vmatpush1.bf16.msra.mxu1 %v7282_v28  ;;  %2939 = vmatprep.subr.bf16.mxu0 %v7289_v29 }
 0x48c   :  { %3021 = vmatprep.subr.bf16.mxu1 %v7291_v30 }
 0x48e   :  { %2940 = vmatpush1.bf16.msra.mxu0 %v7288_v36 }
 0x48f   :  { %3022 = vmatpush1.bf16.msra.mxu1 %v7290_v40  ;;  %2941 = vmatprep.subr.bf16.mxu0 %v7297_v39 }
 0x490   :  { %3023 = vmatprep.subr.bf16.mxu1 %v7299_v41 }
 0x492   :  { %2942 = vmatpush1.bf16.msra.mxu0 %v7296_v46 }
 0x493   :  { %3024 = vmatpush1.bf16.msra.mxu1 %v7298_v47  ;;  %2943 = vmatprep.subr.bf16.mxu0 %v7305_v48 }
 0x494   :  { %3025 = vmatprep.subr.bf16.mxu1 %v7307_v49 }
 0x496   :  { %2944 = vmatpush1.bf16.msra.mxu0 %v7304_v0 }
 0x497   :  { %3026 = vmatpush1.bf16.msra.mxu1 %v7306_v1  ;;  %2945 = vmatprep.subr.bf16.mxu0 %v7313_v7 }
 0x498   :  { %3027 = vmatprep.subr.bf16.mxu1 %v7315_v8 }
 0x49a   :  { %2946 = vmatpush1.bf16.msra.mxu0 %v7312_v51 }
 0x49b   :  { %3028 = vmatpush1.bf16.msra.mxu1 %v7314_v4  ;;  %2947 = vmatprep.subr.bf16.mxu0 %v7321_v5 }
 0x49c   :  { %3029 = vmatprep.subr.bf16.mxu1 %v7323_v11 }
 0x49e   :  { %2948 = vmatpush1.bf16.msra.mxu0 %v7320_v16 }
 0x49f   :  { %3030 = vmatpush1.bf16.msra.mxu1 %v7322_v17  ;;  %2949 = vmatprep.subr.bf16.mxu0 %v7329_v9 }
 0x4a0   :  { %3031 = vmatprep.subr.bf16.mxu1 %v7331_v19 }
 0x4a2   :  { %2950 = vmatpush1.bf16.msra.mxu0 %v7328_v37 }
 0x4a3   :  { %3032 = vmatpush1.bf16.msra.mxu1 %v7330_v23  ;;  %2951 = vmatprep.subr.bf16.mxu0 %v7337_v57  ;;  %v8114_v57 = vld [vmem:[#allocation11] ss:$28 sps:$4 sm:$0xff]  }
 0x4a4   :  { %3033 = vmatprep.subr.bf16.mxu1 %v7339_v2  ;;  %v8117_v2 = vld [vmem:[#allocation11 + $0x8] ss:$28 sps:$4 sm:$0xff]  }
 0x4a6   :  { %2952 = vmatpush1.bf16.msra.mxu0 %v7336_v62 }
 0x4a7   :  { %3034 = vmatpush1.bf16.msra.mxu1 %v7338_v53  ;;  %6312 = vmatprep.subr.bf16.mxu0 %v8116_v20  ;;  %v8138_v20 = vld [vmem:[#allocation11 + $0xe0] ss:$28 sps:$4 sm:$0xff]  }
 0x4a8   :  { %6476 = vmatprep.subr.bf16.mxu1 %v8119_v21  ;;  %v8141_v21 = vld [vmem:[#allocation11 + $0xe8] ss:$28 sps:$4 sm:$0xff]  }
 0x4a9   :  { %2954 = vmatmul.mubr.bf16.vlgmr.msra.gmra.mrb[8].mxu0 %v9252_v3 }
 0x4aa   :  { %3036 = vmatmul.mubr.bf16.vlgmr.msra.gmra.mrb[16].mxu1 %v9252_v3  ;;  %6313 = vmatpush1.bf16.msra.mxu0 %v8114_v57 }
 0x4ab   :  { %6477 = vmatpush1.bf16.msra.mxu1 %v8117_v2 }
 0x4fc   :  { %v9264_v38 = vpop.f32.mrb[4].mxu0  ;;  %v9266_v24 = vpop.f32.mrb[12].mxu1 }
 0x4fd   :  { %v3044_v25 = vrot.slane %v9264_v38, 4  ;;  %v3100_v27 = vmul.f32 %v9264_v38, %v9264_v38  ;;  %v3056_v28 = vrot.slane %v9266_v24, 4  ;;  %v3102_v29 = vmul.f32 %v9266_v24, %v9266_v24  ;;  %v9274_v30 = vpop.f32.mrb[5].mxu0  ;;  %v9276_v31 = vpop.f32.mrb[13].mxu1 }
 0x4fe   :  { %v3050_v3 = vrot.slane %v9274_v30, 4  ;;  %v3101_v32 = vmul.f32 %v9274_v30, %v9274_v30  ;;  %v3062_v33 = vrot.slane %v9276_v31, 4  ;;  %v3103_v34 = vmul.f32 %v9276_v31, %v9276_v31  ;;  %v2795_v36 = vpop.f32.mrb[6].mxu0  ;;  %v2877_v40 = vpop.f32.mrb[14].mxu1 }
 0x4ff   :  { %v3045_v39 = vadd.f32 %v3044_v25, %v9264_v38  ;;  %v3108_v41 = vrot.slane %v3100_v27, 4  ;;  %v3057_v42 = vadd.f32 %v3056_v28, %v9266_v24  ;;  %v3120_v43 = vrot.slane %v3102_v29, 4  ;;  %v2796_v44 = vpop.f32.mrb[7].mxu0  ;;  %v2878_v45 = vpop.f32.mrb[15].mxu1 }
 0x500   :  { %v3051_v46 = vadd.f32 %v3050_v3, %v9274_v30  ;;  %v3114_v47 = vrot.slane %v3101_v32, 4  ;;  %v3063_v48 = vadd.f32 %v3062_v33, %v9276_v31  ;;  %v3126_v49 = vrot.slane %v3103_v34, 4 }
 0x501   :  { %v3046_v50 = vrot.slane %v3045_v39, 2  ;;  %v3109_v55 = vadd.f32 %v3108_v41, %v3100_v27  ;;  %v3058_v59 = vrot.slane %v3057_v42, 2  ;;  %v3121_v63 = vadd.f32 %v3120_v43, %v3102_v29  ;;  %v8125_v41 = vld [vmem:[#allocation11 + $0x44] ss:$28 sps:$4 sm:$0xff]  }
 0x502   :  { %v3052_v0 = vrot.slane %v3051_v46, 2  ;;  %v3115_v1 = vadd.f32 %v3114_v47, %v3101_v32  ;;  %v3064_v7 = vrot.slane %v3063_v48, 2  ;;  %v3127_v8 = vadd.f32 %v3126_v49, %v3103_v34  ;;  %v8123_v47 = vld [vmem:[#allocation11 + $0x40] ss:$28 sps:$4 sm:$0xff]   ;;  %6478 = vmatprep.subr.bf16.mxu1 %v8125_v41 }
 0x503   :  { %v3047_v10 = vadd.f32 %v3046_v50, %v3045_v39  ;;  %v3110_v15 = vrot.slane %v3109_v55, 2  ;;  %v3059_v18 = vadd.f32 %v3058_v59, %v3057_v42  ;;  %v3122_v6 = vrot.slane %v3121_v63, 2  ;;  %v8122_v39 = vld [vmem:[#allocation11 + $0x3c] ss:$28 sps:$4 sm:$0xff]   ;;  %6479 = vmatpush1.bf16.msra.mxu1 %v8123_v47  ;;  %v8164_v47 = vld [vmem:[#allocation11 + $0x1c4] ss:$28 sps:$4 sm:$0xff]  }
 0x504   :  { %v3053_v51 = vadd.f32 %v3052_v0, %v3051_v46  ;;  %v3116_v4 = vrot.slane %v3115_v1, 2  ;;  %v3065_v5 = vadd.f32 %v3064_v7, %v3063_v48  ;;  %v3128_v11 = vrot.slane %v3127_v8, 2  ;;  %v8120_v46 = vld [vmem:[#allocation11 + $0x38] ss:$28 sps:$4 sm:$0xff]   ;;  %6314 = vmatprep.subr.bf16.mxu0 %v8122_v39 }
 0x505   :  { %v3048_v12 = vrot.slane %v3047_v10, 1  ;;  %v3111_v13 = vadd.f32 %v3110_v15, %v3109_v55  ;;  %v3060_v26 = vrot.slane %v3059_v18, 1  ;;  %v3123_v14 = vadd.f32 %v3122_v6, %v3121_v63  ;;  %6315 = vmatpush1.bf16.msra.mxu0 %v8120_v46  ;;  %v8128_v7 = vld [vmem:[#allocation11 + $0x74] ss:$28 sps:$4 sm:$0xff]  }
 0x506   :  { %v3054_v16 = vrot.slane %v3053_v51, 1  ;;  %v3117_v17 = vadd.f32 %v3116_v4, %v3115_v1  ;;  %v3066_v9 = vrot.slane %v3065_v5, 1  ;;  %v3129_v19 = vadd.f32 %v3128_v11, %v3127_v8  ;;  %v8131_v8 = vld [vmem:[#allocation11 + $0x7c] ss:$28 sps:$4 sm:$0xff]   ;;  %6316 = vmatprep.subr.bf16.mxu0 %v8128_v7  ;;  %v8161_v46 = vld [vmem:[#allocation11 + $0x194] ss:$28 sps:$4 sm:$0xff]  }
 0x507   :  { %v3049_v22 = vadd.f32 %v3048_v12, %v3047_v10  ;;  %v3112_v35 = vrot.slane %v3111_v13, 1  ;;  %v3061_v37 = vadd.f32 %v3060_v26, %v3059_v18  ;;  %v3124_v23 = vrot.slane %v3123_v14, 1  ;;  %v8126_v18 = vld [vmem:[#allocation11 + $0x70] ss:$28 sps:$4 sm:$0xff]   ;;  %v8129_v6 = vld [vmem:[#allocation11 + $0x78] ss:$28 sps:$4 sm:$0xff]   ;;  %6480 = vmatprep.subr.bf16.mxu1 %v8131_v8 }
 0x508   :  { %v3055_v62 = vadd.f32 %v3054_v16, %v3053_v51  ;;  %v3118_v53 = vrot.slane %v3117_v17, 1  ;;  %v3067_v25 = vadd.f32 %v3066_v9, %v3065_v5  ;;  %v3130_v27 = vrot.slane %v3129_v19, 1  ;;  %6481 = vmatpush1.bf16.msra.mxu1 %v8129_v6  ;;  %v8134_v26 = vld [vmem:[#allocation11 + $0xac] ss:$28 sps:$4 sm:$0xff]   ;;  %v8140_v9 = vld [vmem:[#allocation11 + $0xe4] ss:$28 sps:$4 sm:$0xff]  }
 0x509   :  { %v9288_v28 = vmul.f32 0.125, %v3049_v22  ;;  %v3113_v29 = vadd.f32 %v3112_v35, %v3111_v13  ;;  %v9290_v3 = vmul.f32 0.125, %v3061_v37  ;;  %v3125_v32 = vadd.f32 %v3124_v23, %v3123_v14  ;;  %6317 = vmatpush1.bf16.msra.mxu0 %v8126_v18  ;;  %v8132_v14 = vld [vmem:[#allocation11 + $0xa8] ss:$28 sps:$4 sm:$0xff]   ;;  %v8135_v16 = vld [vmem:[#allocation11 + $0xb0] ss:$28 sps:$4 sm:$0xff]  }
 0x50a   :  { %v9292_v33 = vmul.f32 0.125, %v3055_v62  ;;  %v3119_v34 = vadd.f32 %v3118_v53, %v3117_v17  ;;  %v9294_v36 = vmul.f32 0.125, %v3067_v25  ;;  %v3131_v40 = vadd.f32 %v3130_v27, %v3129_v19  ;;  %v8137_v17 = vld [vmem:[#allocation11 + $0xb4] ss:$28 sps:$4 sm:$0xff]   ;;  %6318 = vmatprep.subr.bf16.mxu0 %v8134_v26  ;;  %v8143_v19 = vld [vmem:[#allocation11 + $0xec] ss:$28 sps:$4 sm:$0xff]  }
 0x50b   :  { %v3156_v42 = vmul.f32 0.125, %v3113_v29  ;;  %v3164_v43 = vmul.f32 %v9288_v28, %v9288_v28  ;;  %v3158_v44 = vmul.f32 0.125, %v3125_v32  ;;  %v3166_v45 = vmul.f32 %v9290_v3, %v9290_v3  ;;  %6482 = vmatprep.subr.bf16.mxu1 %v8137_v17  ;;  %v8146_v22 = vld [vmem:[#allocation11 + $0x11c] ss:$28 sps:$4 sm:$0xff]   ;;  %v8149_v35 = vld [vmem:[#allocation11 + $0x124] ss:$28 sps:$4 sm:$0xff]  }
 0x50c   :  { %v3157_v48 = vmul.f32 0.125, %v3119_v34  ;;  %v3165_v49 = vmul.f32 %v9292_v33, %v9292_v33  ;;  %v3159_v50 = vmul.f32 0.125, %v3131_v40  ;;  %v3167_v55 = vmul.f32 %v9294_v36, %v9294_v36  ;;  %6483 = vmatpush1.bf16.msra.mxu1 %v8135_v16  ;;  %v8144_v37 = vld [vmem:[#allocation11 + $0x118] ss:$28 sps:$4 sm:$0xff]   ;;  %v8147_v23 = vld [vmem:[#allocation11 + $0x120] ss:$28 sps:$4 sm:$0xff]  }
 0x50d   :  { %v3172_v59 = vsub.f32 %v3156_v42, %v3164_v43  ;;  %v3174_v63 = vsub.f32 %v3158_v44, %v3166_v45  ;;  %6319 = vmatpush1.bf16.msra.mxu0 %v8132_v14  ;;  %6484 = vmatprep.subr.bf16.mxu1 %v8143_v19  ;;  %v8152_v62 = vld [vmem:[#allocation11 + $0x154] ss:$28 sps:$4 sm:$0xff]   ;;  %v8155_v53 = vld [vmem:[#allocation11 + $0x15c] ss:$28 sps:$4 sm:$0xff]   ;;  %v8156_v42 = vld [vmem:[#allocation11 + $0x188] ss:$28 sps:$4 sm:$0xff]  }
 0x50e   :  { %v3173_v0 = vsub.f32 %v3157_v48, %v3165_v49  ;;  %v3175_v1 = vsub.f32 %v3159_v50, %v3167_v55  ;;  %6320 = vmatprep.subr.bf16.mxu0 %v8140_v9  ;;  %v8150_v27 = vld [vmem:[#allocation11 + $0x150] ss:$28 sps:$4 sm:$0xff]   ;;  %v8153_v29 = vld [vmem:[#allocation11 + $0x158] ss:$28 sps:$4 sm:$0xff]   ;;  %v8162_v49 = vld [vmem:[#allocation11 + $0x1c0] ss:$28 sps:$4 sm:$0xff]  }
 0x50f   :  { %v3180_v10 = vmax.f32 %v3172_v59, 0.0  ;;  %v3182_v15 = vmax.f32 %v3174_v63, 0.0  ;;  %v8158_v43 = vld [vmem:[#allocation11 + $0x18c] ss:$28 sps:$4 sm:$0xff]   ;;  %v8170_v55 = vld [vmem:[#allocation11 + $0x1fc] ss:$28 sps:$4 sm:$0xff]  }
 0x510   :  { %v3181_v51 = vmax.f32 %v3173_v0, 0.0  ;;  %v3183_v4 = vmax.f32 %v3175_v1, 0.0  ;;  %6485 = vmatpush1.bf16.msra.mxu1 %v8141_v21  ;;  %v8159_v44 = vld [vmem:[#allocation11 + $0x190] ss:$28 sps:$4 sm:$0xff]   ;;  %v8165_v50 = vld [vmem:[#allocation11 + $0x1c8] ss:$28 sps:$4 sm:$0xff]  }
 0x511   :  { %v3188_v5 = vadd.f32 0.8, %v3180_v10  ;;  %v3190_v11 = vadd.f32 0.8, %v3182_v15  ;;  %6321 = vmatpush1.bf16.msra.mxu0 %v8138_v20  ;;  %6486 = vmatprep.subr.bf16.mxu1 %v8149_v35  ;;  %v8167_v48 = vld [vmem:[#allocation11 + $0x1cc] ss:$28 sps:$4 sm:$0xff]  }
 0x512   :  { %v3189_v12 = vadd.f32 0.8, %v3181_v51  ;;  %v3191_v13 = vadd.f32 0.8, %v3183_v4  ;;  %6322 = vmatprep.subr.bf16.mxu0 %v8146_v22  ;;  %v8173_v59 = vld [vmem:[#allocation11 + $0x204] ss:$28 sps:$4 sm:$0xff]  }
 0x513   :  { %8766 = vrsqrt.f32 %v3188_v5  ;;  %v8168_v63 = vld [vmem:[#allocation11 + $0x1f8] ss:$28 sps:$4 sm:$0xff]   ;;  %v8171_v0 = vld [vmem:[#allocation11 + $0x200] ss:$28 sps:$4 sm:$0xff]   ;;  %v8174_v8 = vld [vmem:[#allocation11 + $0x230] ss:$28 sps:$4 sm:$0xff]  }
 0x514   :  { %8768 = vrsqrt.f32 %v3190_v11  ;;  %6487 = vmatpush1.bf16.msra.mxu1 %v8147_v23  ;;  %v8176_v1 = vld [vmem:[#allocation11 + $0x234] ss:$28 sps:$4 sm:$0xff]   ;;  %v8179_v7 = vld [vmem:[#allocation11 + $0x23c] ss:$28 sps:$4 sm:$0xff]   ;;  %v8182_v15 = vld [vmem:[#allocation11 + $0x26c] ss:$28 sps:$4 sm:$0xff]  }
 0x515   :  { %8770 = vrsqrt.f32 %v3189_v12  ;;  %6323 = vmatpush1.bf16.msra.mxu0 %v8144_v37  ;;  %6488 = vmatprep.subr.bf16.mxu1 %v8155_v53  ;;  %v8177_v10 = vld [vmem:[#allocation11 + $0x238] ss:$28 sps:$4 sm:$0xff]   ;;  %v8180_v6 = vld [vmem:[#allocation11 + $0x268] ss:$28 sps:$4 sm:$0xff]   ;;  %v8183_v51 = vld [vmem:[#allocation11 + $0x270] ss:$28 sps:$4 sm:$0xff]  }
 0x516   :  { %8772 = vrsqrt.f32 %v3191_v13  ;;  %6324 = vmatprep.subr.bf16.mxu0 %v8152_v62  ;;  %v8185_v18 = vld [vmem:[#allocation11 + $0x274] ss:$28 sps:$4 sm:$0xff]   ;;  %v8188_v4 = vld [vmem:[#allocation11 + $0x2a4] ss:$28 sps:$4 sm:$0xff]   ;;  %v8191_v5 = vld [vmem:[#allocation11 + $0x2ac] ss:$28 sps:$4 sm:$0xff]  }
 0x517   :  { %v8186_v11 = vld [vmem:[#allocation11 + $0x2a0] ss:$28 sps:$4 sm:$0xff]   ;;  %v8189_v12 = vld [vmem:[#allocation11 + $0x2a8] ss:$28 sps:$4 sm:$0xff]   ;;  %v8192_v14 = vld [vmem:[#allocation11 + $0x2d8] ss:$28 sps:$4 sm:$0xff]  }
 0x518   :  { %6489 = vmatpush1.bf16.msra.mxu1 %v8153_v29  ;;  %v8194_v13 = vld [vmem:[#allocation11 + $0x2dc] ss:$28 sps:$4 sm:$0xff]   ;;  %v8197_v26 = vld [vmem:[#allocation11 + $0x2e4] ss:$28 sps:$4 sm:$0xff]   ;;  %v8200_v17 = vld [vmem:[#allocation11 + $0x314] ss:$28 sps:$4 sm:$0xff]  }
 0x519   :  { %6325 = vmatpush1.bf16.msra.mxu0 %v8150_v27  ;;  %6490 = vmatprep.subr.bf16.mxu1 %v8161_v46  ;;  %v8195_v16 = vld [vmem:[#allocation11 + $0x2e0] ss:$28 sps:$4 sm:$0xff]   ;;  %v8198_v19 = vld [vmem:[#allocation11 + $0x310] ss:$28 sps:$4 sm:$0xff]   ;;  %v8201_v20 = vld [vmem:[#allocation11 + $0x318] ss:$28 sps:$4 sm:$0xff]  }
 0x51a   :  { %6326 = vmatprep.subr.bf16.mxu0 %v8158_v43  ;;  %v8203_v9 = vld [vmem:[#allocation11 + $0x31c] ss:$28 sps:$4 sm:$0xff]   ;;  %v8206_v21 = vld [vmem:[#allocation11 + $0x34c] ss:$28 sps:$4 sm:$0xff]   ;;  %v8209_v22 = vld [vmem:[#allocation11 + $0x354] ss:$28 sps:$4 sm:$0xff]  }
 0x51b   :  { %v8204_v35 = vld [vmem:[#allocation11 + $0x348] ss:$28 sps:$4 sm:$0xff]   ;;  %v8207_v37 = vld [vmem:[#allocation11 + $0x350] ss:$28 sps:$4 sm:$0xff]  }
 0x51c   :  { %6491 = vmatpush1.bf16.msra.mxu1 %v8159_v44  ;;  %v8212_v23 = vld [vmem:[#allocation11 + $0x384] ss:$28 sps:$4 sm:$0xff]  }
 0x51d   :  { %v8767_v57 = vpop.eup %8766  ;;  %6327 = vmatpush1.bf16.msra.mxu0 %v8156_v42  ;;  %6492 = vmatprep.subr.bf16.mxu1 %v8167_v48 }
 0x51e   :  { %v8769_v2 = vpop.eup %8768  ;;  %6328 = vmatprep.subr.bf16.mxu0 %v8164_v47 }
 0x51f   :  { %v8771_v25 = vpop.eup %8770 }
 0x520   :  { %v8773_v32 = vpop.eup %8772  ;;  %v3212_v34 = vcombine.low %v8767_v57, %v8771_v25  ;;  %6493 = vmatpush1.bf16.msra.mxu1 %v8165_v50  ;;  %v8215_v57 = vld [vmem:[#allocation11 + $0x38c] ss:$28 sps:$4 sm:$0xff]  }
 0x521   :  { %v3213_v40 = vcombine.low %v8769_v2, %v8773_v32  ;;  %6329 = vmatpush1.bf16.msra.mxu0 %v8162_v49  ;;  %6494 = vmatprep.subr.bf16.mxu1 %v8173_v59 }
 0x522   :  { %v9305_v39 = vrot.slane %v3212_v34, %v9141_v54  ;;  %6330 = vmatprep.subr.bf16.mxu0 %v8170_v55 }
 0x523   :  { %v9308_v41 = vrot.slane %v3213_v40, %v9141_v54 }
 0x524   :  { %6495 = vmatpush1.bf16.msra.mxu1 %v8171_v0 }
 0x525   :  { %v3244_v45 = vcombine.low %v9305_v39, %v9308_v41  ;;  %6331 = vmatpush1.bf16.msra.mxu0 %v8168_v63  ;;  %6496 = vmatprep.subr.bf16.mxu1 %v8179_v7 }
 0x526   :  { %6332 = vmatprep.subr.bf16.mxu0 %v8176_v1 }
 0x528   :  { %6497 = vmatpush1.bf16.msra.mxu1 %v8177_v10 }
 0x529   :  { %6333 = vmatpush1.bf16.msra.mxu0 %v8174_v8  ;;  %6498 = vmatprep.subr.bf16.mxu1 %v8185_v18 }
 0x52a   :  { %6334 = vmatprep.subr.bf16.mxu0 %v8182_v15 }
 0x52c   :  { %6499 = vmatpush1.bf16.msra.mxu1 %v8183_v51 }
 0x52d   :  { %6335 = vmatpush1.bf16.msra.mxu0 %v8180_v6  ;;  %6500 = vmatprep.subr.bf16.mxu1 %v8191_v5 }
 0x52e   :  { %6336 = vmatprep.subr.bf16.mxu0 %v8188_v4 }
 0x530   :  { %6501 = vmatpush1.bf16.msra.mxu1 %v8189_v12 }
 0x531   :  { %6337 = vmatpush1.bf16.msra.mxu0 %v8186_v11  ;;  %6502 = vmatprep.subr.bf16.mxu1 %v8197_v26 }
 0x532   :  { %6338 = vmatprep.subr.bf16.mxu0 %v8194_v13 }
 0x534   :  { %6503 = vmatpush1.bf16.msra.mxu1 %v8195_v16 }
 0x535   :  { %6339 = vmatpush1.bf16.msra.mxu0 %v8192_v14  ;;  %6504 = vmatprep.subr.bf16.mxu1 %v8203_v9 }
 0x536   :  { %6340 = vmatprep.subr.bf16.mxu0 %v8200_v17 }
 0x538   :  { %6505 = vmatpush1.bf16.msra.mxu1 %v8201_v20 }
 0x539   :  { %6341 = vmatpush1.bf16.msra.mxu0 %v8198_v19  ;;  %6506 = vmatprep.subr.bf16.mxu1 %v8209_v22 }
 0x53a   :  { %6342 = vmatprep.subr.bf16.mxu0 %v8206_v21 }
 0x53c   :  { %6507 = vmatpush1.bf16.msra.mxu1 %v8207_v37 }
 0x53d   :  { %6343 = vmatpush1.bf16.msra.mxu0 %v8204_v35  ;;  %6517 = vmatprep.subr.bf16.mxu1 %v8215_v57 }
 0x53e   :  { %6353 = vmatprep.subr.bf16.mxu0 %v8212_v23 }
 0x57c   :  { %v9312_v2 = vpop.f32.mrb[8].mxu0 }
 0x57d   :  { %v3068_v62 = vrot.slane %v9312_v2, 4  ;;  %v3104_v53 = vmul.f32 %v9312_v2, %v9312_v2  ;;  %v9317_v25 = vpop.f32.mrb[16].mxu1  ;;  %v9319_v27 = vpop.f32.mrb[9].mxu0 }
 0x57e   :  { %v3080_v29 = vrot.slane %v9317_v25, 4  ;;  %v3106_v32 = vmul.f32 %v9317_v25, %v9317_v25  ;;  %v3074_v34 = vrot.slane %v9319_v27, 4  ;;  %v3105_v40 = vmul.f32 %v9319_v27, %v9319_v27  ;;  %v9327_v42 = vpop.f32.mrb[17].mxu1  ;;  %v2959_v43 = vpop.f32.mrb[10].mxu0 }
 0x57f   :  { %v3069_v44 = vadd.f32 %v3068_v62, %v9312_v2  ;;  %v3132_v46 = vrot.slane %v3104_v53, 4  ;;  %v3086_v47 = vrot.slane %v9327_v42, 4  ;;  %v3107_v48 = vmul.f32 %v9327_v42, %v9327_v42  ;;  %v3041_v49 = vpop.f32.mrb[18].mxu1  ;;  %v2960_v50 = vpop.f32.mrb[11].mxu0 }
 0x580   :  { %v3081_v55 = vadd.f32 %v3080_v29, %v9317_v25  ;;  %v3144_v59 = vrot.slane %v3106_v32, 4  ;;  %v3075_v63 = vadd.f32 %v3074_v34, %v9319_v27  ;;  %v3138_v0 = vrot.slane %v3105_v40, 4  ;;  %v3042_v1 = vpop.f32.mrb[19].mxu1 }
 0x581   :  { %v3070_v7 = vrot.slane %v3069_v44, 2  ;;  %v3133_v8 = vadd.f32 %v3132_v46, %v3104_v53  ;;  %v3087_v10 = vadd.f32 %v3086_v47, %v9327_v42  ;;  %v3150_v15 = vrot.slane %v3107_v48, 4 }
 0x582   :  { %v3082_v18 = vrot.slane %v3081_v55, 2  ;;  %v3145_v6 = vadd.f32 %v3144_v59, %v3106_v32  ;;  %v3076_v51 = vrot.slane %v3075_v63, 2  ;;  %v3139_v4 = vadd.f32 %v3138_v0, %v3105_v40 }
 0x583   :  { %v3071_v5 = vadd.f32 %v3070_v7, %v3069_v44  ;;  %v3134_v11 = vrot.slane %v3133_v8, 2  ;;  %v3088_v12 = vrot.slane %v3087_v10, 2  ;;  %v3151_v13 = vadd.f32 %v3150_v15, %v3107_v48 }
 0x584   :  { %v3083_v26 = vadd.f32 %v3082_v18, %v3081_v55  ;;  %v3146_v14 = vrot.slane %v3145_v6, 2  ;;  %v3077_v16 = vadd.f32 %v3076_v51, %v3075_v63  ;;  %v3140_v17 = vrot.slane %v3139_v4, 2 }
 0x585   :  { %v3072_v9 = vrot.slane %v3071_v5, 1  ;;  %v3135_v19 = vadd.f32 %v3134_v11, %v3133_v8  ;;  %v3089_v20 = vadd.f32 %v3088_v12, %v3087_v10  ;;  %v3152_v21 = vrot.slane %v3151_v13, 2 }
 0x586   :  { %v3084_v22 = vrot.slane %v3083_v26, 1  ;;  %v3147_v35 = vadd.f32 %v3146_v14, %v3145_v6  ;;  %v3078_v37 = vrot.slane %v3077_v16, 1  ;;  %v3141_v23 = vadd.f32 %v3140_v17, %v3139_v4 }
 0x587   :  { %v3073_v57 = vadd.f32 %v3072_v9, %v3071_v5  ;;  %v3136_v62 = vrot.slane %v3135_v19, 1  ;;  %v3090_v53 = vrot.slane %v3089_v20, 1  ;;  %v3153_v29 = vadd.f32 %v3152_v21, %v3151_v13 }
 0x588   :  { %v3085_v32 = vadd.f32 %v3084_v22, %v3083_v26  ;;  %v3148_v34 = vrot.slane %v3147_v35, 1  ;;  %v3079_v40 = vadd.f32 %v3078_v37, %v3077_v16  ;;  %v3142_v43 = vrot.slane %v3141_v23, 1 }
 0x589   :  { %v9336_v44 = vmul.f32 0.125, %v3073_v57  ;;  %v3137_v46 = vadd.f32 %v3136_v62, %v3135_v19  ;;  %v3091_v47 = vadd.f32 %v3090_v53, %v3089_v20  ;;  %v3154_v48 = vrot.slane %v3153_v29, 1 }
 0x58a   :  { %v9338_v49 = vmul.f32 0.125, %v3085_v32  ;;  %v3149_v50 = vadd.f32 %v3148_v34, %v3147_v35  ;;  %v3097_v55 = vmul.f32 0.125, %v3079_v40  ;;  %v3143_v59 = vadd.f32 %v3142_v43, %v3141_v23  ;;  %v132_v32 = vld [vmem:[#allocation13 + $0x5] ss:$8 sm:$0xf0] }
 0x58b   :  { %v3160_v63 = vmul.f32 0.125, %v3137_v46  ;;  %v3168_v0 = vmul.f32 %v9336_v44, %v9336_v44  ;;  %v3099_v1 = vmul.f32 0.125, %v3091_v47  ;;  %v3155_v7 = vadd.f32 %v3154_v48, %v3153_v29  ;;  %v131_v29 = vld [vmem:[#allocation13 + $0x5] ss:$8 sm:$0xf] }
 0x58c   :  { %v3162_v8 = vmul.f32 0.125, %v3149_v50  ;;  %v3170_v10 = vmul.f32 %v9338_v49, %v9338_v49  ;;  %v3161_v15 = vmul.f32 0.125, %v3143_v59  ;;  %v3169_v18 = vmul.f32 %v3097_v55, %v3097_v55 }
 0x58d   :  { %v3176_v6 = vsub.f32 %v3160_v63, %v3168_v0  ;;  %v3163_v51 = vmul.f32 0.125, %v3155_v7  ;;  %v3171_v4 = vmul.f32 %v3099_v1, %v3099_v1  ;;  %v3252_v40 = vrot.slane %v3244_v45, %v9141_v54 }
 0x58e   :  { %v3178_v5 = vsub.f32 %v3162_v8, %v3170_v10  ;;  %v3177_v11 = vsub.f32 %v3161_v15, %v3169_v18  ;;  %v133_v43 = vor.u32 %v132_v32, %v131_v29  ;;  %v9352_v48 = vsub.s32 4, %v9138_v52 }
 0x58f   :  { %v3184_v12 = vmax.f32 %v3176_v6, 0.0  ;;  %v3179_v13 = vsub.f32 %v3163_v51, %v3171_v4  ;;  %v9355_v50 = vsub.s32 5, %v9138_v52  ;;  %v9358_v59 = vsub.s32 6, %v9138_v52 }
 0x590   :  { %v3186_v26 = vmax.f32 %v3178_v5, 0.0  ;;  %v3185_v14 = vmax.f32 %v3177_v11, 0.0  ;;  %v3294_v63 = vsub.s32 7, %v9138_v52 }
 0x591   :  { %v3192_v16 = vadd.f32 0.8, %v3184_v12  ;;  %v3187_v17 = vmax.f32 %v3179_v13, 0.0 }
 0x592   :  { %v3194_v9 = vadd.f32 0.8, %v3186_v26  ;;  %v3193_v19 = vadd.f32 0.8, %v3185_v14 }
 0x593   :  { %8774 = vrsqrt.f32 %v3192_v16  ;;  %v3195_v20 = vadd.f32 0.8, %v3187_v17 }
 0x594   :  { %8776 = vrsqrt.f32 %v3194_v9 }
 0x595   :  { %8778 = vrsqrt.f32 %v3193_v19 }
 0x596   :  { %8780 = vrsqrt.f32 %v3195_v20  ;;  %v135_v20 = vld [vmem:[#allocation13 + $0x6] ss:$8 sm:$0xf] }
 0x59d   :  { %v8775_v21 = vpop.eup %8774 }
 0x59e   :  { %v8777_v22 = vpop.eup %8776 }
 0x59f   :  { %v8779_v35 = vpop.eup %8778 }
 0x5a0   :  { %v8781_v37 = vpop.eup %8780  ;;  %v3214_v23 = vcombine.low %v8775_v21, %v8779_v35 }
 0x5a1   :  { %v3215_v57 = vcombine.low %v8777_v22, %v8781_v37 }
 0x5a2   :  { %v3236_v62 = vrot.slane %v3214_v23, %v9141_v54 }
 0x5a3   :  { %v3243_v53 = vrot.slane %v3215_v57, %v9141_v54 }
 0x5a5   :  { %v3245_v34 = vcombine.low %v3236_v62, %v3243_v53 }
 0x5a7   :  { %v3259_v46 = vrot.slane %v3245_v34, %v9141_v54 }
 0x5a9   :  { %v3260_v47 = vcombine.low %v3252_v40, %v3259_v46 }
 0x5ab   :  { %v3262_v0 = vmul.f32 %v3260_v47, %v133_v43 }
 0x5ad   :  { %v3267_v7 = vrot.slane %v3262_v0, %v9146_v60  ;;  %v3271_v39 = vrot.slane %v3262_v0, %v9149_v61  ;;  %v3275_v41 = vrot.slane %v3262_v0, %v9208_v56  ;;  %v3279_v45 = vrot.slane %v3262_v0, %v9211_v58 }
 0x5ae   :  { %v3283_v8 = vrot.slane %v3262_v0, %v9352_v48  ;;  %v3287_v10 = vrot.slane %v3262_v0, %v9355_v50  ;;  %v3291_v15 = vrot.slane %v3262_v0, %v9358_v59  ;;  %v3295_v18 = vrot.slane %v3262_v0, %v3294_v63 }
 0x5af   :  { %v3304_v6 = vmul.f32 %v3267_v7, %v9288_v28  ;;  %v3305_v52 = vmul.f32 %v3271_v39, %v9292_v33  ;;  %v3306_v51 = vmul.f32 %v3275_v41, %v9290_v3  ;;  %v3307_v4 = vmul.f32 %v3279_v45, %v9294_v36 }
 0x5b0   :  { %v3308_v5 = vmul.f32 %v3283_v8, %v9336_v44  ;;  %v3309_v11 = vmul.f32 %v3287_v10, %v3097_v55  ;;  %v3310_v12 = vmul.f32 %v3291_v15, %v9338_v49  ;;  %v3311_v13 = vmul.f32 %v3295_v18, %v3099_v1 }
 0x5b1   :  { %v3320_v26 = vcombine.low %v3304_v6, %v3305_v52  ;;  %v3321_v14 = vcombine.low %v3306_v51, %v3307_v4  ;;  %v3378_v16 = vmul.f32 %v3295_v18, %v9327_v42  ;;  %v3372_v17 = vmul.f32 %v3271_v39, %v9274_v30  ;;  %v8213_v18 = vld [vmem:[#allocation11 + $0x388] ss:$28 sps:$4 sm:$0xff]   ;;  %v8218_v51 = vld [vmem:[#allocation11 + $0x3bc] ss:$28 sps:$4 sm:$0xff]  }
 0x5b2   :  { %v3322_v9 = vcombine.low %v3308_v5, %v3309_v11  ;;  %v3323_v28 = vcombine.low %v3310_v12, %v3311_v13  ;;  %v3371_v33 = vmul.f32 %v3267_v7, %v9264_v38  ;;  %v3374_v3 = vmul.f32 %v3279_v45, %v9276_v31  ;;  %v136_v38 = vld [vmem:[#allocation13 + $0x6] ss:$8 sm:$0xf0] }
 0x5b3   :  { %v3330_v36 = vrot.slane %v3320_v26, %v9141_v54  ;;  %v3337_v44 = vrot.slane %v3321_v14, %v9141_v54  ;;  %v3373_v55 = vmul.f32 %v3275_v41, %v9266_v24  ;;  %v3376_v49 = vmul.f32 %v3287_v10, %v9319_v27  ;;  %v8221_v4 = vld [vmem:[#allocation11 + $0x3c4] ss:$28 sps:$4 sm:$0xff]   ;;  %v8216_v11 = vld [vmem:[#allocation11 + $0x3b8] ss:$28 sps:$4 sm:$0xff]   ;;  %v8222_v14 = vld [vmem:[#allocation11 + $0x3f0] ss:$28 sps:$4 sm:$0xff]  }
 0x5b4   :  { %v3344_v1 = vrot.slane %v3322_v9, %v9141_v54  ;;  %v3351_v42 = vrot.slane %v3323_v28, %v9141_v54  ;;  %v3375_v30 = vmul.f32 %v3283_v8, %v9312_v2  ;;  %v3377_v19 = vmul.f32 %v3291_v15, %v9317_v25  ;;  %v8210_v15 = vld [vmem:[#allocation11 + $0x380] ss:$28 sps:$4 sm:$0xff]   ;;  %v8224_v13 = vld [vmem:[#allocation11 + $0x3f4] ss:$28 sps:$4 sm:$0xff]   ;;  %v8228_v28 = vld [vmem:[#allocation11 + $0x428] ss:$28 sps:$4 sm:$0xff]  }
 0x5b5   :  { %v3352_v21 = vcombine.low %v3330_v36, %v3337_v44  ;;  %v137_v35 = vor.u32 %v136_v38, %v135_v20  ;;  %v8219_v12 = vld [vmem:[#allocation11 + $0x3c0] ss:$28 sps:$4 sm:$0xff]   ;;  %v8233_v9 = vld [vmem:[#allocation11 + $0x434] ss:$28 sps:$4 sm:$0xff]   ;;  %v8239_v36 = vld [vmem:[#allocation11 + $0x46c] ss:$28 sps:$4 sm:$0xff]  }
 0x5b6   :  { %v3353_v31 = vcombine.low %v3344_v1, %v3351_v42  ;;  %v8227_v26 = vld [vmem:[#allocation11 + $0x3fc] ss:$28 sps:$4 sm:$0xff]   ;;  %v8245_v1 = vld [vmem:[#allocation11 + $0x4a4] ss:$28 sps:$4 sm:$0xff]   ;;  %v8246_v38 = vld [vmem:[#allocation11 + $0x4d0] ss:$28 sps:$4 sm:$0xff]  }
 0x5b7   :  { %v3360_v22 = vrot.slane %v3352_v21, %v9141_v54  ;;  %v8234_v44 = vld [vmem:[#allocation11 + $0x460] ss:$28 sps:$4 sm:$0xff]   ;;  %v8240_v42 = vld [vmem:[#allocation11 + $0x498] ss:$28 sps:$4 sm:$0xff]  }
 0x5b8   :  { %v3367_v37 = vrot.slane %v3353_v31, %v9141_v54  ;;  %v8251_v20 = vld [vmem:[#allocation11 + $0x4dc] ss:$28 sps:$4 sm:$0xff]   ;;  %v8254_v31 = vld [vmem:[#allocation11 + $0x50c] ss:$28 sps:$4 sm:$0xff]  }
 0x5b9   :  { %v8249_v21 = vld [vmem:[#allocation11 + $0x4d8] ss:$28 sps:$4 sm:$0xff]  }
 0x5ba   :  { %v3368_v24 = vcombine.low %v3360_v22, %v3367_v37  ;;  %v8257_v22 = vld [vmem:[#allocation11 + $0x514] ss:$28 sps:$4 sm:$0xff]  }
 0x5bb   :  { %v8255_v37 = vld [vmem:[#allocation11 + $0x510] ss:$28 sps:$4 sm:$0xff]  }
 0x5bc   :  { %v3370_v23 = vsub.f32 %v137_v35, %v3368_v24  ;;  %v8252_v35 = vld [vmem:[#allocation11 + $0x508] ss:$28 sps:$4 sm:$0xff]  }
 0x5bd   :  { %v8260_v24 = vld [vmem:[#allocation11 + $0x544] ss:$28 sps:$4 sm:$0xff]  }
 0x5be   :  { %v3411_v27 = vrot.slane %v3370_v23, %v3294_v63  ;;  %v3387_v57 = vrot.slane %v3370_v23, %v9149_v61  ;;  %v3383_v62 = vrot.slane %v3370_v23, %v9146_v60  ;;  %v3395_v2 = vrot.slane %v3370_v23, %v9211_v58 }
 0x5bf   :  { %v3391_v25 = vrot.slane %v3370_v23, %v9208_v56  ;;  %v3403_v53 = vrot.slane %v3370_v23, %v9355_v50  ;;  %v3399_v29 = vrot.slane %v3370_v23, %v9352_v48  ;;  %v3407_v32 = vrot.slane %v3370_v23, %v9358_v59  ;;  %v8263_v23 = vld [vmem:[#allocation11 + $0x54c] ss:$28 sps:$4 sm:$0xff]  }
 0x5c0   :  { %v9395_v34 = vadd.f32 %v3411_v27, %v3378_v16  ;;  %v3421_v54 = vadd.f32 %v3387_v57, %v3372_v17  ;;  %v3420_v40 = vadd.f32 %v3383_v62, %v3371_v33  ;;  %v3423_v43 = vadd.f32 %v3395_v2, %v3374_v3  ;;  %v8225_v16 = vld [vmem:[#allocation11 + $0x3f8] ss:$28 sps:$4 sm:$0xff]   ;;  %v8230_v17 = vld [vmem:[#allocation11 + $0x42c] ss:$28 sps:$4 sm:$0xff]   ;;  %v8236_v3 = vld [vmem:[#allocation11 + $0x464] ss:$28 sps:$4 sm:$0xff]  }
 0x5c1   :  { %v9397_v46 = vadd.f32 %v3391_v25, %v3373_v55  ;;  %v9399_v47 = vadd.f32 %v3403_v53, %v3376_v49  ;;  %v9401_v63 = vadd.f32 %v3399_v29, %v3375_v30  ;;  %v9403_v0 = vadd.f32 %v3407_v32, %v3377_v19  ;;  %v8231_v33 = vld [vmem:[#allocation11 + $0x430] ss:$28 sps:$4 sm:$0xff]   ;;  %v8237_v55 = vld [vmem:[#allocation11 + $0x468] ss:$28 sps:$4 sm:$0xff]   ;;  %v8242_v49 = vld [vmem:[#allocation11 + $0x49c] ss:$28 sps:$4 sm:$0xff]  }
 0x5c2   :  { %vm3429_vm8 = vcmp.gt.f32.partialorder %v3421_v54, 0.0  ;;  %v3437_v7 = vmul.f32 0.2, %v3421_v54  ;;  %vm3428_vm9 = vcmp.gt.f32.partialorder %v3420_v40, 0.0  ;;  %v3436_v39 = vmul.f32 0.2, %v3420_v40 }
 0x5c3   :  { %vm3431_vm10 = vcmp.gt.f32.partialorder %v3423_v43, 0.0  ;;  %v3439_v41 = vmul.f32 0.2, %v3423_v43  ;;  %v8243_v30 = vld [vmem:[#allocation11 + $0x4a0] ss:$28 sps:$4 sm:$0xff]   ;;  %vm3430_vm11 = vcmp.gt.f32.partialorder %v9397_v46, 0.0 }
 0x5c4   :  { %v3445_v45 = vsel %vm3429_vm8, %v3421_v54, %v3437_v7  ;;  %v3444_v8 = vsel %vm3428_vm9, %v3420_v40, %v3436_v39  ;;  %v8248_v19 = vld [vmem:[#allocation11 + $0x4d4] ss:$28 sps:$4 sm:$0xff]   ;;  %v8258_v27 = vld [vmem:[#allocation11 + $0x540] ss:$28 sps:$4 sm:$0xff]   ;;  %v8261_v57 = vld [vmem:[#allocation11 + $0x548] ss:$28 sps:$4 sm:$0xff]  }
 0x5c5   :  { %v9405_v10 = vpack.c.bf16 %v3445_v45, %v3445_v45  ;;  %v9407_v6 = vpack.c.bf16 %v3444_v8, %v3444_v8  ;;  %v3447_v52 = vsel %vm3431_vm10, %v3423_v43, %v3439_v41  ;;  %v8266_v62 = vld [vmem:[#allocation11 + $0x57c] ss:$28 sps:$4 sm:$0xff]   ;;  %v8269_v2 = vld [vmem:[#allocation11 + $0x584] ss:$28 sps:$4 sm:$0xff]   ;;  %v8272_v29 = vld [vmem:[#allocation11 + $0x5b4] ss:$28 sps:$4 sm:$0xff]  }
 0x5c6   :  { %v9413_v5 = vpack.c.bf16 %v3447_v52, %v3447_v52  ;;  %v8264_v25 = vld [vmem:[#allocation11 + $0x578] ss:$28 sps:$4 sm:$0xff]   ;;  %v8267_v53 = vld [vmem:[#allocation11 + $0x580] ss:$28 sps:$4 sm:$0xff]   ;;  %v8270_v54 = vld [vmem:[#allocation11 + $0x5b0] ss:$28 sps:$4 sm:$0xff]  }
 0x5c7   :  { %6344 = vmatprep.mubr.bf16.mxu0 %v9405_v10  ;;  %6508 = vmatprep.mubr.bf16.mxu1 %v9405_v10  ;;  %v8275_v32 = vld [vmem:[#allocation11 + $0x5bc] ss:$28 sps:$4 sm:$0xff]   ;;  %v8278_v43 = vld [vmem:[#allocation11 + $0x5ec] ss:$28 sps:$4 sm:$0xff]   ;;  %v8281_v7 = vld [vmem:[#allocation11 + $0x5f4] ss:$28 sps:$4 sm:$0xff]  }
 0x5c8   :  { %6345 = vmatmul.mubr.bf16.vlgmr.msra.gmra.mrb[12].mxu0 %v9407_v6  ;;  %6509 = vmatmul.mubr.bf16.vlgmr.msra.gmra.mrb[20].mxu1 %v9407_v6  ;;  %v8273_v40 = vld [vmem:[#allocation11 + $0x5b8] ss:$28 sps:$4 sm:$0xff]   ;;  %v8276_v39 = vld [vmem:[#allocation11 + $0x5e8] ss:$28 sps:$4 sm:$0xff]   ;;  %v8279_v41 = vld [vmem:[#allocation11 + $0x5f0] ss:$28 sps:$4 sm:$0xff]  }
 0x5c9   :  { %6354 = vmatpush1.bf16.msra.mxu0 %v8210_v15  ;;  %6518 = vmatpush1.bf16.msra.mxu1 %v8213_v18  ;;  %v8284_v45 = vld [vmem:[#allocation11 + $0x624] ss:$28 sps:$4 sm:$0xff]   ;;  %v8287_v8 = vld [vmem:[#allocation11 + $0x62c] ss:$28 sps:$4 sm:$0xff]   ;;  %v8290_v52 = vld [vmem:[#allocation11 + $0x65c] ss:$28 sps:$4 sm:$0xff]  }
 0x5ca   :  { %6385 = vmatprep.mubr.bf16.mxu0 %v9413_v5  ;;  %6549 = vmatprep.mubr.bf16.mxu1 %v9413_v5  ;;  %v8282_v15 = vld [vmem:[#allocation11 + $0x620] ss:$28 sps:$4 sm:$0xff]   ;;  %v8285_v18 = vld [vmem:[#allocation11 + $0x628] ss:$28 sps:$4 sm:$0xff]   ;;  %vm3433_vm12 = vcmp.gt.f32.partialorder %v9399_v47, 0.0  ;;  %vm3432_vm13 = vcmp.gt.f32.partialorder %v9401_v63, 0.0 }
 0x5cb   :  { %6355 = vmatprep.subr.bf16.mxu0 %v8218_v51  ;;  %6519 = vmatprep.subr.bf16.mxu1 %v8221_v4  ;;  %v8293_v51 = vld [vmem:[#allocation11 + $0x664] ss:$28 sps:$4 sm:$0xff]   ;;  %v8288_v4 = vld [vmem:[#allocation11 + $0x658] ss:$28 sps:$4 sm:$0xff]   ;;  %vm3435_vm14 = vcmp.gt.f32.partialorder %v9395_v34, 0.0  ;;  %vm3434_vm15 = vcmp.gt.f32.partialorder %v9403_v0, 0.0 }
 0x5cd   :  { %6356 = vmatpush1.bf16.msra.mxu0 %v8216_v11  ;;  %6520 = vmatpush1.bf16.msra.mxu1 %v8219_v12  ;;  %v8291_v11 = vld [vmem:[#allocation11 + $0x660] ss:$28 sps:$4 sm:$0xff]   ;;  %v8296_v12 = vld [vmem:[#allocation11 + $0x694] ss:$28 sps:$4 sm:$0xff]  }
 0x5ce   :  { %6357 = vmatprep.subr.bf16.mxu0 %v8224_v13  ;;  %6521 = vmatprep.subr.bf16.mxu1 %v8227_v26  ;;  %v8299_v13 = vld [vmem:[#allocation11 + $0x69c] ss:$28 sps:$4 sm:$0xff]   ;;  %v8294_v26 = vld [vmem:[#allocation11 + $0x690] ss:$28 sps:$4 sm:$0xff]  }
 0x5d1   :  { %6358 = vmatpush1.bf16.msra.mxu0 %v8222_v14  ;;  %6522 = vmatpush1.bf16.msra.mxu1 %v8225_v16  ;;  %v8297_v14 = vld [vmem:[#allocation11 + $0x698] ss:$28 sps:$4 sm:$0xff]   ;;  %v8302_v16 = vld [vmem:[#allocation11 + $0x6cc] ss:$28 sps:$4 sm:$0xff]  }
 0x5d2   :  { %6359 = vmatprep.subr.bf16.mxu0 %v8230_v17  ;;  %6523 = vmatprep.subr.bf16.mxu1 %v8233_v9  ;;  %v8305_v17 = vld [vmem:[#allocation11 + $0x6d4] ss:$28 sps:$4 sm:$0xff]   ;;  %v3438_v9 = vmul.f32 0.2, %v9397_v46 }
 0x5d5   :  { %6360 = vmatpush1.bf16.msra.mxu0 %v8228_v28  ;;  %6524 = vmatpush1.bf16.msra.mxu1 %v8231_v33  ;;  %v3441_v28 = vmul.f32 0.2, %v9399_v47  ;;  %v8300_v33 = vld [vmem:[#allocation11 + $0x6c8] ss:$28 sps:$4 sm:$0xff]  }
 0x5d6   :  { %6361 = vmatprep.subr.bf16.mxu0 %v8236_v3  ;;  %6525 = vmatprep.subr.bf16.mxu1 %v8239_v36  ;;  %v8303_v3 = vld [vmem:[#allocation11 + $0x6d0] ss:$28 sps:$4 sm:$0xff]   ;;  %v8308_v36 = vld [vmem:[#allocation11 + $0x704] ss:$28 sps:$4 sm:$0xff]  }
 0x5d9   :  { %6362 = vmatpush1.bf16.msra.mxu0 %v8234_v44  ;;  %6526 = vmatpush1.bf16.msra.mxu1 %v8237_v55  ;;  %v8311_v44 = vld [vmem:[#allocation11 + $0x70c] ss:$28 sps:$4 sm:$0xff]   ;;  %v3446_v55 = vsel %vm3430_vm11, %v9397_v46, %v3438_v9  ;;  %v8312_v46 = vld [vmem:[#allocation11 + $0x738] ss:$28 sps:$4 sm:$0xff]  }
 0x5da   :  { %6363 = vmatprep.subr.bf16.mxu0 %v8242_v49  ;;  %6527 = vmatprep.subr.bf16.mxu1 %v8245_v1  ;;  %v3449_v49 = vsel %vm3433_vm12, %v9399_v47, %v3441_v28  ;;  %v8306_v1 = vld [vmem:[#allocation11 + $0x700] ss:$28 sps:$4 sm:$0xff]   ;;  %v8369_v9 = vld [vmem:[#allocation11 + $0x938] ss:$28 sps:$4 sm:$0xff]   ;;  %v8374_v28 = vld [vmem:[#allocation11 + $0x96c] ss:$28 sps:$4 sm:$0xff]  }
 0x5db   :  { %v8315_v47 = vld [vmem:[#allocation11 + $0x740] ss:$28 sps:$4 sm:$0xff]  }
 0x5dd   :  { %6364 = vmatpush1.bf16.msra.mxu0 %v8240_v42  ;;  %6528 = vmatpush1.bf16.msra.mxu1 %v8243_v30  ;;  %v9423_v42 = vpack.c.bf16 %v3446_v55, %v3446_v55  ;;  %v8309_v30 = vld [vmem:[#allocation11 + $0x708] ss:$28 sps:$4 sm:$0xff]  }
 0x5de   :  { %6365 = vmatprep.subr.bf16.mxu0 %v8248_v19  ;;  %6529 = vmatprep.subr.bf16.mxu1 %v8251_v20  ;;  %v9425_v19 = vpack.c.bf16 %v3449_v49, %v3449_v49  ;;  %v8314_v20 = vld [vmem:[#allocation11 + $0x73c] ss:$28 sps:$4 sm:$0xff]   ;;  %v8383_v55 = vld [vmem:[#allocation11 + $0x9ac] ss:$28 sps:$4 sm:$0xff]  }
 0x5df   :  { %v8378_v49 = vld [vmem:[#allocation11 + $0x9a0] ss:$28 sps:$4 sm:$0xff]  }
 0x5e1   :  { %6366 = vmatpush1.bf16.msra.mxu0 %v8246_v38  ;;  %6530 = vmatpush1.bf16.msra.mxu1 %v8249_v21  ;;  %v8317_v38 = vld [vmem:[#allocation11 + $0x744] ss:$28 sps:$4 sm:$0xff]   ;;  %v8320_v21 = vld [vmem:[#allocation11 + $0x774] ss:$28 sps:$4 sm:$0xff]  }
 0x5e2   :  { %6367 = vmatprep.subr.bf16.mxu0 %v8254_v31  ;;  %6531 = vmatprep.subr.bf16.mxu1 %v8257_v22  ;;  %v8323_v31 = vld [vmem:[#allocation11 + $0x77c] ss:$28 sps:$4 sm:$0xff]   ;;  %v8318_v22 = vld [vmem:[#allocation11 + $0x770] ss:$28 sps:$4 sm:$0xff]  }
 0x5e5   :  { %6368 = vmatpush1.bf16.msra.mxu0 %v8252_v35  ;;  %6532 = vmatpush1.bf16.msra.mxu1 %v8255_v37  ;;  %v8321_v35 = vld [vmem:[#allocation11 + $0x778] ss:$28 sps:$4 sm:$0xff]   ;;  %v8326_v37 = vld [vmem:[#allocation11 + $0x7ac] ss:$28 sps:$4 sm:$0xff]  }
 0x5e6   :  { %6369 = vmatprep.subr.bf16.mxu0 %v8260_v24  ;;  %6533 = vmatprep.subr.bf16.mxu1 %v8263_v23  ;;  %v8329_v24 = vld [vmem:[#allocation11 + $0x7b4] ss:$28 sps:$4 sm:$0xff]   ;;  %v8324_v23 = vld [vmem:[#allocation11 + $0x7a8] ss:$28 sps:$4 sm:$0xff]  }
 0x5e9   :  { %6370 = vmatpush1.bf16.msra.mxu0 %v8258_v27  ;;  %6534 = vmatpush1.bf16.msra.mxu1 %v8261_v57  ;;  %v8327_v27 = vld [vmem:[#allocation11 + $0x7b0] ss:$28 sps:$4 sm:$0xff]   ;;  %v8332_v57 = vld [vmem:[#allocation11 + $0x7e4] ss:$28 sps:$4 sm:$0xff]  }
 0x5ea   :  { %6371 = vmatprep.subr.bf16.mxu0 %v8266_v62  ;;  %6535 = vmatprep.subr.bf16.mxu1 %v8269_v2  ;;  %v8335_v62 = vld [vmem:[#allocation11 + $0x7ec] ss:$28 sps:$4 sm:$0xff]   ;;  %v8330_v2 = vld [vmem:[#allocation11 + $0x7e0] ss:$28 sps:$4 sm:$0xff]  }
 0x5ed   :  { %6372 = vmatpush1.bf16.msra.mxu0 %v8264_v25  ;;  %6536 = vmatpush1.bf16.msra.mxu1 %v8267_v53  ;;  %v8333_v25 = vld [vmem:[#allocation11 + $0x7e8] ss:$28 sps:$4 sm:$0xff]   ;;  %v8338_v53 = vld [vmem:[#allocation11 + $0x81c] ss:$28 sps:$4 sm:$0xff]  }
 0x5ee   :  { %6373 = vmatprep.subr.bf16.mxu0 %v8272_v29  ;;  %6537 = vmatprep.subr.bf16.mxu1 %v8275_v32  ;;  %v8341_v29 = vld [vmem:[#allocation11 + $0x824] ss:$28 sps:$4 sm:$0xff]   ;;  %v8336_v32 = vld [vmem:[#allocation11 + $0x818] ss:$28 sps:$4 sm:$0xff]  }
 0x5f1   :  { %6374 = vmatpush1.bf16.msra.mxu0 %v8270_v54  ;;  %6538 = vmatpush1.bf16.msra.mxu1 %v8273_v40  ;;  %v8339_v54 = vld [vmem:[#allocation11 + $0x820] ss:$28 sps:$4 sm:$0xff]   ;;  %v8344_v40 = vld [vmem:[#allocation11 + $0x854] ss:$28 sps:$4 sm:$0xff]  }
 0x5f2   :  { %6375 = vmatprep.subr.bf16.mxu0 %v8278_v43  ;;  %6539 = vmatprep.subr.bf16.mxu1 %v8281_v7  ;;  %v8347_v43 = vld [vmem:[#allocation11 + $0x85c] ss:$28 sps:$4 sm:$0xff]   ;;  %v8342_v7 = vld [vmem:[#allocation11 + $0x850] ss:$28 sps:$4 sm:$0xff]  }
 0x5f5   :  { %6376 = vmatpush1.bf16.msra.mxu0 %v8276_v39  ;;  %6540 = vmatpush1.bf16.msra.mxu1 %v8279_v41  ;;  %v8345_v39 = vld [vmem:[#allocation11 + $0x858] ss:$28 sps:$4 sm:$0xff]   ;;  %v8350_v41 = vld [vmem:[#allocation11 + $0x88c] ss:$28 sps:$4 sm:$0xff]  }
 0x5f6   :  { %6377 = vmatprep.subr.bf16.mxu0 %v8284_v45  ;;  %6541 = vmatprep.subr.bf16.mxu1 %v8287_v8  ;;  %v8353_v45 = vld [vmem:[#allocation11 + $0x894] ss:$28 sps:$4 sm:$0xff]   ;;  %v8348_v8 = vld [vmem:[#allocation11 + $0x888] ss:$28 sps:$4 sm:$0xff]  }
 0x5f9   :  { %6378 = vmatpush1.bf16.msra.mxu0 %v8282_v15  ;;  %6542 = vmatpush1.bf16.msra.mxu1 %v8285_v18  ;;  %v8351_v15 = vld [vmem:[#allocation11 + $0x890] ss:$28 sps:$4 sm:$0xff]   ;;  %v8356_v18 = vld [vmem:[#allocation11 + $0x8c4] ss:$28 sps:$4 sm:$0xff]  }
 0x5fa   :  { %6379 = vmatprep.subr.bf16.mxu0 %v8290_v52  ;;  %6543 = vmatprep.subr.bf16.mxu1 %v8293_v51  ;;  %v8359_v52 = vld [vmem:[#allocation11 + $0x8cc] ss:$28 sps:$4 sm:$0xff]   ;;  %v8354_v51 = vld [vmem:[#allocation11 + $0x8c0] ss:$28 sps:$4 sm:$0xff]  }
 0x5fd   :  { %6380 = vmatpush1.bf16.msra.mxu0 %v8288_v4  ;;  %6544 = vmatpush1.bf16.msra.mxu1 %v8291_v11  ;;  %v8357_v4 = vld [vmem:[#allocation11 + $0x8c8] ss:$28 sps:$4 sm:$0xff]   ;;  %v8362_v11 = vld [vmem:[#allocation11 + $0x8fc] ss:$28 sps:$4 sm:$0xff]  }
 0x5fe   :  { %6381 = vmatprep.subr.bf16.mxu0 %v8296_v12  ;;  %6545 = vmatprep.subr.bf16.mxu1 %v8299_v13  ;;  %v8365_v12 = vld [vmem:[#allocation11 + $0x904] ss:$28 sps:$4 sm:$0xff]   ;;  %v8360_v13 = vld [vmem:[#allocation11 + $0x8f8] ss:$28 sps:$4 sm:$0xff]  }
 0x601   :  { %6382 = vmatpush1.bf16.msra.mxu0 %v8294_v26  ;;  %6546 = vmatpush1.bf16.msra.mxu1 %v8297_v14  ;;  %v8363_v26 = vld [vmem:[#allocation11 + $0x900] ss:$28 sps:$4 sm:$0xff]   ;;  %v8368_v14 = vld [vmem:[#allocation11 + $0x934] ss:$28 sps:$4 sm:$0xff]  }
 0x602   :  { %6383 = vmatprep.subr.bf16.mxu0 %v8302_v16  ;;  %6547 = vmatprep.subr.bf16.mxu1 %v8305_v17  ;;  %v8371_v16 = vld [vmem:[#allocation11 + $0x93c] ss:$28 sps:$4 sm:$0xff]   ;;  %v8366_v17 = vld [vmem:[#allocation11 + $0x930] ss:$28 sps:$4 sm:$0xff]  }
 0x605   :  { %6384 = vmatpush1.bf16.msra.mxu0 %v8300_v33  ;;  %6548 = vmatpush1.bf16.msra.mxu1 %v8303_v3  ;;  %v8377_v33 = vld [vmem:[#allocation11 + $0x974] ss:$28 sps:$4 sm:$0xff]   ;;  %v8372_v3 = vld [vmem:[#allocation11 + $0x968] ss:$28 sps:$4 sm:$0xff]  }
 0x606   :  { %6394 = vmatprep.subr.bf16.mxu0 %v8308_v36  ;;  %6558 = vmatprep.subr.bf16.mxu1 %v8311_v44  ;;  %v8375_v36 = vld [vmem:[#allocation11 + $0x970] ss:$28 sps:$4 sm:$0xff]   ;;  %v8380_v44 = vld [vmem:[#allocation11 + $0x9a4] ss:$28 sps:$4 sm:$0xff]  }
 0x608   :  { %6386 = vmatmul.mubr.bf16.vlgmr.msra.gmra.mrb[12].mxu0 %v9423_v42  ;;  %6550 = vmatmul.mubr.bf16.vlgmr.msra.gmra.mrb[20].mxu1 %v9423_v42 }
 0x609   :  { %6395 = vmatpush1.bf16.msra.mxu0 %v8306_v1  ;;  %6426 = vmatprep.mubr.bf16.mxu0 %v9425_v19  ;;  %v8381_v1 = vld [vmem:[#allocation11 + $0x9a8] ss:$28 sps:$4 sm:$0xff]  }
 0x60a   :  { %6559 = vmatpush1.bf16.msra.mxu1 %v8309_v30  ;;  %6590 = vmatprep.mubr.bf16.mxu1 %v9425_v19  ;;  %v8386_v30 = vld [vmem:[#allocation11 + $0x9dc] ss:$28 sps:$4 sm:$0xff]  }
 0x60b   :  { %6396 = vmatprep.subr.bf16.mxu0 %v8314_v20  ;;  %6560 = vmatprep.subr.bf16.mxu1 %v8317_v38  ;;  %v8389_v20 = vld [vmem:[#allocation11 + $0x9e4] ss:$28 sps:$4 sm:$0xff]   ;;  %v8384_v38 = vld [vmem:[#allocation11 + $0x9d8] ss:$28 sps:$4 sm:$0xff]  }
 0x60d   :  { %6397 = vmatpush1.bf16.msra.mxu0 %v8312_v46  ;;  %v8387_v46 = vld [vmem:[#allocation11 + $0x9e0] ss:$28 sps:$4 sm:$0xff]  }
 0x60e   :  { %6561 = vmatpush1.bf16.msra.mxu1 %v8315_v47  ;;  %6398 = vmatprep.subr.bf16.mxu0 %v8320_v21  ;;  %v8392_v47 = vld [vmem:[#allocation11 + $0xa14] ss:$28 sps:$4 sm:$0xff]   ;;  %v8395_v21 = vld [vmem:[#allocation11 + $0xa1c] ss:$28 sps:$4 sm:$0xff]  }
 0x60f   :  { %6562 = vmatprep.subr.bf16.mxu1 %v8323_v31  ;;  %v8390_v31 = vld [vmem:[#allocation11 + $0xa10] ss:$28 sps:$4 sm:$0xff]  }
 0x611   :  { %6399 = vmatpush1.bf16.msra.mxu0 %v8318_v22  ;;  %v8393_v22 = vld [vmem:[#allocation11 + $0xa18] ss:$28 sps:$4 sm:$0xff]  }
 0x612   :  { %6563 = vmatpush1.bf16.msra.mxu1 %v8321_v35  ;;  %6400 = vmatprep.subr.bf16.mxu0 %v8326_v37  ;;  %v8398_v35 = vld [vmem:[#allocation11 + $0xa4c] ss:$28 sps:$4 sm:$0xff]   ;;  %v8401_v37 = vld [vmem:[#allocation11 + $0xa54] ss:$28 sps:$4 sm:$0xff]  }
 0x613   :  { %6564 = vmatprep.subr.bf16.mxu1 %v8329_v24  ;;  %v3440_v24 = vmul.f32 0.2, %v9401_v63 }
 0x615   :  { %6401 = vmatpush1.bf16.msra.mxu0 %v8324_v23  ;;  %v8396_v23 = vld [vmem:[#allocation11 + $0xa48] ss:$28 sps:$4 sm:$0xff]  }
 0x616   :  { %6565 = vmatpush1.bf16.msra.mxu1 %v8327_v27  ;;  %6402 = vmatprep.subr.bf16.mxu0 %v8332_v57  ;;  %v3443_v27 = vmul.f32 0.2, %v9395_v34  ;;  %v8399_v57 = vld [vmem:[#allocation11 + $0xa50] ss:$28 sps:$4 sm:$0xff]  }
 0x617   :  { %6566 = vmatprep.subr.bf16.mxu1 %v8335_v62  ;;  %v8404_v62 = vld [vmem:[#allocation11 + $0xa84] ss:$28 sps:$4 sm:$0xff]  }
 0x619   :  { %6403 = vmatpush1.bf16.msra.mxu0 %v8330_v2  ;;  %v3448_v2 = vsel %vm3432_vm13, %v9401_v63, %v3440_v24  ;;  %v8408_v63 = vld [vmem:[#allocation11 + $0xab8] ss:$28 sps:$4 sm:$0xff]  }
 0x61a   :  { %6567 = vmatpush1.bf16.msra.mxu1 %v8333_v25  ;;  %6404 = vmatprep.subr.bf16.mxu0 %v8338_v53  ;;  %v8407_v25 = vld [vmem:[#allocation11 + $0xa8c] ss:$28 sps:$4 sm:$0xff]   ;;  %v8402_v53 = vld [vmem:[#allocation11 + $0xa80] ss:$28 sps:$4 sm:$0xff]   ;;  %v8465_v24 = vld [vmem:[#allocation11 + $0xcb8] ss:$28 sps:$4 sm:$0xff]  }
 0x61b   :  { %6568 = vmatprep.subr.bf16.mxu1 %v8341_v29  ;;  %v3451_v29 = vsel %vm3435_vm14, %v9395_v34, %v3443_v27  ;;  %v8411_v34 = vld [vmem:[#allocation11 + $0xac0] ss:$28 sps:$4 sm:$0xff]   ;;  %v8473_v27 = vld [vmem:[#allocation11 + $0xcf4] ss:$28 sps:$4 sm:$0xff]  }
 0x61d   :  { %6405 = vmatpush1.bf16.msra.mxu0 %v8336_v32  ;;  %v9437_v32 = vpack.c.bf16 %v3448_v2, %v3448_v2  ;;  %v8476_v2 = vld [vmem:[#allocation11 + $0xd24] ss:$28 sps:$4 sm:$0xff]  }
 0x61e   :  { %6569 = vmatpush1.bf16.msra.mxu1 %v8339_v54  ;;  %6406 = vmatprep.subr.bf16.mxu0 %v8344_v40  ;;  %v8405_v54 = vld [vmem:[#allocation11 + $0xa88] ss:$28 sps:$4 sm:$0xff]   ;;  %v8410_v40 = vld [vmem:[#allocation11 + $0xabc] ss:$28 sps:$4 sm:$0xff]  }
 0x61f   :  { %6570 = vmatprep.subr.bf16.mxu1 %v8347_v43  ;;  %v9440_v43 = vpack.c.bf16 %v3451_v29, %v3451_v29  ;;  %v8477_v29 = vld [vmem:[#allocation11 + $0xd28] ss:$28 sps:$4 sm:$0xff]  }
 0x621   :  { %6407 = vmatpush1.bf16.msra.mxu0 %v8342_v7  ;;  %v8413_v7 = vld [vmem:[#allocation11 + $0xac4] ss:$28 sps:$4 sm:$0xff]  }
 0x622   :  { %6571 = vmatpush1.bf16.msra.mxu1 %v8345_v39  ;;  %6408 = vmatprep.subr.bf16.mxu0 %v8350_v41  ;;  %v8416_v39 = vld [vmem:[#allocation11 + $0xaf4] ss:$28 sps:$4 sm:$0xff]   ;;  %v8419_v41 = vld [vmem:[#allocation11 + $0xafc] ss:$28 sps:$4 sm:$0xff]  }
 0x623   :  { %6572 = vmatprep.subr.bf16.mxu1 %v8353_v45  ;;  %v8414_v45 = vld [vmem:[#allocation11 + $0xaf0] ss:$28 sps:$4 sm:$0xff]  }
 0x625   :  { %6409 = vmatpush1.bf16.msra.mxu0 %v8348_v8  ;;  %v8417_v8 = vld [vmem:[#allocation11 + $0xaf8] ss:$28 sps:$4 sm:$0xff]  }
 0x626   :  { %6573 = vmatpush1.bf16.msra.mxu1 %v8351_v15  ;;  %6410 = vmatprep.subr.bf16.mxu0 %v8356_v18  ;;  %v8422_v15 = vld [vmem:[#allocation11 + $0xb2c] ss:$28 sps:$4 sm:$0xff]   ;;  %v8425_v18 = vld [vmem:[#allocation11 + $0xb34] ss:$28 sps:$4 sm:$0xff]  }
 0x627   :  { %6574 = vmatprep.subr.bf16.mxu1 %v8359_v52  ;;  %v8420_v52 = vld [vmem:[#allocation11 + $0xb28] ss:$28 sps:$4 sm:$0xff]  }
 0x629   :  { %6411 = vmatpush1.bf16.msra.mxu0 %v8354_v51  ;;  %v8423_v51 = vld [vmem:[#allocation11 + $0xb30] ss:$28 sps:$4 sm:$0xff]  }
 0x62a   :  { %6575 = vmatpush1.bf16.msra.mxu1 %v8357_v4  ;;  %6412 = vmatprep.subr.bf16.mxu0 %v8362_v11  ;;  %v8428_v4 = vld [vmem:[#allocation11 + $0xb64] ss:$28 sps:$4 sm:$0xff]   ;;  %v8431_v11 = vld [vmem:[#allocation11 + $0xb6c] ss:$28 sps:$4 sm:$0xff]  }
 0x62b   :  { %6576 = vmatprep.subr.bf16.mxu1 %v8365_v12  ;;  %v8426_v12 = vld [vmem:[#allocation11 + $0xb60] ss:$28 sps:$4 sm:$0xff]  }
 0x62d   :  { %6413 = vmatpush1.bf16.msra.mxu0 %v8360_v13  ;;  %v8429_v13 = vld [vmem:[#allocation11 + $0xb68] ss:$28 sps:$4 sm:$0xff]  }
 0x62e   :  { %6577 = vmatpush1.bf16.msra.mxu1 %v8363_v26  ;;  %6414 = vmatprep.subr.bf16.mxu0 %v8368_v14  ;;  %v8434_v26 = vld [vmem:[#allocation11 + $0xb9c] ss:$28 sps:$4 sm:$0xff]   ;;  %v8437_v14 = vld [vmem:[#allocation11 + $0xba4] ss:$28 sps:$4 sm:$0xff]  }
 0x62f   :  { %6578 = vmatprep.subr.bf16.mxu1 %v8371_v16  ;;  %v8432_v16 = vld [vmem:[#allocation11 + $0xb98] ss:$28 sps:$4 sm:$0xff]  }
 0x631   :  { %6415 = vmatpush1.bf16.msra.mxu0 %v8366_v17  ;;  %v8435_v17 = vld [vmem:[#allocation11 + $0xba0] ss:$28 sps:$4 sm:$0xff]  }
 0x632   :  { %6579 = vmatpush1.bf16.msra.mxu1 %v8369_v9  ;;  %6416 = vmatprep.subr.bf16.mxu0 %v8374_v28  ;;  %v8440_v9 = vld [vmem:[#allocation11 + $0xbd4] ss:$28 sps:$4 sm:$0xff]   ;;  %v8443_v28 = vld [vmem:[#allocation11 + $0xbdc] ss:$28 sps:$4 sm:$0xff]  }
 0x633   :  { %6580 = vmatprep.subr.bf16.mxu1 %v8377_v33  ;;  %v8438_v33 = vld [vmem:[#allocation11 + $0xbd0] ss:$28 sps:$4 sm:$0xff]  }
 0x635   :  { %6417 = vmatpush1.bf16.msra.mxu0 %v8372_v3  ;;  %v8441_v3 = vld [vmem:[#allocation11 + $0xbd8] ss:$28 sps:$4 sm:$0xff]  }
 0x636   :  { %6581 = vmatpush1.bf16.msra.mxu1 %v8375_v36  ;;  %6418 = vmatprep.subr.bf16.mxu0 %v8380_v44  ;;  %v8446_v36 = vld [vmem:[#allocation11 + $0xc0c] ss:$28 sps:$4 sm:$0xff]   ;;  %v8449_v44 = vld [vmem:[#allocation11 + $0xc14] ss:$28 sps:$4 sm:$0xff]  }
 0x637   :  { %6582 = vmatprep.subr.bf16.mxu1 %v8383_v55  ;;  %v8444_v55 = vld [vmem:[#allocation11 + $0xc08] ss:$28 sps:$4 sm:$0xff]  }
 0x639   :  { %6419 = vmatpush1.bf16.msra.mxu0 %v8378_v49  ;;  %v8447_v49 = vld [vmem:[#allocation11 + $0xc10] ss:$28 sps:$4 sm:$0xff]  }
 0x63a   :  { %6583 = vmatpush1.bf16.msra.mxu1 %v8381_v1  ;;  %6420 = vmatprep.subr.bf16.mxu0 %v8386_v30  ;;  %v8452_v1 = vld [vmem:[#allocation11 + $0xc44] ss:$28 sps:$4 sm:$0xff]   ;;  %v8455_v30 = vld [vmem:[#allocation11 + $0xc4c] ss:$28 sps:$4 sm:$0xff]  }
 0x63b   :  { %6584 = vmatprep.subr.bf16.mxu1 %v8389_v20  ;;  %v8450_v20 = vld [vmem:[#allocation11 + $0xc40] ss:$28 sps:$4 sm:$0xff]  }
 0x63d   :  { %6421 = vmatpush1.bf16.msra.mxu0 %v8384_v38  ;;  %v8453_v38 = vld [vmem:[#allocation11 + $0xc48] ss:$28 sps:$4 sm:$0xff]  }
 0x63e   :  { %6585 = vmatpush1.bf16.msra.mxu1 %v8387_v46  ;;  %6422 = vmatprep.subr.bf16.mxu0 %v8392_v47  ;;  %v8458_v46 = vld [vmem:[#allocation11 + $0xc7c] ss:$28 sps:$4 sm:$0xff]   ;;  %v8461_v47 = vld [vmem:[#allocation11 + $0xc84] ss:$28 sps:$4 sm:$0xff]  }
 0x63f   :  { %6586 = vmatprep.subr.bf16.mxu1 %v8395_v21  ;;  %v8456_v21 = vld [vmem:[#allocation11 + $0xc78] ss:$28 sps:$4 sm:$0xff]  }
 0x641   :  { %6423 = vmatpush1.bf16.msra.mxu0 %v8390_v31  ;;  %v8459_v31 = vld [vmem:[#allocation11 + $0xc80] ss:$28 sps:$4 sm:$0xff]  }
 0x642   :  { %6587 = vmatpush1.bf16.msra.mxu1 %v8393_v22  ;;  %6424 = vmatprep.subr.bf16.mxu0 %v8398_v35  ;;  %v8464_v22 = vld [vmem:[#allocation11 + $0xcb4] ss:$28 sps:$4 sm:$0xff]   ;;  %v8467_v35 = vld [vmem:[#allocation11 + $0xcbc] ss:$28 sps:$4 sm:$0xff]  }
 0x643   :  { %6588 = vmatprep.subr.bf16.mxu1 %v8401_v37  ;;  %v8462_v37 = vld [vmem:[#allocation11 + $0xcb0] ss:$28 sps:$4 sm:$0xff]  }
 0x645   :  { %6425 = vmatpush1.bf16.msra.mxu0 %v8396_v23  ;;  %v8470_v23 = vld [vmem:[#allocation11 + $0xcec] ss:$28 sps:$4 sm:$0xff]  }
 0x646   :  { %6589 = vmatpush1.bf16.msra.mxu1 %v8399_v57  ;;  %6435 = vmatprep.subr.bf16.mxu0 %v8404_v62  ;;  %v8468_v57 = vld [vmem:[#allocation11 + $0xce8] ss:$28 sps:$4 sm:$0xff]   ;;  %v8471_v62 = vld [vmem:[#allocation11 + $0xcf0] ss:$28 sps:$4 sm:$0xff]  }
 0x647   :  { %6599 = vmatprep.subr.bf16.mxu1 %v8407_v25  ;;  %v8479_v25 = vld [vmem:[#allocation11 + $0xd2c] ss:$28 sps:$4 sm:$0xff]  }
 0x648   :  { %6427 = vmatmul.mubr.bf16.vlgmr.msra.gmra.mrb[12].mxu0 %v9437_v32 }
 0x649   :  { %6591 = vmatmul.mubr.bf16.vlgmr.msra.gmra.mrb[20].mxu1 %v9437_v32  ;;  %6436 = vmatpush1.bf16.msra.mxu0 %v8402_v53  ;;  %v8474_v53 = vld [vmem:[#allocation11 + $0xd20] ss:$28 sps:$4 sm:$0xff]  }
 0x64a   :  { %6467 = vmatprep.mubr.bf16.mxu0 %v9440_v43  ;;  %6600 = vmatpush1.bf16.msra.mxu1 %v8405_v54  ;;  %v8482_v54 = vld [vmem:[#allocation11 + $0xd5c] ss:$28 sps:$4 sm:$0xff]  }
 0x64b   :  { %6631 = vmatprep.mubr.bf16.mxu1 %v9440_v43  ;;  %6437 = vmatprep.subr.bf16.mxu0 %v8410_v40  ;;  %v8485_v40 = vld [vmem:[#allocation11 + $0xd64] ss:$28 sps:$4 sm:$0xff]  }
 0x64c   :  { %6601 = vmatprep.subr.bf16.mxu1 %v8413_v7  ;;  %v8480_v7 = vld [vmem:[#allocation11 + $0xd58] ss:$28 sps:$4 sm:$0xff]  }
 0x64d   :  { %6438 = vmatpush1.bf16.msra.mxu0 %v8408_v63  ;;  %v8483_v63 = vld [vmem:[#allocation11 + $0xd60] ss:$28 sps:$4 sm:$0xff]  }
 0x64e   :  { %6602 = vmatpush1.bf16.msra.mxu1 %v8411_v34  ;;  %6439 = vmatprep.subr.bf16.mxu0 %v8416_v39  ;;  %v8488_v34 = vld [vmem:[#allocation11 + $0xd94] ss:$28 sps:$4 sm:$0xff]   ;;  %v8491_v39 = vld [vmem:[#allocation11 + $0xd9c] ss:$28 sps:$4 sm:$0xff]  }
 0x64f   :  { %6603 = vmatprep.subr.bf16.mxu1 %v8419_v41  ;;  %v8486_v41 = vld [vmem:[#allocation11 + $0xd90] ss:$28 sps:$4 sm:$0xff]  }
 0x651   :  { %6440 = vmatpush1.bf16.msra.mxu0 %v8414_v45  ;;  %v8489_v45 = vld [vmem:[#allocation11 + $0xd98] ss:$28 sps:$4 sm:$0xff]  }
 0x652   :  { %6604 = vmatpush1.bf16.msra.mxu1 %v8417_v8  ;;  %6441 = vmatprep.subr.bf16.mxu0 %v8422_v15  ;;  %v8494_v8 = vld [vmem:[#allocation11 + $0xdcc] ss:$28 sps:$4 sm:$0xff]   ;;  %v8497_v15 = vld [vmem:[#allocation11 + $0xdd4] ss:$28 sps:$4 sm:$0xff]  }
 0x653   :  { %6605 = vmatprep.subr.bf16.mxu1 %v8425_v18  ;;  %v3442_v18 = vmul.f32 0.2, %v9403_v0 }
 0x655   :  { %6442 = vmatpush1.bf16.msra.mxu0 %v8420_v52  ;;  %v8492_v52 = vld [vmem:[#allocation11 + $0xdc8] ss:$28 sps:$4 sm:$0xff]  }
 0x656   :  { %6606 = vmatpush1.bf16.msra.mxu1 %v8423_v51  ;;  %6443 = vmatprep.subr.bf16.mxu0 %v8428_v4  ;;  %v8495_v51 = vld [vmem:[#allocation11 + $0xdd0] ss:$28 sps:$4 sm:$0xff]  }
 0x657   :  { %6607 = vmatprep.subr.bf16.mxu1 %v8431_v11  ;;  %v8500_v4 = vld [vmem:[#allocation11 + $0x14] ss:$28 sps:$4 sm:$0xff]   ;;  %v3450_v11 = vsel %vm3434_vm15, %v9403_v0, %v3442_v18 }
 0x658   :  { %v8507_v0 = vld [vmem:[#allocation11 + $0x50] ss:$28 sps:$4 sm:$0xff]   ;;  %v8553_v18 = vld [vmem:[#allocation11 + $0x278] ss:$28 sps:$4 sm:$0xff]  }
 0x659   :  { %6444 = vmatpush1.bf16.msra.mxu0 %v8426_v12  ;;  %v8501_v12 = vld [vmem:[#allocation11 + $0x1d8] ss:$28 sps:$4 sm:$0xff]  }
 0x65a   :  { %6608 = vmatpush1.bf16.msra.mxu1 %v8429_v13  ;;  %6445 = vmatprep.subr.bf16.mxu0 %v8434_v26  ;;  %v8498_v13 = vld [vmem:[#allocation11 + $0x10] ss:$28 sps:$4 sm:$0xff]   ;;  %v9448_v26 = vpack.c.bf16 %v3450_v11, %v3450_v11 }
 0x65b   :  { %6609 = vmatprep.subr.bf16.mxu1 %v8437_v14  ;;  %v8502_v14 = vld [vmem:[#allocation11 + $0x18] ss:$28 sps:$4 sm:$0xff]   ;;  %v8558_v11 = vld [vmem:[#allocation11 + $0x2b0] ss:$28 sps:$4 sm:$0xff]  }
 0x65d   :  { %6446 = vmatpush1.bf16.msra.mxu0 %v8432_v16  ;;  %v8505_v16 = vld [vmem:[#allocation11 + $0x4c] ss:$28 sps:$4 sm:$0xff]  }
 0x65e   :  { %6610 = vmatpush1.bf16.msra.mxu1 %v8435_v17  ;;  %6447 = vmatprep.subr.bf16.mxu0 %v8440_v9  ;;  %v8506_v17 = vld [vmem:[#allocation11 + $0x210] ss:$28 sps:$4 sm:$0xff]   ;;  %v8503_v9 = vld [vmem:[#allocation11 + $0x48] ss:$28 sps:$4 sm:$0xff]  }
 0x65f   :  { %6611 = vmatprep.subr.bf16.mxu1 %v8443_v28  ;;  %v8510_v28 = vld [vmem:[#allocation11 + $0x84] ss:$28 sps:$4 sm:$0xff]  }
 0x661   :  { %6448 = vmatpush1.bf16.msra.mxu0 %v8438_v33  ;;  %v8511_v33 = vld [vmem:[#allocation11 + $0x248] ss:$28 sps:$4 sm:$0xff]  }
 0x662   :  { %6612 = vmatpush1.bf16.msra.mxu1 %v8441_v3  ;;  %6449 = vmatprep.subr.bf16.mxu0 %v8446_v36  ;;  %v8508_v3 = vld [vmem:[#allocation11 + $0x80] ss:$28 sps:$4 sm:$0xff]   ;;  %v8512_v36 = vld [vmem:[#allocation11 + $0x88] ss:$28 sps:$4 sm:$0xff]  }
 0x663   :  { %6613 = vmatprep.subr.bf16.mxu1 %v8449_v44  ;;  %v8515_v44 = vld [vmem:[#allocation11 + $0xbc] ss:$28 sps:$4 sm:$0xff]  }
 0x665   :  { %6450 = vmatpush1.bf16.msra.mxu0 %v8444_v55  ;;  %v8516_v55 = vld [vmem:[#allocation11 + $0x280] ss:$28 sps:$4 sm:$0xff]  }
 0x666   :  { %6614 = vmatpush1.bf16.msra.mxu1 %v8447_v49  ;;  %6451 = vmatprep.subr.bf16.mxu0 %v8452_v1  ;;  %v8513_v49 = vld [vmem:[#allocation11 + $0xb8] ss:$28 sps:$4 sm:$0xff]   ;;  %v8517_v1 = vld [vmem:[#allocation11 + $0xc0] ss:$28 sps:$4 sm:$0xff]  }
 0x667   :  { %6615 = vmatprep.subr.bf16.mxu1 %v8455_v30  ;;  %v8520_v30 = vld [vmem:[#allocation11 + $0xf4] ss:$28 sps:$4 sm:$0xff]  }
 0x669   :  { %6452 = vmatpush1.bf16.msra.mxu0 %v8450_v20  ;;  %v8521_v20 = vld [vmem:[#allocation11 + $0x2b8] ss:$28 sps:$4 sm:$0xff]  }
 0x66a   :  { %6616 = vmatpush1.bf16.msra.mxu1 %v8453_v38  ;;  %6453 = vmatprep.subr.bf16.mxu0 %v8458_v46  ;;  %v8522_v38 = vld [vmem:[#allocation11 + $0xf8] ss:$28 sps:$4 sm:$0xff]   ;;  %v8525_v46 = vld [vmem:[#allocation11 + $0x12c] ss:$28 sps:$4 sm:$0xff]  }
 0x66b   :  { %6617 = vmatprep.subr.bf16.mxu1 %v8461_v47  ;;  %v8526_v47 = vld [vmem:[#allocation11 + $0x2f0] ss:$28 sps:$4 sm:$0xff]  }
 0x66d   :  { %6454 = vmatpush1.bf16.msra.mxu0 %v8456_v21  ;;  %v8523_v21 = vld [vmem:[#allocation11 + $0x128] ss:$28 sps:$4 sm:$0xff]  }
 0x66e   :  { %6618 = vmatpush1.bf16.msra.mxu1 %v8459_v31  ;;  %6455 = vmatprep.subr.bf16.mxu0 %v8464_v22  ;;  %v8527_v31 = vld [vmem:[#allocation11 + $0x130] ss:$28 sps:$4 sm:$0xff]   ;;  %v8530_v22 = vld [vmem:[#allocation11 + $0x164] ss:$28 sps:$4 sm:$0xff]  }
 0x66f   :  { %6619 = vmatprep.subr.bf16.mxu1 %v8467_v35  ;;  %v8531_v35 = vld [vmem:[#allocation11 + $0x328] ss:$28 sps:$4 sm:$0xff]  }
 0x671   :  { %6456 = vmatpush1.bf16.msra.mxu0 %v8462_v37  ;;  %v8528_v37 = vld [vmem:[#allocation11 + $0x160] ss:$28 sps:$4 sm:$0xff]  }
 0x672   :  { %6620 = vmatpush1.bf16.msra.mxu1 %v8465_v24  ;;  %6457 = vmatprep.subr.bf16.mxu0 %v8470_v23  ;;  %v8532_v24 = vld [vmem:[#allocation11 + $0x168] ss:$28 sps:$4 sm:$0xff]   ;;  %v8535_v23 = vld [vmem:[#allocation11 + $0x19c] ss:$28 sps:$4 sm:$0xff]  }
 0x673   :  { %6621 = vmatprep.subr.bf16.mxu1 %v8473_v27  ;;  %v8536_v27 = vld [vmem:[#allocation11 + $0x360] ss:$28 sps:$4 sm:$0xff]  }
 0x675   :  { %6458 = vmatpush1.bf16.msra.mxu0 %v8468_v57  ;;  %v8533_v57 = vld [vmem:[#allocation11 + $0x198] ss:$28 sps:$4 sm:$0xff]  }
 0x676   :  { %6622 = vmatpush1.bf16.msra.mxu1 %v8471_v62  ;;  %6459 = vmatprep.subr.bf16.mxu0 %v8476_v2  ;;  %v8537_v62 = vld [vmem:[#allocation11 + $0x1a0] ss:$28 sps:$4 sm:$0xff]   ;;  %v8540_v2 = vld [vmem:[#allocation11 + $0x1d4] ss:$28 sps:$4 sm:$0xff]  }
 0x677   :  { %6623 = vmatprep.subr.bf16.mxu1 %v8479_v25  ;;  %v8541_v25 = vld [vmem:[#allocation11 + $0x558] ss:$28 sps:$4 sm:$0xff]  }
 0x679   :  { %6460 = vmatpush1.bf16.msra.mxu0 %v8474_v53  ;;  %v8538_v53 = vld [vmem:[#allocation11 + $0x1d0] ss:$28 sps:$4 sm:$0xff]  }
 0x67a   :  { %6624 = vmatpush1.bf16.msra.mxu1 %v8477_v29  ;;  %6461 = vmatprep.subr.bf16.mxu0 %v8482_v54  ;;  %v8542_v29 = vld [vmem:[#allocation11 + $0x398] ss:$28 sps:$4 sm:$0xff]   ;;  %v8545_v54 = vld [vmem:[#allocation11 + $0x20c] ss:$28 sps:$4 sm:$0xff]  }
 0x67b   :  { %6625 = vmatprep.subr.bf16.mxu1 %v8485_v40  ;;  %v8546_v40 = vld [vmem:[#allocation11 + $0x590] ss:$28 sps:$4 sm:$0xff]  }
 0x67d   :  { %6462 = vmatpush1.bf16.msra.mxu0 %v8480_v7  ;;  %v8543_v7 = vld [vmem:[#allocation11 + $0x208] ss:$28 sps:$4 sm:$0xff]  }
 0x67e   :  { %6626 = vmatpush1.bf16.msra.mxu1 %v8483_v63  ;;  %6463 = vmatprep.subr.bf16.mxu0 %v8488_v34  ;;  %v8547_v63 = vld [vmem:[#allocation11 + $0x3d0] ss:$28 sps:$4 sm:$0xff]   ;;  %v8550_v34 = vld [vmem:[#allocation11 + $0x244] ss:$28 sps:$4 sm:$0xff]  }
 0x67f   :  { %6627 = vmatprep.subr.bf16.mxu1 %v8491_v39  ;;  %v8551_v39 = vld [vmem:[#allocation11 + $0x5c8] ss:$28 sps:$4 sm:$0xff]  }
 0x681   :  { %6464 = vmatpush1.bf16.msra.mxu0 %v8486_v41  ;;  %v8548_v41 = vld [vmem:[#allocation11 + $0x240] ss:$28 sps:$4 sm:$0xff]  }
 0x682   :  { %6628 = vmatpush1.bf16.msra.mxu1 %v8489_v45  ;;  %6465 = vmatprep.subr.bf16.mxu0 %v8494_v8  ;;  %v8552_v45 = vld [vmem:[#allocation11 + $0x408] ss:$28 sps:$4 sm:$0xff]   ;;  %v8555_v8 = vld [vmem:[#allocation11 + $0x27c] ss:$28 sps:$4 sm:$0xff]  }
 0x683   :  { %6629 = vmatprep.subr.bf16.mxu1 %v8497_v15  ;;  %v8556_v15 = vld [vmem:[#allocation11 + $0x600] ss:$28 sps:$4 sm:$0xff]  }
 0x685   :  { %6466 = vmatpush1.bf16.msra.mxu0 %v8492_v52  ;;  %v8557_v52 = vld [vmem:[#allocation11 + $0x440] ss:$28 sps:$4 sm:$0xff]  }
 0x686   :  { %6630 = vmatpush1.bf16.msra.mxu1 %v8495_v51  ;;  %6640 = vmatprep.subr.bf16.mxu0 %v8500_v4  ;;  %v8560_v51 = vld [vmem:[#allocation11 + $0x2b4] ss:$28 sps:$4 sm:$0xff]  }
 0x687   :  { %7797 = vmatprep.subr.bf16.mxu1 %v8501_v12  ;;  %v8561_v4 = vld [vmem:[#allocation11 + $0x638] ss:$28 sps:$4 sm:$0xff]  }
 0x688   :  { %6468 = vmatmul.mubr.bf16.vlgmr.msra.gmra.mrb[12].mxu0 %v9448_v26  ;;  %v8562_v12 = vld [vmem:[#allocation11 + $0x478] ss:$28 sps:$4 sm:$0xff]  }
 0x689   :  { %6632 = vmatmul.mubr.bf16.vlgmr.msra.gmra.mrb[20].mxu1 %v9448_v26  ;;  %6641 = vmatpush1.bf16.msra.mxu0 %v8498_v13  ;;  %v8565_v13 = vld [vmem:[#allocation11 + $0x2ec] ss:$28 sps:$4 sm:$0xff]  }
 0x68a   :  { %6672 = vmatprep.mubr.bf16.mxu0 %v9405_v10  ;;  %7798 = vmatpush3.bf16.msra.mxu1 %v8502_v14  ;;  %v8566_v14 = vld [vmem:[#allocation11 + $0x670] ss:$28 sps:$4 sm:$0xff]  }
 0x68b   :  { %6836 = vmatprep.mubr.bf16.mxu1 %v9405_v10  ;;  %6642 = vmatprep.subr.bf16.mxu0 %v8505_v16  ;;  %v8518_v10 = vld [vmem:[#allocation11 + $0xf0] ss:$28 sps:$4 sm:$0xff]   ;;  %v8563_v16 = vld [vmem:[#allocation11 + $0x2e8] ss:$28 sps:$4 sm:$0xff]  }
 0x68c   :  { %7799 = vmatprep.subr.bf16.mxu1 %v8506_v17  ;;  %v8567_v17 = vld [vmem:[#allocation11 + $0x4b0] ss:$28 sps:$4 sm:$0xff]  }
 0x68d   :  { %6643 = vmatpush1.bf16.msra.mxu0 %v8503_v9  ;;  %v8570_v9 = vld [vmem:[#allocation11 + $0x324] ss:$28 sps:$4 sm:$0xff]  }
 0x68e   :  { %7800 = vmatpush3.bf16.msra.mxu1 %v8507_v0  ;;  %6644 = vmatprep.subr.bf16.mxu0 %v8510_v28  ;;  %v8571_v0 = vld [vmem:[#allocation11 + $0x6a8] ss:$28 sps:$4 sm:$0xff]   ;;  %v8568_v28 = vld [vmem:[#allocation11 + $0x320] ss:$28 sps:$4 sm:$0xff]  }
 0x68f   :  { %7801 = vmatprep.subr.bf16.mxu1 %v8511_v33  ;;  %v8572_v33 = vld [vmem:[#allocation11 + $0x4e8] ss:$28 sps:$4 sm:$0xff]  }
 0x691   :  { %6645 = vmatpush1.bf16.msra.mxu0 %v8508_v3  ;;  %v8575_v3 = vld [vmem:[#allocation11 + $0x35c] ss:$28 sps:$4 sm:$0xff]  }
 0x692   :  { %7802 = vmatpush3.bf16.msra.mxu1 %v8512_v36  ;;  %6646 = vmatprep.subr.bf16.mxu0 %v8515_v44  ;;  %v8576_v36 = vld [vmem:[#allocation11 + $0x6e0] ss:$28 sps:$4 sm:$0xff]   ;;  %v8573_v44 = vld [vmem:[#allocation11 + $0x358] ss:$28 sps:$4 sm:$0xff]  }
 0x693   :  { %7803 = vmatprep.subr.bf16.mxu1 %v8516_v55  ;;  %v8577_v55 = vld [vmem:[#allocation11 + $0x520] ss:$28 sps:$4 sm:$0xff]  }
 0x695   :  { %6647 = vmatpush1.bf16.msra.mxu0 %v8513_v49  ;;  %v8580_v49 = vld [vmem:[#allocation11 + $0x394] ss:$28 sps:$4 sm:$0xff]  }
 0x696   :  { %7804 = vmatpush3.bf16.msra.mxu1 %v8517_v1  ;;  %6648 = vmatprep.subr.bf16.mxu0 %v8520_v30  ;;  %v8581_v1 = vld [vmem:[#allocation11 + $0x8d8] ss:$28 sps:$4 sm:$0xff]   ;;  %v8578_v30 = vld [vmem:[#allocation11 + $0x390] ss:$28 sps:$4 sm:$0xff]  }
 0x697   :  { %7805 = vmatprep.subr.bf16.mxu1 %v8521_v20  ;;  %v8582_v20 = vld [vmem:[#allocation11 + $0x718] ss:$28 sps:$4 sm:$0xff]  }
 0x699   :  { %6649 = vmatpush1.bf16.msra.mxu0 %v8518_v10  ;;  %v8585_v10 = vld [vmem:[#allocation11 + $0x3cc] ss:$28 sps:$4 sm:$0xff]  }
 0x69a   :  { %7806 = vmatpush3.bf16.msra.mxu1 %v8522_v38  ;;  %6650 = vmatprep.subr.bf16.mxu0 %v8525_v46  ;;  %v8586_v38 = vld [vmem:[#allocation11 + $0x910] ss:$28 sps:$4 sm:$0xff]   ;;  %v8583_v46 = vld [vmem:[#allocation11 + $0x3c8] ss:$28 sps:$4 sm:$0xff]  }
 0x69b   :  { %7807 = vmatprep.subr.bf16.mxu1 %v8526_v47  ;;  %v8587_v47 = vld [vmem:[#allocation11 + $0x750] ss:$28 sps:$4 sm:$0xff]  }
 0x69d   :  { %6651 = vmatpush1.bf16.msra.mxu0 %v8523_v21  ;;  %v8590_v21 = vld [vmem:[#allocation11 + $0x404] ss:$28 sps:$4 sm:$0xff]  }
 0x69e   :  { %7808 = vmatpush3.bf16.msra.mxu1 %v8527_v31  ;;  %6652 = vmatprep.subr.bf16.mxu0 %v8530_v22  ;;  %v8591_v31 = vld [vmem:[#allocation11 + $0x948] ss:$28 sps:$4 sm:$0xff]   ;;  %v8588_v22 = vld [vmem:[#allocation11 + $0x400] ss:$28 sps:$4 sm:$0xff]  }
 0x69f   :  { %7809 = vmatprep.subr.bf16.mxu1 %v8531_v35  ;;  %v8595_v35 = vld [vmem:[#allocation11 + $0x43c] ss:$28 sps:$4 sm:$0xff]  }
 0x6a1   :  { %6653 = vmatpush1.bf16.msra.mxu0 %v8528_v37  ;;  %v8596_v37 = vld [vmem:[#allocation11 + $0x980] ss:$28 sps:$4 sm:$0xff]  }
 0x6a2   :  { %7810 = vmatpush3.bf16.msra.mxu1 %v8532_v24  ;;  %6654 = vmatprep.subr.bf16.mxu0 %v8535_v23  ;;  %v8593_v24 = vld [vmem:[#allocation11 + $0x438] ss:$28 sps:$4 sm:$0xff]  }
 0x6a3   :  { %7811 = vmatprep.subr.bf16.mxu1 %v8536_v27  ;;  %v8600_v23 = vld [vmem:[#allocation11 + $0x474] ss:$28 sps:$4 sm:$0xff]  }
 0x6a4   :  { %v8601_v27 = vld [vmem:[#allocation11 + $0x9b8] ss:$28 sps:$4 sm:$0xff]  }
 0x6a5   :  { %6655 = vmatpush1.bf16.msra.mxu0 %v8533_v57  ;;  %v8598_v57 = vld [vmem:[#allocation11 + $0x470] ss:$28 sps:$4 sm:$0xff]  }
 0x6a6   :  { %7812 = vmatpush3.bf16.msra.mxu1 %v8537_v62  ;;  %6656 = vmatprep.subr.bf16.mxu0 %v8540_v2  ;;  %v8602_v62 = vld [vmem:[#allocation11 + $0x7f8] ss:$28 sps:$4 sm:$0xff]   ;;  %v8605_v2 = vld [vmem:[#allocation11 + $0x4ac] ss:$28 sps:$4 sm:$0xff]  }
 0x6a7   :  { %7819 = vmatprep.subr.bf16.mxu1 %v8541_v25  ;;  %v8606_v25 = vld [vmem:[#allocation11 + $0x9f0] ss:$28 sps:$4 sm:$0xff]  }
 0x6a9   :  { %6837 = vmatmul.mubr.bf16.vlgmr.msra.gmra.mrb[24].mxu1 %v9407_v6  ;;  %6657 = vmatpush1.bf16.msra.mxu0 %v8538_v53  ;;  %v8603_v53 = vld [vmem:[#allocation11 + $0x4a8] ss:$28 sps:$4 sm:$0xff]  }
 0x6aa   :  { %7820 = vmatpush3.bf16.msra.mxu1 %v8542_v29  ;;  %6876 = vmatprep.mubr.bf16.mxu1 %v9413_v5  ;;  %v8607_v29 = vld [vmem:[#allocation11 + $0x830] ss:$28 sps:$4 sm:$0xff]  }
 0x6ab   :  { %6658 = vmatprep.subr.bf16.mxu0 %v8545_v54  ;;  %7821 = vmatprep.subr.bf16.mxu1 %v8546_v40  ;;  %v8610_v54 = vld [vmem:[#allocation11 + $0x4e4] ss:$28 sps:$4 sm:$0xff]  }
 0x6ac   :  { %v8611_v40 = vld [vmem:[#allocation11 + $0xa28] ss:$28 sps:$4 sm:$0xff]  }
 0x6ad   :  { %6659 = vmatpush1.bf16.msra.mxu0 %v8543_v7  ;;  %v8608_v7 = vld [vmem:[#allocation11 + $0x4e0] ss:$28 sps:$4 sm:$0xff]  }
 0x6ae   :  { %7822 = vmatpush3.bf16.msra.mxu1 %v8547_v63  ;;  %6660 = vmatprep.subr.bf16.mxu0 %v8550_v34  ;;  %v8612_v63 = vld [vmem:[#allocation11 + $0x868] ss:$28 sps:$4 sm:$0xff]   ;;  %v8615_v34 = vld [vmem:[#allocation11 + $0x51c] ss:$28 sps:$4 sm:$0xff]  }
 0x6af   :  { %7823 = vmatprep.subr.bf16.mxu1 %v8551_v39  ;;  %v8616_v39 = vld [vmem:[#allocation11 + $0xa60] ss:$28 sps:$4 sm:$0xff]  }
 0x6b1   :  { %6661 = vmatpush1.bf16.msra.mxu0 %v8548_v41  ;;  %v8613_v41 = vld [vmem:[#allocation11 + $0x518] ss:$28 sps:$4 sm:$0xff]  }
 0x6b2   :  { %7824 = vmatpush3.bf16.msra.mxu1 %v8552_v45  ;;  %6662 = vmatprep.subr.bf16.mxu0 %v8555_v8  ;;  %v8617_v45 = vld [vmem:[#allocation11 + $0x8a0] ss:$28 sps:$4 sm:$0xff]   ;;  %v8620_v8 = vld [vmem:[#allocation11 + $0x554] ss:$28 sps:$4 sm:$0xff]  }
 0x6b3   :  { %7825 = vmatprep.subr.bf16.mxu1 %v8556_v15  ;;  %v8621_v15 = vld [vmem:[#allocation11 + $0xc58] ss:$28 sps:$4 sm:$0xff]  }
 0x6b5   :  { %6663 = vmatpush1.bf16.msra.mxu0 %v8553_v18  ;;  %v8618_v18 = vld [vmem:[#allocation11 + $0x550] ss:$28 sps:$4 sm:$0xff]  }
 0x6b6   :  { %7826 = vmatpush3.bf16.msra.mxu1 %v8557_v52  ;;  %6664 = vmatprep.subr.bf16.mxu0 %v8560_v51  ;;  %v8622_v52 = vld [vmem:[#allocation11 + $0xa98] ss:$28 sps:$4 sm:$0xff]   ;;  %v8625_v51 = vld [vmem:[#allocation11 + $0x58c] ss:$28 sps:$4 sm:$0xff]  }
 0x6b7   :  { %7827 = vmatprep.subr.bf16.mxu1 %v8561_v4  ;;  %v8626_v4 = vld [vmem:[#allocation11 + $0xc90] ss:$28 sps:$4 sm:$0xff]  }
 0x6b9   :  { %6665 = vmatpush1.bf16.msra.mxu0 %v8558_v11  ;;  %v8623_v11 = vld [vmem:[#allocation11 + $0x588] ss:$28 sps:$4 sm:$0xff]  }
 0x6ba   :  { %7828 = vmatpush3.bf16.msra.mxu1 %v8562_v12  ;;  %6666 = vmatprep.subr.bf16.mxu0 %v8565_v13  ;;  %v8627_v12 = vld [vmem:[#allocation11 + $0xad0] ss:$28 sps:$4 sm:$0xff]   ;;  %v8630_v13 = vld [vmem:[#allocation11 + $0x5c4] ss:$28 sps:$4 sm:$0xff]  }
 0x6bb   :  { %7829 = vmatprep.subr.bf16.mxu1 %v8566_v14  ;;  %v8631_v14 = vld [vmem:[#allocation11 + $0xcc8] ss:$28 sps:$4 sm:$0xff]  }
 0x6bd   :  { %6667 = vmatpush1.bf16.msra.mxu0 %v8563_v16  ;;  %v8628_v16 = vld [vmem:[#allocation11 + $0x5c0] ss:$28 sps:$4 sm:$0xff]  }
 0x6be   :  { %7830 = vmatpush3.bf16.msra.mxu1 %v8567_v17  ;;  %6668 = vmatprep.subr.bf16.mxu0 %v8570_v9  ;;  %v8632_v17 = vld [vmem:[#allocation11 + $0xb08] ss:$28 sps:$4 sm:$0xff]   ;;  %v8635_v9 = vld [vmem:[#allocation11 + $0x5fc] ss:$28 sps:$4 sm:$0xff]  }
 0x6bf   :  { %7831 = vmatprep.subr.bf16.mxu1 %v8571_v0  ;;  %v8636_v0 = vld [vmem:[#allocation11 + $0xd00] ss:$28 sps:$4 sm:$0xff]  }
 0x6c1   :  { %6669 = vmatpush1.bf16.msra.mxu0 %v8568_v28  ;;  %v8633_v28 = vld [vmem:[#allocation11 + $0x5f8] ss:$28 sps:$4 sm:$0xff]  }
 0x6c2   :  { %7832 = vmatpush3.bf16.msra.mxu1 %v8572_v33  ;;  %6670 = vmatprep.subr.bf16.mxu0 %v8575_v3  ;;  %v8637_v33 = vld [vmem:[#allocation11 + $0xb40] ss:$28 sps:$4 sm:$0xff]   ;;  %v8640_v3 = vld [vmem:[#allocation11 + $0x634] ss:$28 sps:$4 sm:$0xff]  }
 0x6c3   :  { %7833 = vmatprep.subr.bf16.mxu1 %v8576_v36  ;;  %v8641_v36 = vld [vmem:[#allocation11 + $0xd38] ss:$28 sps:$4 sm:$0xff]  }
 0x6c5   :  { %6671 = vmatpush1.bf16.msra.mxu0 %v8573_v44  ;;  %v8638_v44 = vld [vmem:[#allocation11 + $0x630] ss:$28 sps:$4 sm:$0xff]  }
 0x6c6   :  { %7834 = vmatpush3.bf16.msra.mxu1 %v8577_v55  ;;  %6681 = vmatprep.subr.bf16.mxu0 %v8580_v49  ;;  %v8642_v55 = vld [vmem:[#allocation11 + $0xb78] ss:$28 sps:$4 sm:$0xff]   ;;  %v8645_v49 = vld [vmem:[#allocation11 + $0x66c] ss:$28 sps:$4 sm:$0xff]  }
 0x6c7   :  { %7841 = vmatprep.subr.bf16.mxu1 %v8581_v1  ;;  %v8646_v1 = vld [vmem:[#allocation11 + $0xd70] ss:$28 sps:$4 sm:$0xff]  }
 0x6c8   :  { %6673 = vmatmul.mubr.bf16.vlgmr.msra.gmra.mrb[16].mxu0 %v9407_v6  ;;  %v8592_v6 = vld [vmem:[#allocation11 + $0x788] ss:$28 sps:$4 sm:$0xff]  }
 0x6c9   :  { %6877 = vmatmul.mubr.bf16.vlgmr.msra.gmra.mrb[28].mxu1 %v9423_v42  ;;  %6682 = vmatpush1.bf16.msra.mxu0 %v8578_v30  ;;  %v8643_v30 = vld [vmem:[#allocation11 + $0x668] ss:$28 sps:$4 sm:$0xff]  }
 0x6ca   :  { %6713 = vmatprep.mubr.bf16.mxu0 %v9413_v5  ;;  %7842 = vmatpush3.bf16.msra.mxu1 %v8582_v20  ;;  %v8597_v5 = vld [vmem:[#allocation11 + $0x7c0] ss:$28 sps:$4 sm:$0xff]   ;;  %v8647_v20 = vld [vmem:[#allocation11 + $0xbb0] ss:$28 sps:$4 sm:$0xff]  }
 0x6cb   :  { %6916 = vmatprep.mubr.bf16.mxu1 %v9425_v19  ;;  %6683 = vmatprep.subr.bf16.mxu0 %v8585_v10  ;;  %v8650_v10 = vld [vmem:[#allocation11 + $0x6a4] ss:$28 sps:$4 sm:$0xff]  }
 0x6cc   :  { %7843 = vmatprep.subr.bf16.mxu1 %v8586_v38  ;;  %v8651_v38 = vld [vmem:[#allocation11 + $0xda8] ss:$28 sps:$4 sm:$0xff]  }
 0x6cd   :  { %6684 = vmatpush1.bf16.msra.mxu0 %v8583_v46  ;;  %v8648_v46 = vld [vmem:[#allocation11 + $0x6a0] ss:$28 sps:$4 sm:$0xff]  }
 0x6ce   :  { %7844 = vmatpush3.bf16.msra.mxu1 %v8587_v47  ;;  %6685 = vmatprep.subr.bf16.mxu0 %v8590_v21  ;;  %v8652_v47 = vld [vmem:[#allocation11 + $0xbe8] ss:$28 sps:$4 sm:$0xff]   ;;  %v8655_v21 = vld [vmem:[#allocation11 + $0x6dc] ss:$28 sps:$4 sm:$0xff]  }
 0x6cf   :  { %7845 = vmatprep.subr.bf16.mxu1 %v8591_v31  ;;  %v8656_v31 = vld [vmem:[#allocation11 + $0xde0] ss:$28 sps:$4 sm:$0xff]  }
 0x6d1   :  { %6686 = vmatpush1.bf16.msra.mxu0 %v8588_v22  ;;  %v8653_v22 = vld [vmem:[#allocation11 + $0x6d8] ss:$28 sps:$4 sm:$0xff]  }
 0x6d2   :  { %7846 = vmatpush3.bf16.msra.mxu1 %v8592_v6  ;;  %6687 = vmatprep.subr.bf16.mxu0 %v8595_v35  ;;  %v8657_v6 = vld [vmem:[#allocation11 + $0xc20] ss:$28 sps:$4 sm:$0xff]   ;;  %v8660_v35 = vld [vmem:[#allocation11 + $0x714] ss:$28 sps:$4 sm:$0xff]  }
 0x6d3   :  { %7847 = vmatprep.subr.bf16.mxu1 %v8596_v37  ;;  %v8658_v37 = vld [vmem:[#allocation11 + $0x710] ss:$28 sps:$4 sm:$0xff]  }
 0x6d5   :  { %6688 = vmatpush1.bf16.msra.mxu0 %v8593_v24  ;;  %v8663_v24 = vld [vmem:[#allocation11 + $0x74c] ss:$28 sps:$4 sm:$0xff]  }
 0x6d6   :  { %7848 = vmatpush3.bf16.msra.mxu1 %v8597_v5  ;;  %6689 = vmatprep.subr.bf16.mxu0 %v8600_v23  ;;  %v8661_v5 = vld [vmem:[#allocation11 + $0x748] ss:$28 sps:$4 sm:$0xff]  }
 0x6d7   :  { %7849 = vmatprep.subr.bf16.mxu1 %v8601_v27  ;;  %v8666_v23 = vld [vmem:[#allocation11 + $0x784] ss:$28 sps:$4 sm:$0xff]  }
 0x6d8   :  { %v8664_v27 = vld [vmem:[#allocation11 + $0x780] ss:$28 sps:$4 sm:$0xff]  }
 0x6d9   :  { %6690 = vmatpush1.bf16.msra.mxu0 %v8598_v57  ;;  %v8669_v57 = vld [vmem:[#allocation11 + $0x7bc] ss:$28 sps:$4 sm:$0xff]  }
 0x6da   :  { %7850 = vmatpush3.bf16.msra.mxu1 %v8602_v62  ;;  %6691 = vmatprep.subr.bf16.mxu0 %v8605_v2  ;;  %v8667_v62 = vld [vmem:[#allocation11 + $0x7b8] ss:$28 sps:$4 sm:$0xff]  }
 0x6db   :  { %7851 = vmatprep.subr.bf16.mxu1 %v8606_v25  ;;  %v8672_v2 = vld [vmem:[#allocation11 + $0x7f4] ss:$28 sps:$4 sm:$0xff]  }
 0x6dc   :  { %v8670_v25 = vld [vmem:[#allocation11 + $0x7f0] ss:$28 sps:$4 sm:$0xff]  }
 0x6dd   :  { %6692 = vmatpush1.bf16.msra.mxu0 %v8603_v53  ;;  %v8673_v53 = vld [vmem:[#allocation11 + $0x828] ss:$28 sps:$4 sm:$0xff]  }
 0x6de   :  { %7852 = vmatpush3.bf16.msra.mxu1 %v8607_v29  ;;  %6693 = vmatprep.subr.bf16.mxu0 %v8610_v54  ;;  %v8678_v29 = vld [vmem:[#allocation11 + $0x864] ss:$28 sps:$4 sm:$0xff]   ;;  %v8681_v54 = vld [vmem:[#allocation11 + $0x89c] ss:$28 sps:$4 sm:$0xff]  }
 0x6df   :  { %7853 = vmatprep.subr.bf16.mxu1 %v8611_v40  ;;  %v8679_v40 = vld [vmem:[#allocation11 + $0x898] ss:$28 sps:$4 sm:$0xff]  }
 0x6e1   :  { %6694 = vmatpush1.bf16.msra.mxu0 %v8608_v7  ;;  %v8684_v7 = vld [vmem:[#allocation11 + $0x8d4] ss:$28 sps:$4 sm:$0xff]  }
 0x6e2   :  { %7854 = vmatpush3.bf16.msra.mxu1 %v8612_v63  ;;  %6695 = vmatprep.subr.bf16.mxu0 %v8615_v34  ;;  %v8682_v63 = vld [vmem:[#allocation11 + $0x8d0] ss:$28 sps:$4 sm:$0xff]  }
 0x6e3   :  { %7855 = vmatprep.subr.bf16.mxu1 %v8616_v39  ;;  %v8687_v34 = vld [vmem:[#allocation11 + $0x90c] ss:$28 sps:$4 sm:$0xff]  }
 0x6e4   :  { %v8685_v39 = vld [vmem:[#allocation11 + $0x908] ss:$28 sps:$4 sm:$0xff]  }
 0x6e5   :  { %6696 = vmatpush1.bf16.msra.mxu0 %v8613_v41  ;;  %v8690_v41 = vld [vmem:[#allocation11 + $0x944] ss:$28 sps:$4 sm:$0xff]  }
 0x6e6   :  { %7856 = vmatpush3.bf16.msra.mxu1 %v8617_v45  ;;  %6697 = vmatprep.subr.bf16.mxu0 %v8620_v8  ;;  %v8688_v45 = vld [vmem:[#allocation11 + $0x940] ss:$28 sps:$4 sm:$0xff]  }
 0x6e7   :  { %7863 = vmatprep.subr.bf16.mxu1 %v8621_v15  ;;  %v8693_v8 = vld [vmem:[#allocation11 + $0x97c] ss:$28 sps:$4 sm:$0xff]  }
 0x6e8   :  { %v8691_v15 = vld [vmem:[#allocation11 + $0x978] ss:$28 sps:$4 sm:$0xff]  }
 0x6e9   :  { %6917 = vmatmul.mubr.bf16.vlgmr.msra.gmra.mrb[32].mxu1 %v9437_v32  ;;  %6698 = vmatpush1.bf16.msra.mxu0 %v8618_v18  ;;  %v8696_v18 = vld [vmem:[#allocation11 + $0x9b4] ss:$28 sps:$4 sm:$0xff]  }
 0x6ea   :  { %7864 = vmatpush3.bf16.msra.mxu1 %v8622_v52  ;;  %6956 = vmatprep.mubr.bf16.mxu1 %v9440_v43  ;;  %v8694_v52 = vld [vmem:[#allocation11 + $0x9b0] ss:$28 sps:$4 sm:$0xff]  }
 0x6eb   :  { %6699 = vmatprep.subr.bf16.mxu0 %v8625_v51  ;;  %7865 = vmatprep.subr.bf16.mxu1 %v8626_v4  ;;  %v8699_v51 = vld [vmem:[#allocation11 + $0x9ec] ss:$28 sps:$4 sm:$0xff]  }
 0x6ec   :  { %v8697_v4 = vld [vmem:[#allocation11 + $0x9e8] ss:$28 sps:$4 sm:$0xff]  }
 0x6ed   :  { %6700 = vmatpush1.bf16.msra.mxu0 %v8623_v11  ;;  %v8702_v11 = vld [vmem:[#allocation11 + $0xa24] ss:$28 sps:$4 sm:$0xff]  }
 0x6ee   :  { %7866 = vmatpush3.bf16.msra.mxu1 %v8627_v12  ;;  %6701 = vmatprep.subr.bf16.mxu0 %v8630_v13  ;;  %v8700_v12 = vld [vmem:[#allocation11 + $0xa20] ss:$28 sps:$4 sm:$0xff]  }
 0x6ef   :  { %7867 = vmatprep.subr.bf16.mxu1 %v8631_v14  ;;  %v8705_v13 = vld [vmem:[#allocation11 + $0xa5c] ss:$28 sps:$4 sm:$0xff]  }
 0x6f0   :  { %v8703_v14 = vld [vmem:[#allocation11 + $0xa58] ss:$28 sps:$4 sm:$0xff]  }
 0x6f1   :  { %6702 = vmatpush1.bf16.msra.mxu0 %v8628_v16  ;;  %v8708_v16 = vld [vmem:[#allocation11 + $0xa94] ss:$28 sps:$4 sm:$0xff]  }
 0x6f2   :  { %7868 = vmatpush3.bf16.msra.mxu1 %v8632_v17  ;;  %6703 = vmatprep.subr.bf16.mxu0 %v8635_v9  ;;  %v8706_v17 = vld [vmem:[#allocation11 + $0xa90] ss:$28 sps:$4 sm:$0xff]  }
 0x6f3   :  { %7869 = vmatprep.subr.bf16.mxu1 %v8636_v0  ;;  %v8711_v9 = vld [vmem:[#allocation11 + $0xacc] ss:$28 sps:$4 sm:$0xff]  }
 0x6f4   :  { %v8709_v0 = vld [vmem:[#allocation11 + $0xac8] ss:$28 sps:$4 sm:$0xff]  }
 0x6f5   :  { %6704 = vmatpush1.bf16.msra.mxu0 %v8633_v28  ;;  %v8714_v28 = vld [vmem:[#allocation11 + $0xb04] ss:$28 sps:$4 sm:$0xff]  }
 0x6f6   :  { %7870 = vmatpush3.bf16.msra.mxu1 %v8637_v33  ;;  %6705 = vmatprep.subr.bf16.mxu0 %v8640_v3  ;;  %v8712_v33 = vld [vmem:[#allocation11 + $0xb00] ss:$28 sps:$4 sm:$0xff]  }
 0x6f7   :  { %7871 = vmatprep.subr.bf16.mxu1 %v8641_v36  ;;  %v8717_v3 = vld [vmem:[#allocation11 + $0xb3c] ss:$28 sps:$4 sm:$0xff]  }
 0x6f8   :  { %v8715_v36 = vld [vmem:[#allocation11 + $0xb38] ss:$28 sps:$4 sm:$0xff]  }
 0x6f9   :  { %6706 = vmatpush1.bf16.msra.mxu0 %v8638_v44  ;;  %v139_v44 = vld [vmem:[#allocation13 + $0x7] ss:$8 sm:$0xf] }
 0x6fa   :  { %7872 = vmatpush3.bf16.msra.mxu1 %v8642_v55  ;;  %6707 = vmatprep.subr.bf16.mxu0 %v8645_v49  ;;  %v140_v55 = vld [vmem:[#allocation13 + $0x7] ss:$8 sm:$0xf0] }
 0x6fb   :  { %7873 = vmatprep.subr.bf16.mxu1 %v8646_v1  ;;  %v8720_v49 = vld [vmem:[#allocation11 + $0xb74] ss:$28 sps:$4 sm:$0xff]   ;;  %v9467_v1 = vor.u32 %v140_v55, %v139_v44 }
 0x6fd   :  { %6708 = vmatpush1.bf16.msra.mxu0 %v8643_v30  ;;  %v8723_v30 = vld [vmem:[#allocation11 + $0xbac] ss:$28 sps:$4 sm:$0xff]  }
 0x6fe   :  { %7874 = vmatpush3.bf16.msra.mxu1 %v8647_v20  ;;  %6709 = vmatprep.subr.bf16.mxu0 %v8650_v10  ;;  %v3984_v20 = vrot.slane %v9467_v1, %v9208_v56  ;;  %v3980_v10 = vrot.slane %v9467_v1, %v9149_v61 }
 0x6ff   :  { %7875 = vmatprep.subr.bf16.mxu1 %v8651_v38  ;;  %v8721_v38 = vld [vmem:[#allocation11 + $0xba8] ss:$28 sps:$4 sm:$0xff]  }
 0x701   :  { %6710 = vmatpush1.bf16.msra.mxu0 %v8648_v46  ;;  %v3988_v46 = vrot.slane %v9467_v1, %v9211_v58 }
 0x702   :  { %7876 = vmatpush3.bf16.msra.mxu1 %v8652_v47  ;;  %6711 = vmatprep.subr.bf16.mxu0 %v8655_v21  ;;  %v8726_v47 = vld [vmem:[#allocation11 + $0xbe4] ss:$28 sps:$4 sm:$0xff]  }
 0x703   :  { %7877 = vmatprep.subr.bf16.mxu1 %v8656_v31 }
 0x705   :  { %6712 = vmatpush1.bf16.msra.mxu0 %v8653_v22 }
 0x706   :  { %7878 = vmatpush3.bf16.msra.mxu1 %v8657_v6  ;;  %6722 = vmatprep.subr.bf16.mxu0 %v8660_v35 }
 0x708   :  { %6714 = vmatmul.mubr.bf16.vlgmr.msra.gmra.mrb[16].mxu0 %v9423_v42  ;;  %v8675_v42 = vld [vmem:[#allocation11 + $0x82c] ss:$28 sps:$4 sm:$0xff]  }
 0x709   :  { %6957 = vmatmul.mubr.bf16.vlgmr.msra.gmra.mrb[36].mxu1 %v9448_v26  ;;  %6723 = vmatpush1.bf16.msra.mxu0 %v8658_v37 }
 0x70a   :  { %6754 = vmatprep.mubr.bf16.mxu0 %v9425_v19  ;;  %6724 = vmatprep.subr.bf16.mxu0 %v8663_v24  ;;  %v8676_v19 = vld [vmem:[#allocation11 + $0x860] ss:$28 sps:$4 sm:$0xff]  }
 0x70d   :  { %6725 = vmatpush1.bf16.msra.mxu0 %v8661_v5  ;;  %v8724_v5 = vld [vmem:[#allocation11 + $0xbe0] ss:$28 sps:$4 sm:$0xff]  }
 0x70e   :  { %6726 = vmatprep.subr.bf16.mxu0 %v8666_v23 }
 0x711   :  { %6727 = vmatpush1.bf16.msra.mxu0 %v8664_v27  ;;  %v8729_v27 = vld [vmem:[#allocation11 + $0xc1c] ss:$28 sps:$4 sm:$0xff]  }
 0x712   :  { %6728 = vmatprep.subr.bf16.mxu0 %v8669_v57  ;;  %v8727_v57 = vld [vmem:[#allocation11 + $0xc18] ss:$28 sps:$4 sm:$0xff]  }
 0x715   :  { %6729 = vmatpush1.bf16.msra.mxu0 %v8667_v62  ;;  %v8732_v62 = vld [vmem:[#allocation11 + $0xc54] ss:$28 sps:$4 sm:$0xff]  }
 0x716   :  { %6730 = vmatprep.subr.bf16.mxu0 %v8672_v2  ;;  %v8730_v2 = vld [vmem:[#allocation11 + $0xc50] ss:$28 sps:$4 sm:$0xff]  }
 0x719   :  { %6731 = vmatpush1.bf16.msra.mxu0 %v8670_v25  ;;  %v8735_v25 = vld [vmem:[#allocation11 + $0xc8c] ss:$28 sps:$4 sm:$0xff]  }
 0x71a   :  { %6732 = vmatprep.subr.bf16.mxu0 %v8675_v42 }
 0x71d   :  { %6733 = vmatpush1.bf16.msra.mxu0 %v8673_v53 }
 0x71e   :  { %6734 = vmatprep.subr.bf16.mxu0 %v8678_v29  ;;  %v8733_v29 = vld [vmem:[#allocation11 + $0xc88] ss:$28 sps:$4 sm:$0xff]  }
 0x721   :  { %6735 = vmatpush1.bf16.msra.mxu0 %v8676_v19 }
 0x722   :  { %6736 = vmatprep.subr.bf16.mxu0 %v8681_v54  ;;  %v8738_v54 = vld [vmem:[#allocation11 + $0xcc4] ss:$28 sps:$4 sm:$0xff]  }
 0x725   :  { %6737 = vmatpush1.bf16.msra.mxu0 %v8679_v40 }
 0x726   :  { %6738 = vmatprep.subr.bf16.mxu0 %v8684_v7  ;;  %v8736_v7 = vld [vmem:[#allocation11 + $0xcc0] ss:$28 sps:$4 sm:$0xff]  }
 0x729   :  { %6739 = vmatpush1.bf16.msra.mxu0 %v8682_v63  ;;  %v8741_v63 = vld [vmem:[#allocation11 + $0xcfc] ss:$28 sps:$4 sm:$0xff]  }
 0x72a   :  { %6740 = vmatprep.subr.bf16.mxu0 %v8687_v34  ;;  %v8739_v34 = vld [vmem:[#allocation11 + $0xcf8] ss:$28 sps:$4 sm:$0xff]  }
 0x72d   :  { %6741 = vmatpush1.bf16.msra.mxu0 %v8685_v39  ;;  %v8744_v39 = vld [vmem:[#allocation11 + $0xd34] ss:$28 sps:$4 sm:$0xff]  }
 0x72e   :  { %6742 = vmatprep.subr.bf16.mxu0 %v8690_v41  ;;  %v8742_v41 = vld [vmem:[#allocation11 + $0xd30] ss:$28 sps:$4 sm:$0xff]  }
 0x731   :  { %6743 = vmatpush1.bf16.msra.mxu0 %v8688_v45  ;;  %v8747_v45 = vld [vmem:[#allocation11 + $0xd6c] ss:$28 sps:$4 sm:$0xff]  }
 0x732   :  { %6744 = vmatprep.subr.bf16.mxu0 %v8693_v8  ;;  %v8745_v8 = vld [vmem:[#allocation11 + $0xd68] ss:$28 sps:$4 sm:$0xff]  }
 0x735   :  { %6745 = vmatpush1.bf16.msra.mxu0 %v8691_v15  ;;  %v8750_v15 = vld [vmem:[#allocation11 + $0xda4] ss:$28 sps:$4 sm:$0xff]  }
 0x736   :  { %6746 = vmatprep.subr.bf16.mxu0 %v8696_v18 }
 0x739   :  { %6747 = vmatpush1.bf16.msra.mxu0 %v8694_v52 }
 0x73a   :  { %6748 = vmatprep.subr.bf16.mxu0 %v8699_v51  ;;  %v8748_v51 = vld [vmem:[#allocation11 + $0xda0] ss:$28 sps:$4 sm:$0xff]  }
 0x73d   :  { %6749 = vmatpush1.bf16.msra.mxu0 %v8697_v4 }
 0x73e   :  { %6750 = vmatprep.subr.bf16.mxu0 %v8702_v11 }
 0x741   :  { %6751 = vmatpush1.bf16.msra.mxu0 %v8700_v12  ;;  %v8753_v12 = vld [vmem:[#allocation11 + $0xddc] ss:$28 sps:$4 sm:$0xff]  }
 0x742   :  { %6752 = vmatprep.subr.bf16.mxu0 %v8705_v13 }
 0x745   :  { %6753 = vmatpush1.bf16.msra.mxu0 %v8703_v14  ;;  %v8751_v14 = vld [vmem:[#allocation11 + $0xdd8] ss:$28 sps:$4 sm:$0xff]  }
 0x746   :  { %6763 = vmatprep.subr.bf16.mxu0 %v8708_v16  ;;  %v4000_v16 = vrot.slane %v9467_v1, %v9358_v59 }
 0x748   :  { %6755 = vmatmul.mubr.bf16.vlgmr.msra.gmra.mrb[16].mxu0 %v9437_v32  ;;  %v8718_v32 = vld [vmem:[#allocation11 + $0xb70] ss:$28 sps:$4 sm:$0xff]  }
 0x749   :  { %6764 = vmatpush1.bf16.msra.mxu0 %v8706_v17  ;;  %6795 = vmatprep.mubr.bf16.mxu0 %v9440_v43  ;;  %v3976_v43 = vrot.slane %v9467_v1, %v9146_v60 }
 0x74a   :  { %6765 = vmatprep.subr.bf16.mxu0 %v8711_v9 }
 0x74d   :  { %6766 = vmatpush1.bf16.msra.mxu0 %v8709_v0 }
 0x74e   :  { %6767 = vmatprep.subr.bf16.mxu0 %v8714_v28 }
 0x751   :  { %6768 = vmatpush1.bf16.msra.mxu0 %v8712_v33 }
 0x752   :  { %6769 = vmatprep.subr.bf16.mxu0 %v8717_v3 }
 0x755   :  { %6770 = vmatpush1.bf16.msra.mxu0 %v8715_v36 }
 0x756   :  { %6771 = vmatprep.subr.bf16.mxu0 %v8720_v49 }
 0x759   :  { %6772 = vmatpush1.bf16.msra.mxu0 %v8718_v32 }
 0x75a   :  { %6773 = vmatprep.subr.bf16.mxu0 %v8723_v30 }
 0x75b   :  { %v6469_v21 = vpop.f32.mrb[12].mxu0 }
 0x75c   :  { %v7905_v31 = vadd.f32 %v6469_v21, %v3976_v43  ;;  %v6633_v22 = vpop.f32.mrb[20].mxu1  ;;  %v6471_v6 = vpop.f32.mrb[13].mxu0  ;;  %v3992_v21 = vrot.slane %v9467_v1, %v9352_v48 }
 0x75d   :  { %v7907_v35 = vadd.f32 %v6633_v22, %v3984_v20  ;;  %v7906_v37 = vadd.f32 %v6471_v6, %v3980_v10  ;;  %v6635_v60 = vpop.f32.mrb[21].mxu1  ;;  %v6473_v24 = vpop.f32.mrb[14].mxu0  ;;  %6774 = vmatpush1.bf16.msra.mxu0 %v8721_v38 }
 0x75e   :  { %8782 = vtanh.f32 %v7905_v31  ;;  %v7908_v56 = vadd.f32 %v6635_v60, %v3988_v46  ;;  %v6637_v23 = vpop.f32.mrb[22].mxu1  ;;  %v6474_v61 = vpop.f32.mrb[15].mxu0  ;;  %6775 = vmatprep.subr.bf16.mxu0 %v8726_v47  ;;  %v3996_v31 = vrot.slane %v9467_v1, %v9355_v50 }
 0x75f   :  { %8784 = vtanh.f32 %v7907_v35  ;;  %v6638_v58 = vpop.f32.mrb[23].mxu1 }
 0x760   :  { %8786 = vtanh.f32 %v7906_v37 }
 0x761   :  { %8788 = vtanh.f32 %v7908_v56  ;;  %6776 = vmatpush1.bf16.msra.mxu0 %v8724_v5 }
 0x762   :  { %6777 = vmatprep.subr.bf16.mxu0 %v8729_v27 }
 0x765   :  { %6778 = vmatpush1.bf16.msra.mxu0 %v8727_v57 }
 0x766   :  { %6779 = vmatprep.subr.bf16.mxu0 %v8732_v62 }
 0x768   :  { %v8783_v42 = vpop.eup %8782 }
 0x769   :  { %v8785_v53 = vpop.eup %8784  ;;  %6971 = vst [vmem:[#allocation14] sm:$0xff] %v8783_v42  ;;  %6780 = vmatpush1.bf16.msra.mxu0 %v8730_v2 }
 0x76a   :  { %v8787_v19 = vpop.eup %8786  ;;  %6973 = vst [vmem:[#allocation14 + $0x10] sm:$0xff] %v8785_v53  ;;  %6781 = vmatprep.subr.bf16.mxu0 %v8735_v25 }
 0x76b   :  { %v8789_v40 = vpop.eup %8788  ;;  %6972 = vst [vmem:[#allocation14 + $0x8] sm:$0xff] %v8787_v19 }
 0x76c   :  { %6974 = vst [vmem:[#allocation14 + $0x18] sm:$0xff] %v8789_v40 }
 0x76d   :  { %6782 = vmatpush1.bf16.msra.mxu0 %v8733_v29 }
 0x76e   :  { %6783 = vmatprep.subr.bf16.mxu0 %v8738_v54 }
 0x771   :  { %6784 = vmatpush1.bf16.msra.mxu0 %v8736_v7 }
 0x772   :  { %6785 = vmatprep.subr.bf16.mxu0 %v8741_v63 }
 0x775   :  { %6786 = vmatpush1.bf16.msra.mxu0 %v8739_v34 }
 0x776   :  { %6787 = vmatprep.subr.bf16.mxu0 %v8744_v39 }
 0x779   :  { %6788 = vmatpush1.bf16.msra.mxu0 %v8742_v41 }
 0x77a   :  { %6789 = vmatprep.subr.bf16.mxu0 %v8747_v45 }
 0x77c   :  { %v7813_v18 = vpop.f32.mrb[24].mxu1 }
 0x77d   :  { %v7814_v52 = vpop.f32.mrb[25].mxu1  ;;  %6790 = vmatpush1.bf16.msra.mxu0 %v8745_v8 }
 0x77e   :  { %v7815_v4 = vadd.f32 %v7814_v52, %v7813_v18  ;;  %v7816_v11 = vpop.f32.mrb[26].mxu1  ;;  %6791 = vmatprep.subr.bf16.mxu0 %v8750_v15 }
 0x77f   :  { %v7817_v13 = vpop.f32.mrb[27].mxu1 }
 0x780   :  { %v6839_v0 = vadd.f32 %v7815_v4, %v4000_v16 }
 0x781   :  { %6792 = vmatpush1.bf16.msra.mxu0 %v8748_v51 }
 0x782   :  { %6793 = vmatprep.subr.bf16.mxu0 %v8753_v12 }
 0x785   :  { %6794 = vmatpush1.bf16.msra.mxu0 %v8751_v14 }
 0x788   :  { %6796 = vmatmul.mubr.bf16.vlgmr.msra.gmra.mrb[16].mxu0 %v9448_v26 }
 0x79c   :  { %v7835_v17 = vpop.f32.mrb[28].mxu1 }
 0x79d   :  { %v7836_v9 = vpop.f32.mrb[29].mxu1 }
 0x79e   :  { %v7837_v28 = vadd.f32 %v7836_v9, %v7835_v17  ;;  %v7838_v33 = vpop.f32.mrb[30].mxu1 }
 0x79f   :  { %v7839_v3 = vpop.f32.mrb[31].mxu1 }
 0x7a0   :  { %v6879_v36 = vadd.f32 %v7837_v28, %v6839_v0 }
 0x7bc   :  { %v7857_v44 = vpop.f32.mrb[32].mxu1 }
 0x7bd   :  { %v7858_v55 = vpop.f32.mrb[33].mxu1 }
 0x7be   :  { %v7859_v49 = vadd.f32 %v7858_v55, %v7857_v44  ;;  %v7860_v32 = vpop.f32.mrb[34].mxu1 }
 0x7bf   :  { %v7861_v30 = vpop.f32.mrb[35].mxu1 }
 0x7c0   :  { %v6919_v43 = vadd.f32 %v7859_v49, %v6879_v36 }
 0x7dc   :  { %v7879_v20 = vpop.f32.mrb[36].mxu1 }
 0x7dd   :  { %v7880_v10 = vpop.f32.mrb[37].mxu1 }
 0x7de   :  { %v7881_v38 = vadd.f32 %v7880_v10, %v7879_v20  ;;  %v7882_v26 = vpop.f32.mrb[38].mxu1 }
 0x7df   :  { %v7883_v46 = vpop.f32.mrb[39].mxu1 }
 0x7e0   :  { %v6959_v47 = vadd.f32 %v7881_v38, %v6919_v43 }
 0x7e2   :  { %8790 = vtanh.f32 %v6959_v47 }
 0x7ec   :  { %v8791_v59 = vpop.eup %8790 }
 0x7ed   :  { %6977 = vst [vmem:[#allocation14 + $0x30] sm:$0xff] %v8791_v59 }
 0x85b   :  { %v6797_v22 = vpop.f32.mrb[16].mxu0 }
 0x85c   :  { %v7909_v6 = vadd.f32 %v6797_v22, %v3992_v21  ;;  %v6799_v35 = vpop.f32.mrb[17].mxu0 }
 0x85d   :  { %v7910_v37 = vadd.f32 %v6799_v35, %v3996_v31  ;;  %v6801_v60 = vpop.f32.mrb[18].mxu0 }
 0x85e   :  { %8792 = vtanh.f32 %v7909_v6  ;;  %v6802_v24 = vpop.f32.mrb[19].mxu0 }
 0x85f   :  { %8794 = vtanh.f32 %v7910_v37 }
 0x868   :  { %v8793_v5 = vpop.eup %8792 }
 0x869   :  { %v8795_v56 = vpop.eup %8794  ;;  %6975 = vst [vmem:[#allocation14 + $0x20] sm:$0xff] %v8793_v5 }
 0x86a   :  { %6976 = vst [vmem:[#allocation14 + $0x28] sm:$0xff] %v8795_v56 }
 0x86b   :  { %8961 = shalt.err (!%p8958_p4)
}
 0x86c   :  { %s8962_s21 = scalar_lea.hbm %s9503_s7, 896 }
 0x86d   :  { %p8963_p5 = scmp.ne.s32.totalorder %s9503_s7, %s8962_s21  ;;  %p8966_p6 = scmp.lt.u32.totalorder %s8962_s21, %s9503_s7 }
 0x86f   :  { %p8968_p7 = pnand %p8966_p6, %p8963_p5 }
 0x871   :  { %8971 = shalt.err (!%p8968_p7)
}
 0x872   :  { %6987 = dma.vmem_to_hbm [thread:$0]  %s6985_s11, 896, %s9503_s7, [#allocation4]  }
 0x873   :  { %8980 = dma.done.wait [#allocation4], 896  }
 0x874   :  { %8981 = vsyncadd [#allocation4], 4294966400 }
 0x875   :  { %6991 = vsyncpa [#allocation3], 1 }
 0x876   :  { %6992 = vsyncpa [#allocation6], 1 }
 0x877   :  { %6993 = vsyncpa [#allocation9], 1 }
 0x878   :  { %6994 = vsyncpa [#allocation12], 1 }
 0x879   :  { %6995 = vsyncpa [#allocation4], 1 }

</bundles_post_ra>
